<compile_context>
chip_gen: v7x
topology: tpu7x:2x2x1
jax: 0.10.0
libtpu: 0.0.40
codegen_flags: <defaults>
</compile_context>

<pallas_src>
import jax
import jax.numpy as jnp
from jax.experimental import pallas as pl
from jax.experimental.pallas import tpu as pltpu


def _basic_block_kernel(x_ref, w1_ref, b1_ref, w2_ref, b2_ref, out_ref,
                        xpad_ref, midpad_ref, col_ref):
    """Fused conv3x3+BN+ReLU -> conv3x3+BN -> +residual -> ReLU for one image."""
    _, H, W, C = x_ref.shape
    C_p = xpad_ref.shape[-1]          # channels padded to a multiple of 128 (lanes)
    HW = H * W

    # Zero halo + channel padding every step (scratch is reused across grid steps and
    # possibly split across TensorCores), then place the image into the interior.
    xpad_ref[...] = jnp.zeros_like(xpad_ref)
    midpad_ref[...] = jnp.zeros_like(midpad_ref)
    xpad_ref[1:H + 1, 1:W + 1, 0:C] = x_ref[0].astype(jnp.float32)

    def im2col(src_ref):
        # One shifted (H, W, C_p) slab per tap -> lane-dense, lane-aligned column block.
        for dy in range(3):
            for dx in range(3):
                t = dy * 3 + dx
                col_ref[:, t * C_p:(t + 1) * C_p] = (
                    src_ref[dy:dy + H, dx:dx + W, :]
                    .reshape(HW, C_p).astype(col_ref.dtype))

    # conv1 (BN1 scale folded into w1) + bias + ReLU -> padded VMEM intermediate.
    im2col(xpad_ref)
    y1 = jnp.dot(col_ref[...], w1_ref[...], preferred_element_type=jnp.float32)
    y1 = jnp.maximum(y1 + b1_ref[...], 0.0)
    midpad_ref[1:H + 1, 1:W + 1, :] = y1.reshape(H, W, C_p)

    # conv2 (BN2 scale folded into w2) + bias + residual + ReLU.
    im2col(midpad_ref)
    y2 = jnp.dot(col_ref[...], w2_ref[...], preferred_element_type=jnp.float32)
    res = xpad_ref[1:H + 1, 1:W + 1, :].reshape(HW, C_p)      # channel-padded residual
    y2 = jnp.maximum(y2 + b2_ref[...] + res, 0.0)

    # Transpose to channel-major so the HBM store is lane-dense (flattened NCHW).
    out_ref[0] = jnp.transpose(y2)[0:C, :].astype(out_ref.dtype)


def _round_up(x, m):
    return (x + m - 1) // m * m


def _fold_bn(gamma, beta, running_mean, running_var, eps=1e-5):
    scale = gamma / jnp.sqrt(running_var + eps)
    bias = beta - running_mean * scale
    return scale, bias


def _pack_conv_bn(w_hwio, scale, c_pad, dtype):
    """Fold BN scale into the conv weight and pack to (9*C_pad, C_pad), K-major."""
    kh, kw, cin, cout = w_hwio.shape
    w = w_hwio * scale[None, None, None, :]
    w = jnp.pad(w, ((0, 0), (0, 0), (0, c_pad - cin), (0, c_pad - cout)))
    return w.reshape(kh * kw * c_pad, c_pad).astype(dtype)


def basic_block_forward(x_nchw, params, *, matmul_dtype=jnp.float32):
    """BasicBlock forward. Input/output are NCHW (PyTorch convention).

    matmul_dtype: jnp.float32 (default) or jnp.bfloat16 (recommended for v6e/v7x);
    the epilogue (bias / residual / ReLU) always runs in f32.
    """
    N, C, H, W = x_nchw.shape
    C_p = _round_up(C, 128)
    HW = H * W

    s1, b1 = _fold_bn(params["gamma1"], params["beta1"], params["mean1"], params["var1"])
    s2, b2 = _fold_bn(params["gamma2"], params["beta2"], params["mean2"], params["var2"])
    w1p = _pack_conv_bn(params["w1"], s1, C_p, matmul_dtype)
    w2p = _pack_conv_bn(params["w2"], s2, C_p, matmul_dtype)
    b1p = jnp.pad(b1, (0, C_p - C)).reshape(1, C_p).astype(jnp.float32)
    b2p = jnp.pad(b2, (0, C_p - C)).reshape(1, C_p).astype(jnp.float32)

    # Single NCHW -> NHWC pass on the way in (channels-last inside the kernel).
    x_nhwc = jnp.transpose(x_nchw, (0, 2, 3, 1))

    flops = 2 * (2 * N * H * W * 9 * C * C)       # two 3x3 convs
    bytes_accessed = (4 * (x_nhwc.size + N * C * HW + b1p.size + b2p.size)
                      + (w1p.size + w2p.size) * w1p.dtype.itemsize)

    out_flat = pl.pallas_call(
        _basic_block_kernel,
        out_shape=jax.ShapeDtypeStruct((N, C, HW), x_nchw.dtype),
        grid_spec=pltpu.PrefetchScalarGridSpec(
            num_scalar_prefetch=0,
            grid=(N,),
            in_specs=[
                pl.BlockSpec((1, H, W, C), lambda n: (n, 0, 0, 0)),     # image
                pl.BlockSpec((9 * C_p, C_p), lambda n: (0, 0)),         # packed w1*scale1
                pl.BlockSpec((1, C_p), lambda n: (0, 0)),               # bias1
                pl.BlockSpec((9 * C_p, C_p), lambda n: (0, 0)),         # packed w2*scale2
                pl.BlockSpec((1, C_p), lambda n: (0, 0)),               # bias2
            ],
            out_specs=pl.BlockSpec((1, C, HW), lambda n: (n, 0, 0)),    # flattened NCHW
            scratch_shapes=[
                pltpu.VMEM((H + 2, W + 2, C_p), jnp.float32),   # padded input
                pltpu.VMEM((H + 2, W + 2, C_p), jnp.float32),   # padded intermediate
                pltpu.VMEM((HW, 9 * C_p), matmul_dtype),        # im2col columns
            ],
        ),
        compiler_params=pltpu.CompilerParams(
            dimension_semantics=("parallel",),        # batch axis -> megacore / 2 TCs
            vmem_limit_bytes=32 * 1024 * 1024,        # explicit budget, safe on v5e..v7x
        ),
        cost_estimate=pl.CostEstimate(flops=flops, transcendentals=0,
                                      bytes_accessed=bytes_accessed),
    )(x_nhwc, w1p, b1p, w2p, b2p)

    return out_flat.reshape(N, C, H, W)


def _reference_forward(x_nchw, params):
    """Plain-JAX reference (lax conv) for a sanity check."""
    x = jnp.transpose(x_nchw, (0, 2, 3, 1))
    s1, b1 = _fold_bn(params["gamma1"], params["beta1"], params["mean1"], params["var1"])
    s2, b2 = _fold_bn(params["gamma2"], params["beta2"], params["mean2"], params["var2"])

    def conv(inp, w):
        return jax.lax.conv_general_dilated(
            inp, w, window_strides=(1, 1), padding="SAME",
            dimension_numbers=("NHWC", "HWIO", "NHWC"))

    out = jnp.maximum(conv(x, params["w1"]) * s1 + b1, 0.0)
    out = conv(out, params["w2"]) * s2 + b2 + x
    out = jnp.maximum(out, 0.0)
    return jnp.transpose(out, (0, 3, 1, 2))


if __name__ == "__main__":
    key = jax.random.PRNGKey(0)
    N, C, H, W = 2, 4, 16, 16        # inplanes == planes, stride=1, identity shortcut
    ks = jax.random.split(key, 9)

    x = jax.random.normal(ks[0], (N, C, H, W), jnp.float32)
    params = {
        "w1": 0.1 * jax.random.normal(ks[1], (3, 3, C, C), jnp.float32),   # HWIO
        "w2": 0.1 * jax.random.normal(ks[2], (3, 3, C, C), jnp.float32),
        "gamma1": 1.0 + 0.1 * jax.random.normal(ks[3], (C,), jnp.float32),
        "beta1": 0.1 * jax.random.normal(ks[4], (C,), jnp.float32),
        "mean1": 0.1 * jax.random.normal(ks[5], (C,), jnp.float32),
        "var1": jnp.abs(jax.random.normal(ks[6], (C,), jnp.float32)) + 0.5,
        "gamma2": 1.0 + 0.1 * jax.random.normal(ks[7], (C,), jnp.float32),
        "beta2": 0.1 * jax.random.normal(ks[8], (C,), jnp.float32),
        "mean2": jnp.zeros((C,), jnp.float32),
        "var2": jnp.ones((C,), jnp.float32),
    }

    out = jax.block_until_ready(basic_block_forward(x, params))
    ref = jax.block_until_ready(_reference_forward(x, params))
    assert out.shape == (N, C, H, W)
    assert jnp.allclose(out, ref, atol=1e-3, rtol=1e-3)
    print("KERNEL_OK")
</pallas_src>

<mosaic_0001>
module attributes {stable_mosaic.version = 11 : i64} {
  func.func @_basic_block_kernel(%arg0: i32, %arg1: memref<1x16x16x4xf32, #tpu.memory_space<vmem>>, %arg2: memref<1152x128xf32, #tpu.memory_space<vmem>>, %arg3: memref<1x128xf32, #tpu.memory_space<vmem>>, %arg4: memref<1152x128xf32, #tpu.memory_space<vmem>>, %arg5: memref<1x128xf32, #tpu.memory_space<vmem>>, %arg6: memref<1x4x256xf32, #tpu.memory_space<vmem>>, %arg7: memref<18x18x128xf32, #tpu.memory_space<vmem>>, %arg8: memref<18x18x128xf32, #tpu.memory_space<vmem>>, %arg9: memref<256x1152xf32, #tpu.memory_space<vmem>>) attributes {dimension_semantics = [#tpu.dimension_semantics<parallel>], iteration_bounds = array<i64: 2>, scalar_prefetch = 0 : i64, scratch_operands = 3 : i64, tpu.core_type = #tpu.core_type<tc>, window_params = [{transform_indices = @transform_0, window_bounds = array<i64: 1, 16, 16, 4>}, {pipeline_mode = #tpu.pipeline_mode<synchronous>, transform_indices = @transform_1, window_bounds = array<i64: 1152, 128>}, {pipeline_mode = #tpu.pipeline_mode<synchronous>, transform_indices = @transform_2, window_bounds = array<i64: 1, 128>}, {pipeline_mode = #tpu.pipeline_mode<synchronous>, transform_indices = @transform_3, window_bounds = array<i64: 1152, 128>}, {pipeline_mode = #tpu.pipeline_mode<synchronous>, transform_indices = @transform_4, window_bounds = array<i64: 1, 128>}, {transform_indices = @transform_5, window_bounds = array<i64: 1, 4, 256>}]} {
    %cst = arith.constant 0.000000e+00 : f32
    %0 = vector.broadcast %cst : f32 to vector<18x18x128xf32>
    %c0 = arith.constant 0 : index
    %c0_0 = arith.constant 0 : index
    %c0_1 = arith.constant 0 : index
    %1 = vector.load %arg7[%c0, %c0_0, %c0_1] : memref<18x18x128xf32, #tpu.memory_space<vmem>>, vector<18x18x128xf32>
    tpu.vector_store %arg7[%c0, %c0_0, %c0_1], %0 {strides = array<i32>} : memref<18x18x128xf32, #tpu.memory_space<vmem>>, vector<18x18x128xf32>,
    %cst_2 = arith.constant 0.000000e+00 : f32
    %2 = vector.broadcast %cst_2 : f32 to vector<18x18x128xf32>
    %c0_3 = arith.constant 0 : index
    %c0_4 = arith.constant 0 : index
    %c0_5 = arith.constant 0 : index
    %3 = vector.load %arg8[%c0_3, %c0_4, %c0_5] : memref<18x18x128xf32, #tpu.memory_space<vmem>>, vector<18x18x128xf32>
    tpu.vector_store %arg8[%c0_3, %c0_4, %c0_5], %2 {strides = array<i32>} : memref<18x18x128xf32, #tpu.memory_space<vmem>>, vector<18x18x128xf32>,
    %c0_6 = arith.constant 0 : index
    %c0_7 = arith.constant 0 : index
    %c0_8 = arith.constant 0 : index
    %c0_9 = arith.constant 0 : index
    %4 = vector.load %arg1[%c0_6, %c0_7, %c0_8, %c0_9] : memref<1x16x16x4xf32, #tpu.memory_space<vmem>>, vector<1x16x16x4xf32>
    %5 = vector.shape_cast %4 : vector<1x16x16x4xf32> to vector<16x16x4xf32>
    %c1 = arith.constant 1 : index
    %c1_10 = arith.constant 1 : index
    %c0_11 = arith.constant 0 : index
    %6 = vector.load %arg7[%c1, %c1_10, %c0_11] : memref<18x18x128xf32, #tpu.memory_space<vmem>>, vector<16x16x4xf32>
    tpu.vector_store %arg7[%c1, %c1_10, %c0_11], %5 {strides = array<i32>} : memref<18x18x128xf32, #tpu.memory_space<vmem>>, vector<16x16x4xf32>,
    %c0_12 = arith.constant 0 : index
    %c0_13 = arith.constant 0 : index
    %c0_14 = arith.constant 0 : index
    %7 = vector.load %arg7[%c0_12, %c0_13, %c0_14] : memref<18x18x128xf32, #tpu.memory_space<vmem>>, vector<16x16x128xf32>
    %8 = vector.shape_cast %7 : vector<16x16x128xf32> to vector<256x128xf32>
    %c0_15 = arith.constant 0 : index
    %c0_16 = arith.constant 0 : index
    %9 = vector.load %arg9[%c0_15, %c0_16] : memref<256x1152xf32, #tpu.memory_space<vmem>>, vector<256x128xf32>
    tpu.vector_store %arg9[%c0_15, %c0_16], %8 {strides = array<i32>} : memref<256x1152xf32, #tpu.memory_space<vmem>>, vector<256x128xf32>,
    %c0_17 = arith.constant 0 : index
    %c1_18 = arith.constant 1 : index
    %c0_19 = arith.constant 0 : index
    %10 = vector.load %arg7[%c0_17, %c1_18, %c0_19] : memref<18x18x128xf32, #tpu.memory_space<vmem>>, vector<16x16x128xf32>
    %11 = vector.shape_cast %10 : vector<16x16x128xf32> to vector<256x128xf32>
    %c0_20 = arith.constant 0 : index
    %c128 = arith.constant 128 : index
    %12 = vector.load %arg9[%c0_20, %c128] : memref<256x1152xf32, #tpu.memory_space<vmem>>, vector<256x128xf32>
    tpu.vector_store %arg9[%c0_20, %c128], %11 {strides = array<i32>} : memref<256x1152xf32, #tpu.memory_space<vmem>>, vector<256x128xf32>,
    %c0_21 = arith.constant 0 : index
    %c2 = arith.constant 2 : index
    %c0_22 = arith.constant 0 : index
    %13 = vector.load %arg7[%c0_21, %c2, %c0_22] : memref<18x18x128xf32, #tpu.memory_space<vmem>>, vector<16x16x128xf32>
    %14 = vector.shape_cast %13 : vector<16x16x128xf32> to vector<256x128xf32>
    %c0_23 = arith.constant 0 : index
    %c256 = arith.constant 256 : index
    %15 = vector.load %arg9[%c0_23, %c256] : memref<256x1152xf32, #tpu.memory_space<vmem>>, vector<256x128xf32>
    tpu.vector_store %arg9[%c0_23, %c256], %14 {strides = array<i32>} : memref<256x1152xf32, #tpu.memory_space<vmem>>, vector<256x128xf32>,
    %c1_24 = arith.constant 1 : index
    %c0_25 = arith.constant 0 : index
    %c0_26 = arith.constant 0 : index
    %16 = vector.load %arg7[%c1_24, %c0_25, %c0_26] : memref<18x18x128xf32, #tpu.memory_space<vmem>>, vector<16x16x128xf32>
    %17 = vector.shape_cast %16 : vector<16x16x128xf32> to vector<256x128xf32>
    %c0_27 = arith.constant 0 : index
    %c384 = arith.constant 384 : index
    %18 = vector.load %arg9[%c0_27, %c384] : memref<256x1152xf32, #tpu.memory_space<vmem>>, vector<256x128xf32>
    tpu.vector_store %arg9[%c0_27, %c384], %17 {strides = array<i32>} : memref<256x1152xf32, #tpu.memory_space<vmem>>, vector<256x128xf32>,
    %c1_28 = arith.constant 1 : index
    %c1_29 = arith.constant 1 : index
    %c0_30 = arith.constant 0 : index
    %19 = vector.load %arg7[%c1_28, %c1_29, %c0_30] : memref<18x18x128xf32, #tpu.memory_space<vmem>>, vector<16x16x128xf32>
    %20 = vector.shape_cast %19 : vector<16x16x128xf32> to vector<256x128xf32>
    %c0_31 = arith.constant 0 : index
    %c512 = arith.constant 512 : index
    %21 = vector.load %arg9[%c0_31, %c512] : memref<256x1152xf32, #tpu.memory_space<vmem>>, vector<256x128xf32>
    tpu.vector_store %arg9[%c0_31, %c512], %20 {strides = array<i32>} : memref<256x1152xf32, #tpu.memory_space<vmem>>, vector<256x128xf32>,
    %c1_32 = arith.constant 1 : index
    %c2_33 = arith.constant 2 : index
    %c0_34 = arith.constant 0 : index
    %22 = vector.load %arg7[%c1_32, %c2_33, %c0_34] : memref<18x18x128xf32, #tpu.memory_space<vmem>>, vector<16x16x128xf32>
    %23 = vector.shape_cast %22 : vector<16x16x128xf32> to vector<256x128xf32>
    %c0_35 = arith.constant 0 : index
    %c640 = arith.constant 640 : index
    %24 = vector.load %arg9[%c0_35, %c640] : memref<256x1152xf32, #tpu.memory_space<vmem>>, vector<256x128xf32>
    tpu.vector_store %arg9[%c0_35, %c640], %23 {strides = array<i32>} : memref<256x1152xf32, #tpu.memory_space<vmem>>, vector<256x128xf32>,
    %c2_36 = arith.constant 2 : index
    %c0_37 = arith.constant 0 : index
    %c0_38 = arith.constant 0 : index
    %25 = vector.load %arg7[%c2_36, %c0_37, %c0_38] : memref<18x18x128xf32, #tpu.memory_space<vmem>>, vector<16x16x128xf32>
    %26 = vector.shape_cast %25 : vector<16x16x128xf32> to vector<256x128xf32>
    %c0_39 = arith.constant 0 : index
    %c768 = arith.constant 768 : index
    %27 = vector.load %arg9[%c0_39, %c768] : memref<256x1152xf32, #tpu.memory_space<vmem>>, vector<256x128xf32>
    tpu.vector_store %arg9[%c0_39, %c768], %26 {strides = array<i32>} : memref<256x1152xf32, #tpu.memory_space<vmem>>, vector<256x128xf32>,
    %c2_40 = arith.constant 2 : index
    %c1_41 = arith.constant 1 : index
    %c0_42 = arith.constant 0 : index
    %28 = vector.load %arg7[%c2_40, %c1_41, %c0_42] : memref<18x18x128xf32, #tpu.memory_space<vmem>>, vector<16x16x128xf32>
    %29 = vector.shape_cast %28 : vector<16x16x128xf32> to vector<256x128xf32>
    %c0_43 = arith.constant 0 : index
    %c896 = arith.constant 896 : index
    %30 = vector.load %arg9[%c0_43, %c896] : memref<256x1152xf32, #tpu.memory_space<vmem>>, vector<256x128xf32>
    tpu.vector_store %arg9[%c0_43, %c896], %29 {strides = array<i32>} : memref<256x1152xf32, #tpu.memory_space<vmem>>, vector<256x128xf32>,
    %c2_44 = arith.constant 2 : index
    %c2_45 = arith.constant 2 : index
    %c0_46 = arith.constant 0 : index
    %31 = vector.load %arg7[%c2_44, %c2_45, %c0_46] : memref<18x18x128xf32, #tpu.memory_space<vmem>>, vector<16x16x128xf32>
    %32 = vector.shape_cast %31 : vector<16x16x128xf32> to vector<256x128xf32>
    %c0_47 = arith.constant 0 : index
    %c1024 = arith.constant 1024 : index
    %33 = vector.load %arg9[%c0_47, %c1024] : memref<256x1152xf32, #tpu.memory_space<vmem>>, vector<256x128xf32>
    tpu.vector_store %arg9[%c0_47, %c1024], %32 {strides = array<i32>} : memref<256x1152xf32, #tpu.memory_space<vmem>>, vector<256x128xf32>,
    %c0_48 = arith.constant 0 : index
    %c0_49 = arith.constant 0 : index
    %34 = vector.load %arg9[%c0_48, %c0_49] : memref<256x1152xf32, #tpu.memory_space<vmem>>, vector<256x1152xf32>
    %c0_50 = arith.constant 0 : index
    %c0_51 = arith.constant 0 : index
    %35 = vector.load %arg2[%c0_50, %c0_51] : memref<1152x128xf32, #tpu.memory_space<vmem>>, vector<1152x128xf32>
    %cst_52 = arith.constant dense<0.000000e+00> : vector<256x128xf32>
    %36 = tpu.matmul %34, %35, %cst_52 {dimension_numbers = #tpu.dot_dimension_numbers<[1], [0], [0], [1], [0, 0, 1, 1], [], []>} : vector<256x1152xf32>, vector<1152x128xf32>, vector<256x128xf32> -> vector<256x128xf32>
    %c0_53 = arith.constant 0 : index
    %c0_54 = arith.constant 0 : index
    %37 = vector.load %arg3[%c0_53, %c0_54] : memref<1x128xf32, #tpu.memory_space<vmem>>, vector<1x128xf32>
    %38 = vector.broadcast %37 : vector<1x128xf32> to vector<256x128xf32>
    %39 = arith.addf %36, %38 : vector<256x128xf32>
    %cst_55 = arith.constant 0.000000e+00 : f32
    %40 = vector.broadcast %cst_55 : f32 to vector<256x128xf32>
    %41 = arith.maximumf %39, %40 : vector<256x128xf32>
    %42 = vector.shape_cast %41 : vector<256x128xf32> to vector<16x16x128xf32>
    %c1_56 = arith.constant 1 : index
    %c1_57 = arith.constant 1 : index
    %c0_58 = arith.constant 0 : index
    %43 = vector.load %arg8[%c1_56, %c1_57, %c0_58] : memref<18x18x128xf32, #tpu.memory_space<vmem>>, vector<16x16x128xf32>
    tpu.vector_store %arg8[%c1_56, %c1_57, %c0_58], %42 {strides = array<i32>} : memref<18x18x128xf32, #tpu.memory_space<vmem>>, vector<16x16x128xf32>,
    %c0_59 = arith.constant 0 : index
    %c0_60 = arith.constant 0 : index
    %c0_61 = arith.constant 0 : index
    %44 = vector.load %arg8[%c0_59, %c0_60, %c0_61] : memref<18x18x128xf32, #tpu.memory_space<vmem>>, vector<16x16x128xf32>
    %45 = vector.shape_cast %44 : vector<16x16x128xf32> to vector<256x128xf32>
    %c0_62 = arith.constant 0 : index
    %c0_63 = arith.constant 0 : index
    %46 = vector.load %arg9[%c0_62, %c0_63] : memref<256x1152xf32, #tpu.memory_space<vmem>>, vector<256x128xf32>
    tpu.vector_store %arg9[%c0_62, %c0_63], %45 {strides = array<i32>} : memref<256x1152xf32, #tpu.memory_space<vmem>>, vector<256x128xf32>,
    %c0_64 = arith.constant 0 : index
    %c1_65 = arith.constant 1 : index
    %c0_66 = arith.constant 0 : index
    %47 = vector.load %arg8[%c0_64, %c1_65, %c0_66] : memref<18x18x128xf32, #tpu.memory_space<vmem>>, vector<16x16x128xf32>
    %48 = vector.shape_cast %47 : vector<16x16x128xf32> to vector<256x128xf32>
    %c0_67 = arith.constant 0 : index
    %c128_68 = arith.constant 128 : index
    %49 = vector.load %arg9[%c0_67, %c128_68] : memref<256x1152xf32, #tpu.memory_space<vmem>>, vector<256x128xf32>
    tpu.vector_store %arg9[%c0_67, %c128_68], %48 {strides = array<i32>} : memref<256x1152xf32, #tpu.memory_space<vmem>>, vector<256x128xf32>,
    %c0_69 = arith.constant 0 : index
    %c2_70 = arith.constant 2 : index
    %c0_71 = arith.constant 0 : index
    %50 = vector.load %arg8[%c0_69, %c2_70, %c0_71] : memref<18x18x128xf32, #tpu.memory_space<vmem>>, vector<16x16x128xf32>
    %51 = vector.shape_cast %50 : vector<16x16x128xf32> to vector<256x128xf32>
    %c0_72 = arith.constant 0 : index
    %c256_73 = arith.constant 256 : index
    %52 = vector.load %arg9[%c0_72, %c256_73] : memref<256x1152xf32, #tpu.memory_space<vmem>>, vector<256x128xf32>
    tpu.vector_store %arg9[%c0_72, %c256_73], %51 {strides = array<i32>} : memref<256x1152xf32, #tpu.memory_space<vmem>>, vector<256x128xf32>,
    %c1_74 = arith.constant 1 : index
    %c0_75 = arith.constant 0 : index
    %c0_76 = arith.constant 0 : index
    %53 = vector.load %arg8[%c1_74, %c0_75, %c0_76] : memref<18x18x128xf32, #tpu.memory_space<vmem>>, vector<16x16x128xf32>
    %54 = vector.shape_cast %53 : vector<16x16x128xf32> to vector<256x128xf32>
    %c0_77 = arith.constant 0 : index
    %c384_78 = arith.constant 384 : index
    %55 = vector.load %arg9[%c0_77, %c384_78] : memref<256x1152xf32, #tpu.memory_space<vmem>>, vector<256x128xf32>
    tpu.vector_store %arg9[%c0_77, %c384_78], %54 {strides = array<i32>} : memref<256x1152xf32, #tpu.memory_space<vmem>>, vector<256x128xf32>,
    %c1_79 = arith.constant 1 : index
    %c1_80 = arith.constant 1 : index
    %c0_81 = arith.constant 0 : index
    %56 = vector.load %arg8[%c1_79, %c1_80, %c0_81] : memref<18x18x128xf32, #tpu.memory_space<vmem>>, vector<16x16x128xf32>
    %57 = vector.shape_cast %56 : vector<16x16x128xf32> to vector<256x128xf32>
    %c0_82 = arith.constant 0 : index
    %c512_83 = arith.constant 512 : index
    %58 = vector.load %arg9[%c0_82, %c512_83] : memref<256x1152xf32, #tpu.memory_space<vmem>>, vector<256x128xf32>
    tpu.vector_store %arg9[%c0_82, %c512_83], %57 {strides = array<i32>} : memref<256x1152xf32, #tpu.memory_space<vmem>>, vector<256x128xf32>,
    %c1_84 = arith.constant 1 : index
    %c2_85 = arith.constant 2 : index
    %c0_86 = arith.constant 0 : index
    %59 = vector.load %arg8[%c1_84, %c2_85, %c0_86] : memref<18x18x128xf32, #tpu.memory_space<vmem>>, vector<16x16x128xf32>
    %60 = vector.shape_cast %59 : vector<16x16x128xf32> to vector<256x128xf32>
    %c0_87 = arith.constant 0 : index
    %c640_88 = arith.constant 640 : index
    %61 = vector.load %arg9[%c0_87, %c640_88] : memref<256x1152xf32, #tpu.memory_space<vmem>>, vector<256x128xf32>
    tpu.vector_store %arg9[%c0_87, %c640_88], %60 {strides = array<i32>} : memref<256x1152xf32, #tpu.memory_space<vmem>>, vector<256x128xf32>,
    %c2_89 = arith.constant 2 : index
    %c0_90 = arith.constant 0 : index
    %c0_91 = arith.constant 0 : index
    %62 = vector.load %arg8[%c2_89, %c0_90, %c0_91] : memref<18x18x128xf32, #tpu.memory_space<vmem>>, vector<16x16x128xf32>
    %63 = vector.shape_cast %62 : vector<16x16x128xf32> to vector<256x128xf32>
    %c0_92 = arith.constant 0 : index
    %c768_93 = arith.constant 768 : index
    %64 = vector.load %arg9[%c0_92, %c768_93] : memref<256x1152xf32, #tpu.memory_space<vmem>>, vector<256x128xf32>
    tpu.vector_store %arg9[%c0_92, %c768_93], %63 {strides = array<i32>} : memref<256x1152xf32, #tpu.memory_space<vmem>>, vector<256x128xf32>,
    %c2_94 = arith.constant 2 : index
    %c1_95 = arith.constant 1 : index
    %c0_96 = arith.constant 0 : index
    %65 = vector.load %arg8[%c2_94, %c1_95, %c0_96] : memref<18x18x128xf32, #tpu.memory_space<vmem>>, vector<16x16x128xf32>
    %66 = vector.shape_cast %65 : vector<16x16x128xf32> to vector<256x128xf32>
    %c0_97 = arith.constant 0 : index
    %c896_98 = arith.constant 896 : index
    %67 = vector.load %arg9[%c0_97, %c896_98] : memref<256x1152xf32, #tpu.memory_space<vmem>>, vector<256x128xf32>
    tpu.vector_store %arg9[%c0_97, %c896_98], %66 {strides = array<i32>} : memref<256x1152xf32, #tpu.memory_space<vmem>>, vector<256x128xf32>,
    %c2_99 = arith.constant 2 : index
    %c2_100 = arith.constant 2 : index
    %c0_101 = arith.constant 0 : index
    %68 = vector.load %arg8[%c2_99, %c2_100, %c0_101] : memref<18x18x128xf32, #tpu.memory_space<vmem>>, vector<16x16x128xf32>
    %69 = vector.shape_cast %68 : vector<16x16x128xf32> to vector<256x128xf32>
    %c0_102 = arith.constant 0 : index
    %c1024_103 = arith.constant 1024 : index
    %70 = vector.load %arg9[%c0_102, %c1024_103] : memref<256x1152xf32, #tpu.memory_space<vmem>>, vector<256x128xf32>
    tpu.vector_store %arg9[%c0_102, %c1024_103], %69 {strides = array<i32>} : memref<256x1152xf32, #tpu.memory_space<vmem>>, vector<256x128xf32>,
    %c0_104 = arith.constant 0 : index
    %c0_105 = arith.constant 0 : index
    %71 = vector.load %arg9[%c0_104, %c0_105] : memref<256x1152xf32, #tpu.memory_space<vmem>>, vector<256x1152xf32>
    %c0_106 = arith.constant 0 : index
    %c0_107 = arith.constant 0 : index
    %72 = vector.load %arg4[%c0_106, %c0_107] : memref<1152x128xf32, #tpu.memory_space<vmem>>, vector<1152x128xf32>
    %cst_108 = arith.constant dense<0.000000e+00> : vector<256x128xf32>
    %73 = tpu.matmul %71, %72, %cst_108 {dimension_numbers = #tpu.dot_dimension_numbers<[1], [0], [0], [1], [0, 0, 1, 1], [], []>} : vector<256x1152xf32>, vector<1152x128xf32>, vector<256x128xf32> -> vector<256x128xf32>
    %c1_109 = arith.constant 1 : index
    %c1_110 = arith.constant 1 : index
    %c0_111 = arith.constant 0 : index
    %74 = vector.load %arg7[%c1_109, %c1_110, %c0_111] : memref<18x18x128xf32, #tpu.memory_space<vmem>>, vector<16x16x128xf32>
    %75 = vector.shape_cast %74 : vector<16x16x128xf32> to vector<256x128xf32>
    %c0_112 = arith.constant 0 : index
    %c0_113 = arith.constant 0 : index
    %76 = vector.load %arg5[%c0_112, %c0_113] : memref<1x128xf32, #tpu.memory_space<vmem>>, vector<1x128xf32>
    %77 = vector.broadcast %76 : vector<1x128xf32> to vector<256x128xf32>
    %78 = arith.addf %73, %77 : vector<256x128xf32>
    %79 = arith.addf %78, %75 : vector<256x128xf32>
    %cst_114 = arith.constant 0.000000e+00 : f32
    %80 = vector.broadcast %cst_114 : f32 to vector<256x128xf32>
    %81 = arith.maximumf %79, %80 : vector<256x128xf32>
    %82 = tpu.transpose %81, [1, 0] : vector<256x128xf32> -> vector<128x256xf32>
    %83 = vector.extract_strided_slice %82 {offsets = [0, 0], sizes = [4, 256], strides = [1, 1]} : vector<128x256xf32> to vector<4x256xf32>
    %c0_115 = arith.constant 0 : index
    %c0_116 = arith.constant 0 : index
    %c0_117 = arith.constant 0 : index
    %84 = vector.load %arg6[%c0_115, %c0_116, %c0_117] : memref<1x4x256xf32, #tpu.memory_space<vmem>>, vector<1x4x256xf32>
    %85 = vector.shape_cast %84 : vector<1x4x256xf32> to vector<4x256xf32>
    %86 = vector.shape_cast %83 : vector<4x256xf32> to vector<1x4x256xf32>
    tpu.vector_store %arg6[%c0_115, %c0_116, %c0_117], %86 {strides = array<i32>} : memref<1x4x256xf32, #tpu.memory_space<vmem>>, vector<1x4x256xf32>,
    return
  }
  func.func @transform_0(%arg0: i32) -> (i32, i32, i32, i32) {
    %c0_i32 = arith.constant 0 : i32
    %c0_i32_0 = arith.constant 0 : i32
    %c0_i32_1 = arith.constant 0 : i32
    %c0_i32_2 = arith.constant 0 : i32
    return %arg0, %c0_i32, %c0_i32_0, %c0_i32_1 : i32, i32, i32, i32
  }
  func.func @transform_1(%arg0: i32) -> (i32, i32) {
    %c0_i32 = arith.constant 0 : i32
    %c0_i32_0 = arith.constant 0 : i32
    %c0_i32_1 = arith.constant 0 : i32
    return %c0_i32, %c0_i32_0 : i32, i32
  }
  func.func @transform_2(%arg0: i32) -> (i32, i32) {
    %c0_i32 = arith.constant 0 : i32
    %c0_i32_0 = arith.constant 0 : i32
    %c0_i32_1 = arith.constant 0 : i32
    return %c0_i32, %c0_i32_0 : i32, i32
  }
  func.func @transform_3(%arg0: i32) -> (i32, i32) {
    %c0_i32 = arith.constant 0 : i32
    %c0_i32_0 = arith.constant 0 : i32
    %c0_i32_1 = arith.constant 0 : i32
    return %c0_i32, %c0_i32_0 : i32, i32
  }
  func.func @transform_4(%arg0: i32) -> (i32, i32) {
    %c0_i32 = arith.constant 0 : i32
    %c0_i32_0 = arith.constant 0 : i32
    %c0_i32_1 = arith.constant 0 : i32
    return %c0_i32, %c0_i32_0 : i32, i32
  }
  func.func @transform_5(%arg0: i32) -> (i32, i32, i32) {
    %c0_i32 = arith.constant 0 : i32
    %c0_i32_0 = arith.constant 0 : i32
    %c0_i32_1 = arith.constant 0 : i32
    return %arg0, %c0_i32, %c0_i32_0 : i32, i32, i32
  }
}

</mosaic_0001>

<bundles_post_ra>
// kernel: tpu_custom_call.1
= control target key start
LH: loop header
LB: loop body
LE: loop exit
PB: predicated region body
PF: predicated region fallthrough
CT: control target
= control target key end

     0   :  { %10 = vsyncpa [#allocation6], 0  ;;  %s8032_s0 = inlined_call_operand.vmem [shape: f32[2,16,16,4], index: 0, kind: input, shape index: {}]   ;;  %s8033_s1 = inlined_call_operand.hbm [shape: f32[1152,128], index: 1, kind: input, shape index: {}]   ;;  %s8034_s2 = inlined_call_operand.vmem [shape: f32[1,128], index: 2, kind: input, shape index: {}]   ;;  %s8035_s3 = inlined_call_operand.hbm [shape: f32[1152,128], index: 3, kind: input, shape index: {}]   ;;  %s8036_s4 = inlined_call_operand.vmem [shape: f32[1,128], index: 4, kind: input, shape index: {}]   ;;  %s8037_s5 = inlined_call_operand.hbm [shape: f32[2,4,256], index: 5, kind: output, shape index: {}]  }
   0x1   :  { %11 = vsyncpa [#allocation9], 0 }
   0x2   :  { %12 = vsyncpa [#allocation7], 0 }
   0x3   :  { %14 = vsyncpa [#allocation7 + $0x1], 0  ;;  %s6454_s18 = smov 0   ;;  %s6456_s19 = smov 0  }
   0x4   :  { %s6458_s20 = smov 0   ;;  %s6460_s21 = smov 0  }
   0x5 LB: > { %s6475_s22 = sadd.s32 4294967295, %s6415_s21   ;;  %s5035_s23 = sadd.s32 4294967294, %s6415_s21   ;;  %s6415_s21 = sphi %s6460_s21, %s8154_s21   ;;  %s6411_s20 = sphi %s6458_s20, %s8153_s20   ;;  %s6407_s19 = sphi %s6456_s19, %s8152_s19   ;;  %s6403_s18 = sphi %s6454_s18, %s8151_s18  }
   0x6   : > { %s6479_s24 = sadd.s32 1, %s6415_s21   ;;  %s137_s25 = sadd.s32 1, %s6411_s20 }
   0x7   : > { %s134_s26 = ssub.s32 %s6415_s21, %s6479_s24  ;;  %p147_p0 = scmp.ne.s32.totalorder %s6411_s20, %s6407_s19 }
   0x8   : > { %p135_p1 = scmp.eq.s32.totalorder %s134_s26, 0  ;;  %p148_p2 = scmp.eq.s32.totalorder %s6475_s22, 1 }
   0x9   : > { %p153_p3 = scmp.ne.s32.totalorder %s6407_s19, %s6403_s18  ;;  %p154_p4 = scmp.eq.s32.totalorder %s5035_s23, 1 }
   0xa   : > { %s6490_s27 = scalar_select %p135_p1, %s6411_s20, %s137_s25  }
   0xb   : > { %p6492_p5 = por %p148_p2, %p147_p0  ;;  %p6496_p6 = por %p154_p4, %p153_p3 }
   0xc   : > { %p5036_p7 = scmp.ge.s32.totalorder %s6415_s21, 1  ;;  %p161_p8 = scmp.lt.s32.totalorder %s6415_s21, 3 }
   0xd   : > { %s8083_s28 = scalar_select %p6492_p5, 1, 0 }
   0xe   : > { %s8084_s29 = scalar_select %p6496_p6, 1, 0 }
   0xf   : > { %p8038_p9 = scmp.eq.s32.totalorder %s6475_s22, 0  ;;  %p6503_p10 = pnand %p5036_p7, %p161_p8 }
  0x10   : > { %s6417_s6 = smov [#allocation5]   ;;  %s6418_s9 = smov [#allocation8]  }
  0x11   : > { %s8085_s30 = scalar_select %p6503_p10, 1, 0 }
  0x12   : > { %s173_s7 = sshll.u32 %s6417_s6, 4  ;;  %p6233_p11 = pneg %p6503_p10  ;;  %s174_s7 = int_to_ptr.vmem [resolvable:$true] %s173_s7 }
  0x13   : > { %s189_s10 = sshll.u32 %s6418_s9, 4  ;;  %s6289_s13 = scalar_lea.hbm %s8033_s1, 18432  ;;  %s6515_s10 = int_to_ptr.vmem [resolvable:$true] %s189_s10 }
  0x14   : > { %p6511_p12 = pnand %p8038_p9, %p6233_p11  ;;  %p6290_p13 = scmp.ne.s32.totalorder %s8033_s1, %s6289_s13 }
  0x15   : > { %p6296_p3 = scmp.lt.u32.totalorder %s6289_s13, %s8033_s1 }
  0x16   : > { %p6291_p0 = pneg %p6511_p12 }
  0x18   : > { %p6292_p1 = pnand %p6291_p0, %p6290_p13 }
  0x1a   : > { %p6293_p2 = pneg %p6292_p1 }
  0x1c   : > { %p6298_p4 = pnand %p6296_p3, %p6293_p2 }
  0x1e   : > { %6301 = shalt.err (!%p6298_p4)
}
  0x1f   : > { %s6302_s23 = scalar_lea.vmem %s174_s7, 18432  ;;  %p6310_p9 = scmp.lt.s32.totalorder %s174_s7, %s174_s7 }
  0x20   : > { %p6303_p7 = scmp.ne.s32.totalorder %s174_s7, %s6302_s23  ;;  %p6311_p6 = scmp.lt.s32.totalorder %s6302_s23, %s6302_s23 }
  0x22   : > { %p6305_p8 = pnand %p6303_p7, %p6291_p0  ;;  %p6312_p5 = por %p6311_p6, %p6310_p9 }
  0x24   : > { %p6306_p11 = pneg %p6305_p8 }
  0x26   : > { %p6313_p10 = pnand %p6312_p5, %p6306_p11 }
  0x28   : > { %6316 = shalt.err (!%p6313_p10)
}
  0x29   : > { %s6419_s25 = smov 128   ;;  %s6420_s26 = smov 8  }
  0x2a   : > { %6236 = dma.hbm_to_vmem [thread:$0]  (!%p6511_p12), %s8033_s1, 18432, %s174_s7, [#allocation6], %s6419_s25, %s6419_s25, %s6420_s26  }
  0x2b   : > { %s6317_s13 = scalar_lea.hbm %s8035_s3, 18432 }
  0x2c   : > { %p6318_p13 = scmp.ne.s32.totalorder %s8035_s3, %s6317_s13  ;;  %p6324_p9 = scmp.lt.u32.totalorder %s6317_s13, %s8035_s3 }
  0x2e   : > { %p6320_p5 = pnand %p6318_p13, %p6291_p0 }
  0x30   : > { %p6321_p6 = pneg %p6320_p5 }
  0x32   : > { %p6326_p10 = pnand %p6324_p9, %p6321_p6 }
  0x34   : > { %6329 = shalt.err (!%p6326_p10)
}
  0x35   : > { %s6330_s7 = scalar_lea.vmem %s6515_s10, 18432  ;;  %p6338_p4 = scmp.lt.s32.totalorder %s6515_s10, %s6515_s10 }
  0x36   : > { %p6331_p1 = scmp.ne.s32.totalorder %s6515_s10, %s6330_s7  ;;  %p6339_p7 = scmp.lt.s32.totalorder %s6330_s7, %s6330_s7 }
  0x38   : > { %p6333_p2 = pnand %p6331_p1, %p6291_p0  ;;  %p6340_p8 = por %p6339_p7, %p6338_p4 }
  0x3a   : > { %p6334_p3 = pneg %p6333_p2 }
  0x3c   : > { %p6341_p11 = pnand %p6340_p8, %p6334_p3 }
  0x3e   : > { %6344 = shalt.err (!%p6341_p11)
}
  0x3f   : > { %6239 = dma.hbm_to_vmem [thread:$0]  (!%p6511_p12), %s8035_s3, 18432, %s6515_s10, [#allocation9], %s6419_s25, %s6419_s25, %s6420_s26  }
  0x40   : > { %p8087_p13 = scmp.ne.s32.totalorder %s8085_s30, 0 }
  0x42   : > { %216 = sbr.rel (%p8087_p13) target bundleno = 1595 (0x63b), region = 40 }
  0x49   : > { %p8088_p5 = scmp.eq.s32.totalorder %s6475_s22, 0 }
  0x4b   : > { %6390 = dma.done.wait (%p8088_p5), [#allocation6], 18432   ;;  %p8089_p0 = pmov %p8088_p5 }
  0x4d   : > { %6392 = vsyncadd (%p8089_p0), [#allocation6], 4294948864  ;;  %p8090_p6 = pmov %p8089_p0 }
  0x4e   : > { %p8091_p9 = pmov %p8089_p0 }
  0x4f   : > { %6394 = dma.done.wait (%p8090_p6), [#allocation9], 18432  }
  0x50   : > { %6396 = vsyncadd (%p8091_p9), [#allocation9], 4294948864  ;;  %v8041_v0 = vmov 0.0|0.0   ;;  %v6422_v1 = vmov 0.0   ;;  %p248_p12 = scmp.lt.s32.totalorder %s6475_s22, 1  ;;  %v1292_v2 = vld [vmem:[#allocation5] sm:$0xff] }
  0x51   : > { %5311 = vmatprep.subr.bf16.mxu0 %v8041_v0  ;;  %253 = vst [vmem:[#allocation2] sm:$0xff] %v6422_v1  ;;  %254 = vst [vmem:[#allocation2 + $0x8] sm:$0xff] %v6422_v1  ;;  %v1293_v3 = vld [vmem:[#allocation5 + $0x8] sm:$0xff]  ;;  %v1294_v4 = vld [vmem:[#allocation5 + $0x10] sm:$0xff]  ;;  %vm394_vm0 = vcmask 31744   ;;  %s245_s14 = sand.u32 1, %s6407_s19  }
  0x52   : > { %255 = vst [vmem:[#allocation2 + $0x10] sm:$0x3] %v6422_v1  ;;  %256 = vst [vmem:[#allocation2 + $0x18] sm:$0xff] %v6422_v1  ;;  %v5312_v5 = vpack.c.bf16 %v1293_v3, %v1292_v2  ;;  %v1295_v6 = vld [vmem:[#allocation5 + $0x18] sm:$0xff]  ;;  %s249_s30 = scalar_select %p248_p12, %s6475_s22, 1  ;;  %v1296_v8 = vld [vmem:[#allocation5 + $0x20] sm:$0xff] }
  0x53   : > { %257 = vst [vmem:[#allocation2 + $0x20] sm:$0xff] %v6422_v1  ;;  %258 = vst [vmem:[#allocation2 + $0x28] sm:$0x3] %v6422_v1  ;;  %v5315_v7 = vpack.c.bf16 %v1295_v6, %v1294_v4  ;;  %v1297_v9 = vld [vmem:[#allocation5 + $0x28] sm:$0xff]  ;;  %v1298_v11 = vld [vmem:[#allocation5 + $0x30] sm:$0xff]  ;;  %s5043_s15 = sshll.u32 %s245_s14, 3 }
  0x54   : > { %259 = vst [vmem:[#allocation2 + $0x30] sm:$0xff] %v6422_v1  ;;  %260 = vst [vmem:[#allocation2 + $0x38] sm:$0xff] %v6422_v1  ;;  %5313 = vmatpush1.bf16.msra.mxu0 %v5312_v5  ;;  %s5053_s8 = sshll.u32 %s249_s30, 8  ;;  %v5318_v10 = vpack.c.bf16 %v1297_v9, %v1296_v8  ;;  %v1299_v12 = vld [vmem:[#allocation5 + $0x38] sm:$0xff]  ;;  %v1300_v15 = vld [vmem:[#allocation5 + $0x40] sm:$0xff]  ;;  %s5054_s16 = sshll.u32 %s6475_s22, 7 }
  0x55   : > { %261 = vst [vmem:[#allocation2 + $0x40] sm:$0x3] %v6422_v1  ;;  %262 = vst [vmem:[#allocation2 + $0x48] sm:$0xff] %v6422_v1  ;;  %5314 = vmatprep.subr.bf16.mxu0 %v8041_v0  ;;  %s6690_s26 = scalar_lea.vmem %s8032_s0, %s5053_s8  ;;  %v5321_v14 = vpack.c.bf16 %v1299_v12, %v1298_v11  ;;  %v1301_v16 = vld [vmem:[#allocation5 + $0x48] sm:$0xff]  ;;  %v1302_v24 = vld [vmem:[#allocation5 + $0x50] sm:$0xff]  ;;  %s247_s17 = scalar_lea.vmem [#allocation10], %s5043_s15 }
  0x56   : > { %263 = vst [vmem:[#allocation2 + $0x50] sm:$0xff] %v6422_v1  ;;  %264 = vst [vmem:[#allocation2 + $0x58] sm:$0x3] %v6422_v1  ;;  %v361_v17 = vld [vmem:[%s6690_s26] sm:$0xff]  ;;  %v362_v18 = vld [vmem:[%s6690_s26 + $0x8] sm:$0xff]  ;;  %v5324_v22 = vpack.c.bf16 %v1301_v16, %v1300_v15  ;;  %s4954_s7 = sshll.u32 %s247_s17, 4  ;;  %s7990_s30 = scalar_lea.hbm %s8037_s5, %s5054_s16  ;;  %s7992_s7 = int_to_ptr.vmem [resolvable:$true] %s4954_s7 }
  0x57   : > { %265 = vst [vmem:[#allocation2 + $0x60] sm:$0xff] %v6422_v1  ;;  %266 = vst [vmem:[#allocation2 + $0x68] sm:$0xff] %v6422_v1  ;;  %v363_v19 = vld [vmem:[%s6690_s26 + $0x10] sm:$0xff]  ;;  %v364_v20 = vld [vmem:[%s6690_s26 + $0x18] sm:$0xff]  ;;  %s4940_s8 = scalar_lea.sflag [#allocation7], %s245_s14  ;;  %s6345_s10 = scalar_lea.vmem %s7992_s7, 128 }
  0x58   : > { %267 = vst [vmem:[#allocation2 + $0x70] sm:$0x3] %v6422_v1  ;;  %268 = vst [vmem:[#allocation2 + $0x78] sm:$0xff] %v6422_v1  ;;  %5316 = vmatpush1.bf16.msra.mxu0 %v5315_v7  ;;  %v491_v13 = vld [vmem:[#allocation2 + $0x1] sm:$0xff]  ;;  %v1303_v25 = vld [vmem:[#allocation5 + $0x58] sm:$0xff]  ;;  %p6346_p10 = scmp.ne.s32.totalorder %s7992_s7, %s6345_s10  ;;  %p8149_p1 = scmp.ne.s32.totalorder %s8083_s28, 0 }
  0x59   : > { %269 = vst [vmem:[#allocation2 + $0x80] sm:$0xff] %v6422_v1  ;;  %270 = vst [vmem:[#allocation2 + $0x88] sm:$0x3] %v6422_v1  ;;  %5317 = vmatprep.subr.bf16.mxu0 %v8041_v0  ;;  %1507 = vmatprep.mubr.f32.mxu0 %v491_v13  ;;  %v365_v21 = vld [vmem:[%s6690_s26 + $0x20] sm:$0xff]  ;;  %v366_v23 = vld [vmem:[%s6690_s26 + $0x28] sm:$0xff]  ;;  %v5327_v31 = vpack.c.bf16 %v1303_v25, %v1302_v24  ;;  %s6423_s22 = smov [#allocation10]  }
  0x5a   : > { %271 = vst [vmem:[#allocation2 + $0x90] sm:$0xff] %v6422_v1  ;;  %272 = vst [vmem:[#allocation2 + $0x98] sm:$0xff] %v6422_v1  ;;  %v367_v26 = vld [vmem:[%s6690_s26 + $0x30] sm:$0xff]  ;;  %v368_v27 = vld [vmem:[%s6690_s26 + $0x38] sm:$0xff]  ;;  %p6347_p2 = pnand %p6346_p10, %p8149_p1  ;;  %s6349_s25 = sshll.u32 %s6423_s22, 4  ;;  %s6350_s25 = int_to_ptr.vmem [resolvable:$false] %s6349_s25 }
  0x5b   : > { %273 = vst [vmem:[#allocation2 + $0xa0] sm:$0x3] %v6422_v1  ;;  %274 = vst [vmem:[#allocation2 + $0xa8] sm:$0xff] %v6422_v1  ;;  %v369_v28 = vld [vmem:[%s6690_s26 + $0x40] sm:$0xff]  ;;  %v370_v29 = vld [vmem:[%s6690_s26 + $0x48] sm:$0xff]  ;;  %p6352_p4 = scmp.lt.s32.totalorder %s7992_s7, %s6350_s25 }
  0x5c   : > { %275 = vst [vmem:[#allocation2 + $0xb0] sm:$0xff] %v6422_v1  ;;  %276 = vst [vmem:[#allocation2 + $0xb8] sm:$0x3] %v6422_v1  ;;  %5319 = vmatpush1.bf16.msra.mxu0 %v5318_v10  ;;  %v371_v30 = vld [vmem:[%s6690_s26 + $0x50] sm:$0xff]  ;;  %v372_v32 = vld [vmem:[%s6690_s26 + $0x58] sm:$0xff]  ;;  %p6348_p3 = pneg %p6347_p2 }
  0x5d   : > { %277 = vst [vmem:[#allocation2 + $0xc0] sm:$0xff] %v6422_v1  ;;  %278 = vst [vmem:[#allocation2 + $0xc8] sm:$0xff] %v6422_v1  ;;  %5320 = vmatprep.subr.bf16.mxu0 %v8041_v0  ;;  %v1304_v33 = vld [vmem:[#allocation5 + $0x60] sm:$0xff]  ;;  %v1305_v34 = vld [vmem:[#allocation5 + $0x68] sm:$0xff] }
  0x5e   : > { %279 = vst [vmem:[#allocation2 + $0xd0] sm:$0x3] %v6422_v1  ;;  %280 = vst [vmem:[#allocation2 + $0xd8] sm:$0xff] %v6422_v1  ;;  %v373_v35 = vld [vmem:[%s6690_s26 + $0x60] sm:$0xff]  ;;  %v5330_v36 = vpack.c.bf16 %v1305_v34, %v1304_v33  ;;  %v1306_v37 = vld [vmem:[#allocation5 + $0x70] sm:$0xff] }
  0x5f   : > { %281 = vst [vmem:[#allocation2 + $0xe0] sm:$0xff] %v6422_v1  ;;  %282 = vst [vmem:[#allocation2 + $0xe8] sm:$0x3] %v6422_v1  ;;  %v1307_v38 = vld [vmem:[#allocation5 + $0x78] sm:$0xff]  ;;  %v1308_v40 = vld [vmem:[#allocation5 + $0x80] sm:$0xff] }
  0x60   : > { %283 = vst [vmem:[#allocation2 + $0xf0] sm:$0xff] %v6422_v1  ;;  %284 = vst [vmem:[#allocation2 + $0xf8] sm:$0xff] %v6422_v1  ;;  %5322 = vmatpush1.bf16.msra.mxu0 %v5321_v14  ;;  %v5333_v39 = vpack.c.bf16 %v1307_v38, %v1306_v37  ;;  %v1309_v41 = vld [vmem:[#allocation5 + $0x88] sm:$0xff]  ;;  %v375_v43 = vld [vmem:[%s6690_s26 + $0x70] sm:$0xff] }
  0x61   : > { %285 = vst [vmem:[#allocation2 + $0x100] sm:$0x3] %v6422_v1  ;;  %286 = vst [vmem:[#allocation2 + $0x108] sm:$0xff] %v6422_v1  ;;  %5323 = vmatprep.subr.bf16.mxu0 %v8041_v0  ;;  %v374_v42 = vld [vmem:[%s6690_s26 + $0x68] sm:$0xff]  ;;  %v5336_v44 = vpack.c.bf16 %v1309_v41, %v1308_v40  ;;  %v1310_v45 = vld [vmem:[#allocation5 + $0x90] sm:$0xff] }
  0x62   : > { %287 = vst [vmem:[#allocation2 + $0x110] sm:$0xff] %v6422_v1  ;;  %288 = vst [vmem:[#allocation2 + $0x118] sm:$0x3] %v6422_v1  ;;  %v376_v46 = vld [vmem:[%s6690_s26 + $0x78] sm:$0xff]  ;;  %v377_v47 = vld [vmem:[%s6690_s26 + $0x80] sm:$0xff] }
  0x63   : > { %289 = vst [vmem:[#allocation2 + $0x120] sm:$0xff] %v6422_v1  ;;  %290 = vst [vmem:[#allocation2 + $0x128] sm:$0xff] %v6422_v1  ;;  %v1311_v48 = vld [vmem:[#allocation5 + $0x98] sm:$0xff]  ;;  %v378_v49 = vld [vmem:[%s6690_s26 + $0x88] sm:$0xff] }
  0x64   : > { %291 = vst [vmem:[#allocation2 + $0x130] sm:$0x3] %v6422_v1  ;;  %292 = vst [vmem:[#allocation2 + $0x138] sm:$0xff] %v6422_v1  ;;  %5325 = vmatpush1.bf16.msra.mxu0 %v5324_v22  ;;  %v379_v50 = vld [vmem:[%s6690_s26 + $0x90] sm:$0xff]  ;;  %v380_v51 = vld [vmem:[%s6690_s26 + $0x98] sm:$0xff]  ;;  %v5339_v53 = vpack.c.bf16 %v1311_v48, %v1310_v45 }
  0x65   : > { %293 = vst [vmem:[#allocation2 + $0x140] sm:$0xff] %v6422_v1  ;;  %294 = vst [vmem:[#allocation2 + $0x148] sm:$0x3] %v6422_v1  ;;  %5326 = vmatprep.subr.bf16.mxu0 %v8041_v0  ;;  %v381_v52 = vld [vmem:[%s6690_s26 + $0xa0] sm:$0xff]  ;;  %v382_v55 = vld [vmem:[%s6690_s26 + $0xa8] sm:$0xff] }
  0x66   : > { %295 = vst [vmem:[#allocation2 + $0x150] sm:$0xff] %v6422_v1  ;;  %296 = vst [vmem:[#allocation2 + $0x158] sm:$0xff] %v6422_v1  ;;  %v1312_v54 = vld [vmem:[#allocation5 + $0xa0] sm:$0xff]  ;;  %v383_v56 = vld [vmem:[%s6690_s26 + $0xb0] sm:$0xff] }
  0x67   : > { %297 = vst [vmem:[#allocation2 + $0x160] sm:$0x3] %v6422_v1  ;;  %298 = vst [vmem:[#allocation2 + $0x168] sm:$0xff] %v6422_v1  ;;  %v1313_v57 = vld [vmem:[#allocation5 + $0xa8] sm:$0xff]  ;;  %v384_v58 = vld [vmem:[%s6690_s26 + $0xb8] sm:$0xff] }
  0x68   : > { %299 = vst [vmem:[#allocation2 + $0x170] sm:$0xff] %v6422_v1  ;;  %300 = vst [vmem:[#allocation2 + $0x178] sm:$0x3] %v6422_v1  ;;  %5328 = vmatpush1.bf16.msra.mxu0 %v5327_v31  ;;  %v385_v59 = vld [vmem:[%s6690_s26 + $0xc0] sm:$0xff]  ;;  %v386_v60 = vld [vmem:[%s6690_s26 + $0xc8] sm:$0xff]  ;;  %v5342_v61 = vpack.c.bf16 %v1313_v57, %v1312_v54 }
  0x69   : > { %301 = vst [vmem:[#allocation2 + $0x180] sm:$0xff] %v6422_v1  ;;  %302 = vst [vmem:[#allocation2 + $0x188] sm:$0xff] %v6422_v1  ;;  %5329 = vmatprep.subr.bf16.mxu0 %v8041_v0  ;;  %v1314_v62 = vld [vmem:[#allocation5 + $0xb0] sm:$0xff]  ;;  %v1315_v63 = vld [vmem:[#allocation5 + $0xb8] sm:$0xff] }
  0x6a   : > { %303 = vst [vmem:[#allocation2 + $0x190] sm:$0x3] %v6422_v1  ;;  %304 = vst [vmem:[#allocation2 + $0x198] sm:$0xff] %v6422_v1  ;;  %v5345_v2 = vpack.c.bf16 %v1315_v63, %v1314_v62  ;;  %v1316_v3 = vld [vmem:[#allocation5 + $0xc0] sm:$0xff]  ;;  %v1317_v4 = vld [vmem:[#allocation5 + $0xc8] sm:$0xff] }
  0x6b   : > { %305 = vst [vmem:[#allocation2 + $0x1a0] sm:$0xff] %v6422_v1  ;;  %306 = vst [vmem:[#allocation2 + $0x1a8] sm:$0x3] %v6422_v1  ;;  %v5348_v5 = vpack.c.bf16 %v1317_v4, %v1316_v3  ;;  %v387_v6 = vld [vmem:[%s6690_s26 + $0xd0] sm:$0xff]  ;;  %v388_v7 = vld [vmem:[%s6690_s26 + $0xd8] sm:$0xff] }
  0x6c   : > { %307 = vst [vmem:[#allocation3] sm:$0xff] %v6422_v1  ;;  %308 = vst [vmem:[#allocation3 + $0x8] sm:$0xff] %v6422_v1  ;;  %5331 = vmatpush1.bf16.msra.mxu0 %v5330_v36  ;;  %v1318_v8 = vld [vmem:[#allocation5 + $0xd0] sm:$0xff]  ;;  %v1319_v9 = vld [vmem:[#allocation5 + $0xd8] sm:$0xff] }
  0x6d   : > { %309 = vst [vmem:[#allocation3 + $0x10] sm:$0x3] %v6422_v1  ;;  %310 = vst [vmem:[#allocation3 + $0x18] sm:$0xff] %v6422_v1  ;;  %5332 = vmatprep.subr.bf16.mxu0 %v8041_v0  ;;  %v389_v10 = vld [vmem:[%s6690_s26 + $0xe0] sm:$0xff]  ;;  %v5351_v11 = vpack.c.bf16 %v1319_v9, %v1318_v8  ;;  %v1321_v13 = vld [vmem:[#allocation5 + $0xe8] sm:$0xff] }
  0x6e   : > { %311 = vst [vmem:[#allocation3 + $0x20] sm:$0xff] %v6422_v1  ;;  %312 = vst [vmem:[#allocation3 + $0x28] sm:$0x3] %v6422_v1  ;;  %v1320_v12 = vld [vmem:[#allocation5 + $0xe0] sm:$0xff]  ;;  %v390_v14 = vld [vmem:[%s6690_s26 + $0xe8] sm:$0xff] }
  0x6f   : > { %313 = vst [vmem:[#allocation3 + $0x30] sm:$0xff] %v6422_v1  ;;  %314 = vst [vmem:[#allocation3 + $0x38] sm:$0xff] %v6422_v1  ;;  %v5354_v15 = vpack.c.bf16 %v1321_v13, %v1320_v12  ;;  %v1322_v16 = vld [vmem:[#allocation5 + $0xf0] sm:$0xff]  ;;  %v1327_v24 = vld [vmem:[#allocation5 + $0x118] sm:$0xff] }
  0x70   : > { %315 = vst [vmem:[#allocation3 + $0x40] sm:$0x3] %v6422_v1  ;;  %316 = vst [vmem:[#allocation3 + $0x48] sm:$0xff] %v6422_v1  ;;  %5334 = vmatpush1.bf16.msra.mxu0 %v5333_v39  ;;  %v492_v22 = vld [vmem:[#allocation2 + $0x9] sm:$0xff]  ;;  %v1331_v33 = vld [vmem:[#allocation5 + $0x138] sm:$0xff] }
  0x71   : > { %317 = vst [vmem:[#allocation3 + $0x50] sm:$0xff] %v6422_v1  ;;  %318 = vst [vmem:[#allocation3 + $0x58] sm:$0x3] %v6422_v1  ;;  %5335 = vmatprep.subr.bf16.mxu0 %v8041_v0  ;;  %v1332_v36 = vld [vmem:[#allocation5 + $0x140] sm:$0xff]  ;;  %v1333_v37 = vld [vmem:[#allocation5 + $0x148] sm:$0xff] }
  0x72   : > { %319 = vst [vmem:[#allocation3 + $0x60] sm:$0xff] %v6422_v1  ;;  %320 = vst [vmem:[#allocation3 + $0x68] sm:$0xff] %v6422_v1  ;;  %v5372_v39 = vpack.c.bf16 %v1333_v37, %v1332_v36  ;;  %v1337_v48 = vld [vmem:[#allocation5 + $0x168] sm:$0xff]  ;;  %v1340_v57 = vld [vmem:[#allocation5 + $0x180] sm:$0xff] }
  0x73   : > { %321 = vst [vmem:[#allocation3 + $0x70] sm:$0x3] %v6422_v1  ;;  %322 = vst [vmem:[#allocation3 + $0x78] sm:$0xff] %v6422_v1  ;;  %v1342_v62 = vld [vmem:[#allocation5 + $0x190] sm:$0xff]  ;;  %v1343_v63 = vld [vmem:[#allocation5 + $0x198] sm:$0xff] }
  0x74   : > { %323 = vst [vmem:[#allocation3 + $0x80] sm:$0xff] %v6422_v1  ;;  %324 = vst [vmem:[#allocation3 + $0x88] sm:$0x3] %v6422_v1  ;;  %5337 = vmatpush1.bf16.msra.mxu0 %v5336_v44  ;;  %v5387_v3 = vpack.c.bf16 %v1343_v63, %v1342_v62 }
  0x75   : > { %325 = vst [vmem:[#allocation3 + $0x90] sm:$0xff] %v6422_v1  ;;  %326 = vst [vmem:[#allocation3 + $0x98] sm:$0xff] %v6422_v1  ;;  %5338 = vmatprep.subr.bf16.mxu0 %v8041_v0 }
  0x76   : > { %327 = vst [vmem:[#allocation3 + $0xa0] sm:$0x3] %v6422_v1  ;;  %328 = vst [vmem:[#allocation3 + $0xa8] sm:$0xff] %v6422_v1 }
  0x77   : > { %329 = vst [vmem:[#allocation3 + $0xb0] sm:$0xff] %v6422_v1  ;;  %330 = vst [vmem:[#allocation3 + $0xb8] sm:$0x3] %v6422_v1 }
  0x78   : > { %331 = vst [vmem:[#allocation3 + $0xc0] sm:$0xff] %v6422_v1  ;;  %332 = vst [vmem:[#allocation3 + $0xc8] sm:$0xff] %v6422_v1  ;;  %5340 = vmatpush1.bf16.msra.mxu0 %v5339_v53  ;;  %v1339_v53 = vld [vmem:[#allocation5 + $0x178] sm:$0xff] }
  0x79   : > { %333 = vst [vmem:[#allocation3 + $0xd0] sm:$0x3] %v6422_v1  ;;  %334 = vst [vmem:[#allocation3 + $0xd8] sm:$0xff] %v6422_v1  ;;  %5341 = vmatprep.subr.bf16.mxu0 %v8041_v0 }
  0x7a   : > { %335 = vst [vmem:[#allocation3 + $0xe0] sm:$0xff] %v6422_v1  ;;  %336 = vst [vmem:[#allocation3 + $0xe8] sm:$0x3] %v6422_v1 }
  0x7b   : > { %337 = vst [vmem:[#allocation3 + $0xf0] sm:$0xff] %v6422_v1  ;;  %338 = vst [vmem:[#allocation3 + $0xf8] sm:$0xff] %v6422_v1 }
  0x7c   : > { %339 = vst [vmem:[#allocation3 + $0x100] sm:$0x3] %v6422_v1  ;;  %340 = vst [vmem:[#allocation3 + $0x108] sm:$0xff] %v6422_v1  ;;  %5343 = vmatpush1.bf16.msra.mxu0 %v5342_v61 }
  0x7d   : > { %341 = vst [vmem:[#allocation3 + $0x110] sm:$0xff] %v6422_v1  ;;  %342 = vst [vmem:[#allocation3 + $0x118] sm:$0x3] %v6422_v1  ;;  %5344 = vmatprep.subr.bf16.mxu0 %v8041_v0 }
  0x7e   : > { %343 = vst [vmem:[#allocation3 + $0x120] sm:$0xff] %v6422_v1  ;;  %344 = vst [vmem:[#allocation3 + $0x128] sm:$0xff] %v6422_v1 }
  0x7f   : > { %345 = vst [vmem:[#allocation3 + $0x130] sm:$0x3] %v6422_v1  ;;  %346 = vst [vmem:[#allocation3 + $0x138] sm:$0xff] %v6422_v1 }
  0x80   : > { %347 = vst [vmem:[#allocation3 + $0x140] sm:$0xff] %v6422_v1  ;;  %348 = vst [vmem:[#allocation3 + $0x148] sm:$0x3] %v6422_v1  ;;  %5346 = vmatpush1.bf16.msra.mxu0 %v5345_v2 }
  0x81   : > { %349 = vst [vmem:[#allocation3 + $0x150] sm:$0xff] %v6422_v1  ;;  %350 = vst [vmem:[#allocation3 + $0x158] sm:$0xff] %v6422_v1  ;;  %5347 = vmatprep.subr.bf16.mxu0 %v8041_v0 }
  0x82   : > { %351 = vst [vmem:[#allocation3 + $0x160] sm:$0x3] %v6422_v1  ;;  %352 = vst [vmem:[#allocation3 + $0x168] sm:$0xff] %v6422_v1 }
  0x83   : > { %353 = vst [vmem:[#allocation3 + $0x170] sm:$0xff] %v6422_v1  ;;  %354 = vst [vmem:[#allocation3 + $0x178] sm:$0x3] %v6422_v1 }
  0x84   : > { %355 = vst [vmem:[#allocation3 + $0x180] sm:$0xff] %v6422_v1  ;;  %356 = vst [vmem:[#allocation3 + $0x188] sm:$0xff] %v6422_v1  ;;  %5349 = vmatpush1.bf16.msra.mxu0 %v5348_v5  ;;  %v1344_v5 = vld [vmem:[#allocation5 + $0x1a0] sm:$0xff] }
  0x85   : > { %357 = vst [vmem:[#allocation3 + $0x190] sm:$0x3] %v6422_v1  ;;  %358 = vst [vmem:[#allocation3 + $0x198] sm:$0xff] %v6422_v1  ;;  %5350 = vmatprep.subr.bf16.mxu0 %v8041_v0 }
  0x86   : > { %359 = vst [vmem:[#allocation3 + $0x1a0] sm:$0xff] %v6422_v1  ;;  %360 = vst [vmem:[#allocation3 + $0x1a8] sm:$0x3] %v6422_v1 }
  0x87   : > { %395 = vst.msk [vmem:[#allocation2 + $0x19] sm:$0xff] %vm394_vm0, %v361_v17  ;;  %396 = vst.msk [vmem:[#allocation2 + $0x21] sm:$0xff] %vm394_vm0, %v362_v18  ;;  %v1323_v17 = vld [vmem:[#allocation5 + $0xf8] sm:$0xff] }
  0x88   : > { %397 = vst.msk [vmem:[#allocation2 + $0x31] sm:$0xff] %vm394_vm0, %v363_v19  ;;  %398 = vst.msk [vmem:[#allocation2 + $0x39] sm:$0xff] %vm394_vm0, %v364_v20  ;;  %5352 = vmatpush1.bf16.msra.mxu0 %v5351_v11  ;;  %v5357_v18 = vpack.c.bf16 %v1323_v17, %v1322_v16  ;;  %v1324_v19 = vld [vmem:[#allocation5 + $0x100] sm:$0xff]  ;;  %v1325_v20 = vld [vmem:[#allocation5 + $0x108] sm:$0xff] }
  0x89   : > { %399 = vst.msk [vmem:[#allocation2 + $0x49] sm:$0xff] %vm394_vm0, %v365_v21  ;;  %400 = vst.msk [vmem:[#allocation2 + $0x51] sm:$0xff] %vm394_vm0, %v366_v23  ;;  %5353 = vmatprep.subr.bf16.mxu0 %v8041_v0  ;;  %v5360_v21 = vpack.c.bf16 %v1325_v20, %v1324_v19  ;;  %v1326_v23 = vld [vmem:[#allocation5 + $0x110] sm:$0xff]  ;;  %v1347_v11 = vld [vmem:[#allocation5 + $0x1b8] sm:$0xff] }
  0x8a   : > { %401 = vst.msk [vmem:[#allocation2 + $0x61] sm:$0xff] %vm394_vm0, %v367_v26  ;;  %402 = vst.msk [vmem:[#allocation2 + $0x69] sm:$0xff] %vm394_vm0, %v368_v27  ;;  %v5363_v25 = vpack.c.bf16 %v1327_v24, %v1326_v23  ;;  %v1328_v27 = vld [vmem:[#allocation5 + $0x120] sm:$0xff]  ;;  %v1349_v16 = vld [vmem:[#allocation5 + $0x1c8] sm:$0xff] }
  0x8b   : > { %403 = vst.msk [vmem:[#allocation2 + $0x79] sm:$0xff] %vm394_vm0, %v369_v28  ;;  %404 = vst.msk [vmem:[#allocation2 + $0x81] sm:$0xff] %vm394_vm0, %v370_v29  ;;  %v1329_v28 = vld [vmem:[#allocation5 + $0x128] sm:$0xff]  ;;  %v1350_v20 = vld [vmem:[#allocation5 + $0x1d0] sm:$0xff] }
  0x8c   : > { %405 = vst.msk [vmem:[#allocation2 + $0x91] sm:$0xff] %vm394_vm0, %v371_v30  ;;  %406 = vst.msk [vmem:[#allocation2 + $0x99] sm:$0xff] %vm394_vm0, %v372_v32  ;;  %5355 = vmatpush1.bf16.msra.mxu0 %v5354_v15  ;;  %v5366_v30 = vpack.c.bf16 %v1329_v28, %v1328_v27  ;;  %v1330_v32 = vld [vmem:[#allocation5 + $0x130] sm:$0xff]  ;;  %v1348_v15 = vld [vmem:[#allocation5 + $0x1c0] sm:$0xff] }
  0x8d   : > { %407 = vst.msk [vmem:[#allocation2 + $0xa9] sm:$0xff] %vm394_vm0, %v373_v35  ;;  %408 = vst.msk [vmem:[#allocation2 + $0xb1] sm:$0xff] %vm394_vm0, %v374_v42  ;;  %5356 = vmatprep.subr.bf16.mxu0 %v8041_v0  ;;  %v1334_v42 = vld [vmem:[#allocation5 + $0x150] sm:$0xff]  ;;  %v1353_v27 = vld [vmem:[#allocation5 + $0x1e8] sm:$0xff] }
  0x8e   : > { %409 = vst.msk [vmem:[#allocation2 + $0xc1] sm:$0xff] %vm394_vm0, %v375_v43  ;;  %410 = vst.msk [vmem:[#allocation2 + $0xc9] sm:$0xff] %vm394_vm0, %v376_v46  ;;  %v6767_v26 = vld [vmem:[#allocation2 + $0x19] sm:$0xff]  ;;  %v6774_v31 = vld [vmem:[#allocation2 + $0x21] sm:$0xff] }
  0x8f   : > { %411 = vst.msk [vmem:[#allocation2 + $0xd9] sm:$0xff] %vm394_vm0, %v377_v47  ;;  %412 = vst.msk [vmem:[#allocation2 + $0xe1] sm:$0xff] %vm394_vm0, %v378_v49  ;;  %v6772_v29 = vld [vmem:[#allocation2 + $0x18] sm:$0xff]  ;;  %v6779_v34 = vld [vmem:[#allocation2 + $0x20] sm:$0xff] }
  0x90   : > { %413 = vst.msk [vmem:[#allocation2 + $0xf1] sm:$0xff] %vm394_vm0, %v379_v50  ;;  %414 = vst.msk [vmem:[#allocation2 + $0xf9] sm:$0xff] %vm394_vm0, %v380_v51  ;;  %5358 = vmatpush1.bf16.msra.mxu0 %v5357_v18  ;;  %v6781_v35 = vld [vmem:[#allocation2 + $0x31] sm:$0xff]  ;;  %v6790_v41 = vld [vmem:[#allocation2 + $0x39] sm:$0xff]  ;;  %v5396_v18 = vpack.c.bf16 %v1349_v16, %v1348_v15 }
  0x91   : > { %415 = vst.msk [vmem:[#allocation2 + $0x109] sm:$0xff] %vm394_vm0, %v381_v52  ;;  %416 = vst.msk [vmem:[#allocation2 + $0x111] sm:$0xff] %vm394_vm0, %v382_v55  ;;  %5359 = vmatprep.subr.bf16.mxu0 %v8041_v0  ;;  %v6786_v38 = vld [vmem:[#allocation2 + $0x30] sm:$0xff]  ;;  %v1335_v43 = vld [vmem:[#allocation5 + $0x158] sm:$0xff] }
  0x92   : > { %417 = vst.msk [vmem:[#allocation2 + $0x121] sm:$0xff] %vm394_vm0, %v383_v56  ;;  %418 = vst.msk [vmem:[#allocation2 + $0x129] sm:$0xff] %vm394_vm0, %v384_v58  ;;  %v6788_v40 = vld [vmem:[#allocation2 + $0x32] sm:$0xff]  ;;  %v5375_v45 = vpack.c.bf16 %v1335_v43, %v1334_v42  ;;  %v6798_v46 = vld [vmem:[#allocation2 + $0x49] sm:$0xff] }
  0x93   : > { %419 = vst.msk [vmem:[#allocation2 + $0x139] sm:$0xff] %vm394_vm0, %v385_v59  ;;  %420 = vst.msk [vmem:[#allocation2 + $0x141] sm:$0xff] %vm394_vm0, %v386_v60  ;;  %1508 = vmatmul.mubr.f32.vlgmr.msra.gmra.mrb[0].mxu0 %v6422_v1  ;;  %5183 = vmatprep.mubr.f32.mxu1 %v6788_v40  ;;  %v6796_v44 = vld [vmem:[#allocation2 + $0x38] sm:$0xff]  ;;  %v1336_v47 = vld [vmem:[#allocation5 + $0x160] sm:$0xff] }
  0x94   : > { %421 = vst.msk [vmem:[#allocation2 + $0x151] sm:$0xff] %vm394_vm0, %v387_v6  ;;  %422 = vst.msk [vmem:[#allocation2 + $0x159] sm:$0xff] %vm394_vm0, %v388_v7  ;;  %5361 = vmatpush1.bf16.msra.mxu0 %v5360_v21  ;;  %1512 = vmatprep.mubr.f32.mxu0 %v492_v22  ;;  %v6803_v49 = vld [vmem:[#allocation2 + $0x48] sm:$0xff]  ;;  %v5378_v50 = vpack.c.bf16 %v1337_v48, %v1336_v47  ;;  %v6805_v51 = vld [vmem:[#allocation2 + $0x51] sm:$0xff] }
  0x95   : > { %423 = vst.msk [vmem:[#allocation2 + $0x169] sm:$0xff] %vm394_vm0, %v389_v10  ;;  %424 = vst.msk [vmem:[#allocation2 + $0x171] sm:$0xff] %vm394_vm0, %v390_v14  ;;  %5362 = vmatprep.subr.bf16.mxu0 %v8041_v0  ;;  %v1338_v52 = vld [vmem:[#allocation5 + $0x170] sm:$0xff]  ;;  %v6812_v56 = vld [vmem:[#allocation2 + $0x61] sm:$0xff] }
  0x96   : > { %v6810_v54 = vld [vmem:[#allocation2 + $0x50] sm:$0xff]  ;;  %v5381_v55 = vpack.c.bf16 %v1339_v53, %v1338_v52  ;;  %v1341_v58 = vld [vmem:[#allocation5 + $0x188] sm:$0xff]  ;;  %v6817_v59 = vld [vmem:[#allocation2 + $0x60] sm:$0xff] }
  0x97   : > { %1513 = vmatmul.mubr.f32.gmra.mrb[2].mxu0 %v6422_v1  ;;  %v5369_v1 = vpack.c.bf16 %v1331_v33, %v1330_v32  ;;  %v5384_v60 = vpack.c.bf16 %v1341_v58, %v1340_v57  ;;  %v6819_v61 = vld [vmem:[#allocation2 + $0x69] sm:$0xff]  ;;  %v6826_v4 = vld [vmem:[#allocation2 + $0x79] sm:$0xff]  ;;  %v6833_v9 = vld [vmem:[#allocation2 + $0x81] sm:$0xff] }
  0x98   : > { %1517 = vmatprep.mubr.f32.mxu0 %v6767_v26  ;;  %5364 = vmatpush1.bf16.msra.mxu0 %v5363_v25  ;;  %v6824_v2 = vld [vmem:[#allocation2 + $0x68] sm:$0xff]  ;;  %v6831_v7 = vld [vmem:[#allocation2 + $0x78] sm:$0xff]  ;;  %v1346_v10 = vld [vmem:[#allocation5 + $0x1b0] sm:$0xff] }
  0x99   : > { %5365 = vmatprep.subr.bf16.mxu0 %v8041_v0  ;;  %v1345_v6 = vld [vmem:[#allocation5 + $0x1a8] sm:$0xff]  ;;  %v6838_v12 = vld [vmem:[#allocation2 + $0x80] sm:$0xff]  ;;  %v5393_v13 = vpack.c.bf16 %v1347_v11, %v1346_v10  ;;  %v6840_v14 = vld [vmem:[#allocation2 + $0x91] sm:$0xff] }
  0x9a   : > { %v5390_v8 = vpack.c.bf16 %v1345_v6, %v1344_v5  ;;  %v6845_v17 = vld [vmem:[#allocation2 + $0x90] sm:$0xff]  ;;  %v6847_v19 = vld [vmem:[#allocation2 + $0x99] sm:$0xff]  ;;  %v6859_v28 = vld [vmem:[#allocation2 + $0xa8] sm:$0xff] }
  0x9b   : > { %1518 = vmatmul.mubr.f32.gmra.mrb[4].mxu0 %v6772_v29  ;;  %v1351_v21 = vld [vmem:[#allocation5 + $0x1d8] sm:$0xff]  ;;  %v6854_v24 = vld [vmem:[#allocation2 + $0xa9] sm:$0xff]  ;;  %v1352_v25 = vld [vmem:[#allocation5 + $0x1e0] sm:$0xff] }
  0x9c   : > { %1522 = vmatprep.mubr.f32.mxu0 %v6774_v31  ;;  %5367 = vmatpush1.bf16.msra.mxu0 %v5366_v30  ;;  %v6852_v22 = vld [vmem:[#allocation2 + $0x98] sm:$0xff]  ;;  %v5399_v23 = vpack.c.bf16 %v1351_v21, %v1350_v20  ;;  %v5402_v30 = vpack.c.bf16 %v1353_v27, %v1352_v25  ;;  %v1354_v33 = vld [vmem:[#allocation5 + $0x1f0] sm:$0xff]  ;;  %v6873_v42 = vld [vmem:[#allocation2 + $0xc0] sm:$0xff] }
  0x9d   : > { %5368 = vmatprep.subr.bf16.mxu0 %v8041_v0  ;;  %v6861_v32 = vld [vmem:[#allocation2 + $0xb1] sm:$0xff]  ;;  %v6875_v43 = vld [vmem:[#allocation2 + $0xc9] sm:$0xff]  ;;  %v6882_v47 = vld [vmem:[#allocation2 + $0xd9] sm:$0xff] }
  0x9e   : > { %v6866_v36 = vld [vmem:[#allocation2 + $0xb0] sm:$0xff]  ;;  %v6886_v48 = vld [vmem:[#allocation2 + $0xd8] sm:$0xff]  ;;  %v6892_v52 = vld [vmem:[#allocation2 + $0xe0] sm:$0xff] }
  0x9f   : > { %1523 = vmatmul.mubr.f32.gmra.mrb[6].mxu0 %v6779_v34  ;;  %v6894_v53 = vld [vmem:[#allocation2 + $0xf1] sm:$0xff]  ;;  %v6900_v57 = vld [vmem:[#allocation2 + $0xf9] sm:$0xff]  ;;  %v6910_v62 = vld [vmem:[#allocation2 + $0x108] sm:$0xff] }
  0xa0   : > { %1527 = vmatprep.mubr.f32.mxu0 %v6781_v35  ;;  %5370 = vmatpush1.bf16.msra.mxu0 %v5369_v1  ;;  %v1355_v1 = vld [vmem:[#allocation5 + $0x1f8] sm:$0xff]  ;;  %v6918_v5 = vld [vmem:[#allocation2 + $0x121] sm:$0xff]  ;;  %v6946_v20 = vld [vmem:[#allocation2 + $0x150] sm:$0xff] }
  0xa1   : > { %5371 = vmatprep.subr.bf16.mxu0 %v8041_v0  ;;  %v5405_v37 = vpack.c.bf16 %v1355_v1, %v1354_v33  ;;  %v6904_v58 = vld [vmem:[#allocation2 + $0xf8] sm:$0xff]  ;;  %8093 = vst [vmem:[#allocation15_spill] sm:$0xff] %v6918_v5  ;;  %v6922_v6 = vld [vmem:[#allocation2 + $0x120] sm:$0xff]  ;;  %v6928_v10 = vld [vmem:[#allocation2 + $0x128] sm:$0xff] }
  0xa2   : > { %v6912_v63 = vld [vmem:[#allocation2 + $0x111] sm:$0xff]  ;;  %v6930_v11 = vld [vmem:[#allocation2 + $0x139] sm:$0xff]  ;;  %v6936_v15 = vld [vmem:[#allocation2 + $0x141] sm:$0xff] }
  0xa3   : > { %1528 = vmatmul.mubr.f32.gmra.mrb[8].mxu0 %v6786_v38  ;;  %8092 = vst [vmem:[#allocation14_spill] sm:$0xff] %v6912_v63  ;;  %8095 = vst [vmem:[#allocation17_spill] sm:$0xff] %v6930_v11  ;;  %v6940_v16 = vld [vmem:[#allocation2 + $0x140] sm:$0xff]  ;;  %v6954_v25 = vld [vmem:[#allocation2 + $0x158] sm:$0xff] }
  0xa4   : > { %1532 = vmatprep.mubr.f32.mxu0 %v6790_v41  ;;  %5373 = vmatpush1.bf16.msra.mxu0 %v5372_v39  ;;  %v6868_v39 = vld [vmem:[#allocation2 + $0xc1] sm:$0xff]  ;;  %8096 = vst [vmem:[#allocation18_spill] sm:$0xff] %v6936_v15  ;;  %v6948_v21 = vld [vmem:[#allocation2 + $0x159] sm:$0xff]  ;;  %v6956_v27 = vld [vmem:[#allocation2 + $0x169] sm:$0xff] }
  0xa5   : > { %5374 = vmatprep.subr.bf16.mxu0 %v8041_v0  ;;  %8098 = vst [vmem:[#allocation20_spill] sm:$0xff] %v6948_v21  ;;  %8099 = vst [vmem:[#allocation21_spill] sm:$0xff] %v6956_v27  ;;  %v6962_v33 = vld [vmem:[#allocation2 + $0x168] sm:$0xff]  ;;  %v6964_v1 = vld [vmem:[#allocation2 + $0x171] sm:$0xff] }
  0xa6   : > { %8100 = vst [vmem:[#allocation22_spill] sm:$0xff] %v6964_v1 }
  0xa7   : > { %1533 = vmatmul.mubr.f32.gmra.mrb[10].mxu0 %v6796_v44 }
  0xa8   : > { %1537 = vmatprep.mubr.f32.mxu0 %v6798_v46  ;;  %5376 = vmatpush1.bf16.msra.mxu0 %v5375_v45  ;;  %v6880_v45 = vld [vmem:[#allocation2 + $0xc8] sm:$0xff] }
  0xa9   : > { %5377 = vmatprep.subr.bf16.mxu0 %v8041_v0 }
  0xab   : > { %1538 = vmatmul.mubr.f32.gmra.mrb[12].mxu0 %v6803_v49 }
  0xac   : > { %1542 = vmatprep.mubr.f32.mxu0 %v6805_v51  ;;  %5379 = vmatpush1.bf16.msra.mxu0 %v5378_v50  ;;  %v6888_v50 = vld [vmem:[#allocation2 + $0xe1] sm:$0xff] }
  0xad   : > { %5380 = vmatprep.subr.bf16.mxu0 %v8041_v0 }
  0xaf   : > { %1543 = vmatmul.mubr.f32.gmra.mrb[14].mxu0 %v6810_v54 }
  0xb0   : > { %1547 = vmatprep.mubr.f32.mxu0 %v6812_v56  ;;  %5382 = vmatpush1.bf16.msra.mxu0 %v5381_v55  ;;  %v6898_v55 = vld [vmem:[#allocation2 + $0xf0] sm:$0xff] }
  0xb1   : > { %5383 = vmatprep.subr.bf16.mxu0 %v8041_v0 }
  0xb3   : > { %1548 = vmatmul.mubr.f32.gmra.mrb[16].mxu0 %v6817_v59 }
  0xb4   : > { %1552 = vmatprep.mubr.f32.mxu0 %v6819_v61  ;;  %5385 = vmatpush1.bf16.msra.mxu0 %v5384_v60  ;;  %v6906_v60 = vld [vmem:[#allocation2 + $0x109] sm:$0xff] }
  0xb5   : > { %5386 = vmatprep.subr.bf16.mxu0 %v8041_v0 }
  0xb7   : > { %1553 = vmatmul.mubr.f32.gmra.mrb[18].mxu0 %v6824_v2 }
  0xb8   : > { %1557 = vmatprep.mubr.f32.mxu0 %v6826_v4  ;;  %5388 = vmatpush1.bf16.msra.mxu0 %v5387_v3  ;;  %v6916_v3 = vld [vmem:[#allocation2 + $0x110] sm:$0xff] }
  0xb9   : > { %5389 = vmatprep.subr.bf16.mxu0 %v8041_v0 }
  0xbb   : > { %1558 = vmatmul.mubr.f32.gmra.mrb[20].mxu0 %v6831_v7 }
  0xbc   : > { %1562 = vmatprep.mubr.f32.mxu0 %v6833_v9  ;;  %5391 = vmatpush1.bf16.msra.mxu0 %v5390_v8  ;;  %v6924_v8 = vld [vmem:[#allocation2 + $0x129] sm:$0xff] }
  0xbd   : > { %5392 = vmatprep.subr.bf16.mxu0 %v8041_v0  ;;  %8094 = vst [vmem:[#allocation16_spill] sm:$0xff] %v6924_v8 }
  0xbf   : > { %1563 = vmatmul.mubr.f32.gmra.mrb[22].mxu0 %v6838_v12 }
  0xc0   : > { %1567 = vmatprep.mubr.f32.mxu0 %v6840_v14  ;;  %5394 = vmatpush1.bf16.msra.mxu0 %v5393_v13  ;;  %v6934_v13 = vld [vmem:[#allocation2 + $0x138] sm:$0xff] }
  0xc1   : > { %5395 = vmatprep.subr.bf16.mxu0 %v8041_v0 }
  0xc3   : > { %1568 = vmatmul.mubr.f32.gmra.mrb[24].mxu0 %v6845_v17 }
  0xc4   : > { %1572 = vmatprep.mubr.f32.mxu0 %v6847_v19  ;;  %5397 = vmatpush1.bf16.msra.mxu0 %v5396_v18  ;;  %v6942_v18 = vld [vmem:[#allocation2 + $0x151] sm:$0xff] }
  0xc5   : > { %5398 = vmatprep.subr.bf16.mxu0 %v8041_v0  ;;  %8097 = vst [vmem:[#allocation19_spill] sm:$0xff] %v6942_v18 }
  0xc7   : > { %1573 = vmatmul.mubr.f32.gmra.mrb[26].mxu0 %v6852_v22 }
  0xc8   : > { %1577 = vmatprep.mubr.f32.mxu0 %v6854_v24  ;;  %5400 = vmatpush1.bf16.msra.mxu0 %v5399_v23  ;;  %v391_v23 = vld [vmem:[%s6690_s26 + $0xf0] sm:$0xff] }
  0xc9   : > { %5401 = vmatprep.subr.bf16.mxu0 %v8041_v0  ;;  %425 = vst.msk [vmem:[#allocation2 + $0x181] sm:$0xff] %vm394_vm0, %v391_v23  ;;  %v1356_v23 = vld [vmem:[#allocation5 + $0x200] sm:$0xff] }
  0xcb   : > { %1578 = vmatmul.mubr.f32.gmra.mrb[28].mxu0 %v6859_v28 }
  0xcc   : > { %1582 = vmatprep.mubr.f32.mxu0 %v6861_v32  ;;  %5403 = vmatpush1.bf16.msra.mxu0 %v5402_v30  ;;  %v392_v30 = vld [vmem:[%s6690_s26 + $0xf8] sm:$0xff]  ;;  %s6351_s26 = scalar_lea.vmem %s6350_s25, 256 }
  0xcd   : > { %5404 = vmatprep.subr.bf16.mxu0 %v8041_v0  ;;  %426 = vst.msk [vmem:[#allocation2 + $0x189] sm:$0xff] %vm394_vm0, %v392_v30  ;;  %v555_v30 = vld [vmem:[#allocation2 + $0x2] sm:$0xff]  ;;  %p6353_p7 = scmp.lt.s32.totalorder %s6351_s26, %s6345_s10 }
  0xcf   : > { %1583 = vmatmul.mubr.f32.gmra.mrb[30].mxu0 %v6866_v36  ;;  %p6354_p8 = por %p6353_p7, %p6352_p4 }
  0xd0   : > { %1587 = vmatprep.mubr.f32.mxu0 %v6868_v39  ;;  %5406 = vmatpush1.bf16.msra.mxu0 %v5405_v37  ;;  %v6968_v37 = vld [vmem:[#allocation2 + $0x170] sm:$0xff] }
  0xd1   : > { %5407 = vmatprep.subr.bf16.mxu0 %v8041_v0  ;;  %v1357_v0 = vld [vmem:[#allocation5 + $0x208] sm:$0xff]  ;;  %p6355_p11 = pnand %p6354_p8, %p6348_p3 }
  0xd3   : > { %1588 = vmatmul.mubr.f32.gmra.mrb[32].mxu0 %v6873_v42 }
  0xd4   : > { %1592 = vmatprep.mubr.f32.mxu0 %v6875_v43 }
  0xd7   : > { %1593 = vmatmul.mubr.f32.gmra.mrb[34].mxu0 %v6880_v45 }
  0xd8   : > { %1597 = vmatprep.mubr.f32.mxu0 %v6882_v47 }
  0xdb   : > { %1598 = vmatmul.mubr.f32.gmra.mrb[36].mxu0 %v6886_v48 }
  0xdc   : > { %1602 = vmatprep.mubr.f32.mxu0 %v6888_v50 }
  0xdf   : > { %1603 = vmatmul.mubr.f32.gmra.mrb[38].mxu0 %v6892_v52 }
  0xe0   : > { %1607 = vmatprep.mubr.f32.mxu0 %v6894_v53 }
  0xe3   : > { %1608 = vmatmul.mubr.f32.gmra.mrb[40].mxu0 %v6898_v55 }
  0xe4   : > { %1612 = vmatprep.mubr.f32.mxu0 %v6900_v57 }
  0xe7   : > { %1613 = vmatmul.mubr.f32.gmra.mrb[42].mxu0 %v6904_v58 }
  0xe8   : > { %1617 = vmatprep.mubr.f32.mxu0 %v6906_v60 }
  0xeb   : > { %1618 = vmatmul.mubr.f32.gmra.mrb[44].mxu0 %v6910_v62 }
  0xec   : > { %1622 = vmatprep.mubr.f32.mxu0 %v6912_v63  ;;  %v6975_v63 = vld [vmem:[#allocation2 + $0x1a] sm:$0xff] }
  0xef   : > { %1623 = vmatmul.mubr.f32.gmra.mrb[46].mxu0 %v6916_v3 }
  0xf0   : > { %1627 = vmatprep.mubr.f32.mxu0 %v6918_v5  ;;  %v1361_v5 = vld [vmem:[#allocation5 + $0x228] sm:$0xff] }
  0xf3   : > { %1628 = vmatmul.mubr.f32.gmra.mrb[48].mxu0 %v6922_v6 }
  0xf4   : > { %1632 = vmatprep.mubr.f32.mxu0 %v6924_v8  ;;  %v8101_v8 = vmov 0.0|0.0  }
  0xf7   : > { %1633 = vmatmul.mubr.f32.gmra.mrb[50].mxu0 %v6928_v10 }
  0xf8   : > { %1637 = vmatprep.mubr.f32.mxu0 %v6930_v11 }
  0xfb   : > { %1638 = vmatmul.mubr.f32.gmra.mrb[52].mxu0 %v6934_v13 }
  0xfc   : > { %1642 = vmatprep.mubr.f32.mxu0 %v6936_v15  ;;  %v556_v15 = vld [vmem:[#allocation2 + $0xa] sm:$0xff] }
  0xff   : > { %1643 = vmatmul.mubr.f32.gmra.mrb[54].mxu0 %v6940_v16 }
 0x100   : > { %1647 = vmatprep.mubr.f32.mxu0 %v6942_v18  ;;  %v1358_v18 = vld [vmem:[#allocation5 + $0x210] sm:$0xff] }
 0x103   : > { %1648 = vmatmul.mubr.f32.gmra.mrb[56].mxu0 %v6946_v20 }
 0x104   : > { %1652 = vmatprep.mubr.f32.mxu0 %v6948_v21  ;;  %v5408_v21 = vpack.c.bf16 %v1357_v0, %v1356_v23  ;;  %v1362_v0 = vld [vmem:[#allocation5 + $0x230] sm:$0xff]  ;;  %v1363_v23 = vld [vmem:[#allocation5 + $0x238] sm:$0xff] }
 0x107   : > { %1653 = vmatmul.mubr.f32.gmra.mrb[58].mxu0 %v6954_v25 }
 0x108   : > { %1657 = vmatprep.mubr.f32.mxu0 %v6956_v27  ;;  %v1359_v27 = vld [vmem:[#allocation5 + $0x218] sm:$0xff] }
 0x109   : > { %v5411_v11 = vpack.c.bf16 %v1359_v27, %v1358_v18  ;;  %v5417_v18 = vpack.c.bf16 %v1363_v23, %v1362_v0  ;;  %v1370_v0 = vld [vmem:[#allocation5 + $0x270] sm:$0xff] }
 0x10a   : > { %v6998_v23 = vld [vmem:[#allocation2 + $0x52] sm:$0xff] }
 0x10b   : > { %1658 = vmatmul.mubr.f32.gmra.mrb[60].mxu0 %v6962_v33 }
 0x10c   : > { %1662 = vmatprep.mubr.f32.mxu0 %v6964_v1  ;;  %v1360_v1 = vld [vmem:[#allocation5 + $0x220] sm:$0xff] }
 0x10f   : > { %1663 = vmatmul.mubr.f32.gmra.mrb[62].mxu0 %v6968_v37 }
 0x110   : > { %1732 = vmatprep.mubr.f32.mxu0 %v6772_v29  ;;  %v5414_v29 = vpack.c.bf16 %v1361_v5, %v1360_v1  ;;  %v1368_v1 = vld [vmem:[#allocation5 + $0x260] sm:$0xff] }
 0x113   : > { %1733 = vmatmul.mubr.f32.vlgmr.msra.gmra.mrb[0].mxu0 %v555_v30  ;;  %v1369_v30 = vld [vmem:[#allocation5 + $0x268] sm:$0xff] }
 0x114   : > { %5409 = vmatpush1.bf16.msra.mxu0 %v5408_v21  ;;  %1737 = vmatprep.mubr.f32.mxu0 %v6779_v34  ;;  %v6980_v34 = vld [vmem:[#allocation2 + $0x22] sm:$0xff]  ;;  %v1367_v21 = vld [vmem:[#allocation5 + $0x258] sm:$0xff] }
 0x115   : > { %5410 = vmatprep.subr.bf16.mxu0 %v8101_v8 }
 0x117   : > { %1738 = vmatmul.mubr.f32.gmra.mrb[2].mxu0 %v556_v15  ;;  %v1364_v15 = vld [vmem:[#allocation5 + $0x240] sm:$0xff] }
 0x118   : > { %1742 = vmatprep.mubr.f32.mxu0 %v6786_v38  ;;  %5412 = vmatpush1.bf16.msra.mxu0 %v5411_v11  ;;  %v1365_v38 = vld [vmem:[#allocation5 + $0x248] sm:$0xff]  ;;  %v1366_v11 = vld [vmem:[#allocation5 + $0x250] sm:$0xff] }
 0x119   : > { %5413 = vmatprep.subr.bf16.mxu0 %v8101_v8  ;;  %v5420_v5 = vpack.c.bf16 %v1365_v38, %v1364_v15  ;;  %v5423_v27 = vpack.c.bf16 %v1367_v21, %v1366_v11  ;;  %v1372_v15 = vld [vmem:[#allocation5 + $0x280] sm:$0xff]  ;;  %v1374_v11 = vld [vmem:[#allocation5 + $0x290] sm:$0xff] }
 0x11a   : > { %v7003_v38 = vld [vmem:[#allocation2 + $0x62] sm:$0xff]  ;;  %v7008_v21 = vld [vmem:[#allocation2 + $0x6a] sm:$0xff] }
 0x11b   : > { %1743 = vmatmul.mubr.f32.gmra.mrb[4].mxu0 %v6975_v63 }
 0x11c   : > { %1747 = vmatprep.mubr.f32.mxu0 %v6796_v44  ;;  %5415 = vmatpush1.bf16.msra.mxu0 %v5414_v29  ;;  %v6988_v44 = vld [vmem:[#allocation2 + $0x3a] sm:$0xff]  ;;  %v5426_v29 = vpack.c.bf16 %v1369_v30, %v1368_v1 }
 0x11d   : > { %5416 = vmatprep.subr.bf16.mxu0 %v8101_v8  ;;  %v1376_v1 = vld [vmem:[#allocation5 + $0x2a0] sm:$0xff] }
 0x11e   : > { %v7013_v30 = vld [vmem:[#allocation2 + $0x7a] sm:$0xff] }
 0x11f   : > { %1748 = vmatmul.mubr.f32.gmra.mrb[6].mxu0 %v6980_v34 }
 0x120   : > { %1752 = vmatprep.mubr.f32.mxu0 %v6803_v49  ;;  %5418 = vmatpush1.bf16.msra.mxu0 %v5417_v18  ;;  %v6993_v49 = vld [vmem:[#allocation2 + $0x4a] sm:$0xff] }
 0x121   : > { %5419 = vmatprep.subr.bf16.mxu0 %v8101_v8 }
 0x123   : > { %1753 = vmatmul.mubr.f32.gmra.mrb[8].mxu0 %v6788_v40 }
 0x124   : > { %1757 = vmatprep.mubr.f32.mxu0 %v6810_v54  ;;  %5421 = vmatpush1.bf16.msra.mxu0 %v5420_v5  ;;  %v1371_v54 = vld [vmem:[#allocation5 + $0x278] sm:$0xff] }
 0x125   : > { %5422 = vmatprep.subr.bf16.mxu0 %v8101_v8  ;;  %v5429_v18 = vpack.c.bf16 %v1371_v54, %v1370_v0  ;;  %v1378_v0 = vld [vmem:[#allocation5 + $0x2b0] sm:$0xff]  ;;  %v7018_v54 = vld [vmem:[#allocation2 + $0x82] sm:$0xff] }
 0x127   : > { %1758 = vmatmul.mubr.f32.gmra.mrb[10].mxu0 %v6988_v44 }
 0x128   : > { %1762 = vmatprep.mubr.f32.mxu0 %v6817_v59  ;;  %5424 = vmatpush1.bf16.msra.mxu0 %v5423_v27  ;;  %v1373_v59 = vld [vmem:[#allocation5 + $0x288] sm:$0xff] }
 0x129   : > { %5425 = vmatprep.subr.bf16.mxu0 %v8101_v8  ;;  %v5432_v5 = vpack.c.bf16 %v1373_v59, %v1372_v15  ;;  %v1380_v15 = vld [vmem:[#allocation5 + $0x2c0] sm:$0xff]  ;;  %v7023_v59 = vld [vmem:[#allocation2 + $0x92] sm:$0xff] }
 0x12b   : > { %1763 = vmatmul.mubr.f32.gmra.mrb[12].mxu0 %v6993_v49 }
 0x12c   : > { %1767 = vmatprep.mubr.f32.mxu0 %v6824_v2  ;;  %5427 = vmatpush1.bf16.msra.mxu0 %v5426_v29  ;;  %v1375_v2 = vld [vmem:[#allocation5 + $0x298] sm:$0xff] }
 0x12d   : > { %5428 = vmatprep.subr.bf16.mxu0 %v8101_v8  ;;  %v5435_v27 = vpack.c.bf16 %v1375_v2, %v1374_v11  ;;  %v1382_v11 = vld [vmem:[#allocation5 + $0x2d0] sm:$0xff]  ;;  %v7028_v2 = vld [vmem:[#allocation2 + $0x9a] sm:$0xff] }
 0x12f   : > { %1768 = vmatmul.mubr.f32.gmra.mrb[14].mxu0 %v6998_v23 }
 0x130   : > { %1772 = vmatprep.mubr.f32.mxu0 %v6831_v7  ;;  %5430 = vmatpush1.bf16.msra.mxu0 %v5429_v18  ;;  %v1377_v7 = vld [vmem:[#allocation5 + $0x2a8] sm:$0xff] }
 0x131   : > { %5431 = vmatprep.subr.bf16.mxu0 %v8101_v8  ;;  %v5438_v29 = vpack.c.bf16 %v1377_v7, %v1376_v1  ;;  %v1384_v1 = vld [vmem:[#allocation5 + $0x2e0] sm:$0xff]  ;;  %v7033_v7 = vld [vmem:[#allocation2 + $0xaa] sm:$0xff] }
 0x133   : > { %1773 = vmatmul.mubr.f32.gmra.mrb[16].mxu0 %v7003_v38 }
 0x134   : > { %1777 = vmatprep.mubr.f32.mxu0 %v6838_v12  ;;  %5433 = vmatpush1.bf16.msra.mxu0 %v5432_v5  ;;  %v1379_v12 = vld [vmem:[#allocation5 + $0x2b8] sm:$0xff] }
 0x135   : > { %5434 = vmatprep.subr.bf16.mxu0 %v8101_v8  ;;  %v5441_v18 = vpack.c.bf16 %v1379_v12, %v1378_v0  ;;  %v1386_v0 = vld [vmem:[#allocation5 + $0x2f0] sm:$0xff] }
 0x136   : > { %v7038_v12 = vld [vmem:[#allocation2 + $0xb2] sm:$0xff] }
 0x137   : > { %1778 = vmatmul.mubr.f32.gmra.mrb[18].mxu0 %v7008_v21 }
 0x138   : > { %1782 = vmatprep.mubr.f32.mxu0 %v6845_v17  ;;  %5436 = vmatpush1.bf16.msra.mxu0 %v5435_v27  ;;  %v1381_v17 = vld [vmem:[#allocation5 + $0x2c8] sm:$0xff] }
 0x139   : > { %5437 = vmatprep.subr.bf16.mxu0 %v8101_v8  ;;  %v5444_v5 = vpack.c.bf16 %v1381_v17, %v1380_v15  ;;  %v7052_v15 = vld [vmem:[#allocation2 + $0xda] sm:$0xff]  ;;  %v7060_v17 = vld [vmem:[#allocation2 + $0xf2] sm:$0xff] }
 0x13b   : > { %1783 = vmatmul.mubr.f32.gmra.mrb[20].mxu0 %v7013_v30 }
 0x13c   : > { %1787 = vmatprep.mubr.f32.mxu0 %v6852_v22  ;;  %5439 = vmatpush1.bf16.msra.mxu0 %v5438_v29  ;;  %v1383_v22 = vld [vmem:[#allocation5 + $0x2d8] sm:$0xff] }
 0x13d   : > { %5440 = vmatprep.subr.bf16.mxu0 %v8101_v8  ;;  %v5447_v27 = vpack.c.bf16 %v1383_v22, %v1382_v11  ;;  %v1423_v22 = vld [vmem:[#allocation5 + $0x418] sm:$0xff] }
 0x13f   : > { %1788 = vmatmul.mubr.f32.gmra.mrb[22].mxu0 %v7018_v54 }
 0x140   : > { %1792 = vmatprep.mubr.f32.mxu0 %v6859_v28  ;;  %5442 = vmatpush1.bf16.msra.mxu0 %v5441_v18  ;;  %v1385_v28 = vld [vmem:[#allocation5 + $0x2e8] sm:$0xff] }
 0x141   : > { %5443 = vmatprep.subr.bf16.mxu0 %v8101_v8  ;;  %v5450_v29 = vpack.c.bf16 %v1385_v28, %v1384_v1  ;;  %v1424_v1 = vld [vmem:[#allocation5 + $0x420] sm:$0xff]  ;;  %v1425_v28 = vld [vmem:[#allocation5 + $0x428] sm:$0xff] }
 0x143   : > { %1793 = vmatmul.mubr.f32.gmra.mrb[24].mxu0 %v7023_v59 }
 0x144   : > { %1797 = vmatprep.mubr.f32.mxu0 %v6866_v36  ;;  %5445 = vmatpush1.bf16.msra.mxu0 %v5444_v5  ;;  %v1387_v36 = vld [vmem:[#allocation5 + $0x2f8] sm:$0xff]  ;;  %v1421_v5 = vld [vmem:[#allocation5 + $0x408] sm:$0xff] }
 0x145   : > { %5446 = vmatprep.subr.bf16.mxu0 %v8101_v8  ;;  %v5453_v18 = vpack.c.bf16 %v1387_v36, %v1386_v0  ;;  %v1426_v0 = vld [vmem:[#allocation5 + $0x430] sm:$0xff]  ;;  %v1427_v36 = vld [vmem:[#allocation5 + $0x438] sm:$0xff] }
 0x147   : > { %1798 = vmatmul.mubr.f32.gmra.mrb[26].mxu0 %v7028_v2 }
 0x148   : > { %1802 = vmatprep.mubr.f32.mxu0 %v6873_v42  ;;  %5448 = vmatpush1.bf16.msra.mxu0 %v5447_v27  ;;  %v7043_v42 = vld [vmem:[#allocation2 + $0xc2] sm:$0xff] }
 0x149   : > { %5449 = vmatprep.subr.bf16.mxu0 %v8101_v8 }
 0x14b   : > { %1803 = vmatmul.mubr.f32.gmra.mrb[28].mxu0 %v7033_v7 }
 0x14c   : > { %1807 = vmatprep.mubr.f32.mxu0 %v6880_v45  ;;  %5451 = vmatpush1.bf16.msra.mxu0 %v5450_v29  ;;  %v7048_v45 = vld [vmem:[#allocation2 + $0xca] sm:$0xff]  ;;  %v5511_v29 = vpack.c.bf16 %v1425_v28, %v1424_v1  ;;  %v1432_v28 = vld [vmem:[#allocation5 + $0x460] sm:$0xff] }
 0x14d   : > { %5452 = vmatprep.subr.bf16.mxu0 %v8101_v8 }
 0x14f   : > { %1808 = vmatmul.mubr.f32.gmra.mrb[30].mxu0 %v7038_v12 }
 0x150   : > { %1812 = vmatprep.mubr.f32.mxu0 %v6886_v48  ;;  %5454 = vmatpush1.bf16.msra.mxu0 %v5453_v18  ;;  %v7056_v48 = vld [vmem:[#allocation2 + $0xe2] sm:$0xff]  ;;  %v5515_v18 = vpack.c.bf16 %v1427_v36, %v1426_v0  ;;  %v7108_v36 = vld [vmem:[#allocation2 + $0x172] sm:$0xff] }
 0x151   : > { %5455 = vmatprep.subr.bf16.mxu0 %v8101_v8  ;;  %v7104_v0 = vld [vmem:[#allocation2 + $0x188] sm:$0xff] }
 0x153   : > { %1813 = vmatmul.mubr.f32.gmra.mrb[32].mxu0 %v7043_v42 }
 0x154   : > { %1817 = vmatprep.mubr.f32.mxu0 %v6892_v52  ;;  %v7064_v52 = vld [vmem:[#allocation2 + $0xfa] sm:$0xff] }
 0x157   : > { %1818 = vmatmul.mubr.f32.gmra.mrb[34].mxu0 %v7048_v45 }
 0x158   : > { %1822 = vmatprep.mubr.f32.mxu0 %v6898_v55  ;;  %v7068_v55 = vld [vmem:[#allocation2 + $0x10a] sm:$0xff] }
 0x15b   : > { %1823 = vmatmul.mubr.f32.gmra.mrb[36].mxu0 %v7052_v15 }
 0x15c   : > { %1827 = vmatprep.mubr.f32.mxu0 %v6904_v58  ;;  %v7072_v58 = vld [vmem:[#allocation2 + $0x112] sm:$0xff] }
 0x15f   : > { %1828 = vmatmul.mubr.f32.gmra.mrb[38].mxu0 %v7056_v48 }
 0x160   : > { %1832 = vmatprep.mubr.f32.mxu0 %v6910_v62  ;;  %v7076_v62 = vld [vmem:[#allocation2 + $0x122] sm:$0xff] }
 0x163   : > { %1833 = vmatmul.mubr.f32.gmra.mrb[40].mxu0 %v7060_v17 }
 0x164   : > { %1837 = vmatprep.mubr.f32.mxu0 %v6916_v3  ;;  %v1420_v3 = vld [vmem:[#allocation5 + $0x400] sm:$0xff] }
 0x165   : > { %v5503_v11 = vpack.c.bf16 %v1421_v5, %v1420_v3  ;;  %v1428_v3 = vld [vmem:[#allocation5 + $0x440] sm:$0xff]  ;;  %v1429_v5 = vld [vmem:[#allocation5 + $0x448] sm:$0xff] }
 0x167   : > { %1838 = vmatmul.mubr.f32.gmra.mrb[42].mxu0 %v7064_v52  ;;  %5504 = vmatprep.subr.bf16.mxu1 %v5503_v11 }
 0x168   : > { %1842 = vmatprep.mubr.f32.mxu0 %v6922_v6  ;;  %v7080_v6 = vld [vmem:[#allocation2 + $0x12a] sm:$0xff]  ;;  %5506 = vmatpush3.bf16.msra.mxu1 %v5503_v11  ;;  %v5519_v11 = vpack.c.bf16 %v1429_v5, %v1428_v3  ;;  %v1435_v3 = vld [vmem:[#allocation5 + $0x478] sm:$0xff]  ;;  %v1388_v5 = vld [vmem:[#allocation5 + $0x300] sm:$0xff] }
 0x16b   : > { %1843 = vmatmul.mubr.f32.gmra.mrb[44].mxu0 %v7068_v55 }
 0x16c   : > { %1847 = vmatprep.mubr.f32.mxu0 %v6928_v10  ;;  %v1422_v10 = vld [vmem:[#allocation5 + $0x410] sm:$0xff] }
 0x16d   : > { %v5507_v27 = vpack.c.bf16 %v1423_v22, %v1422_v10  ;;  %v1430_v10 = vld [vmem:[#allocation5 + $0x450] sm:$0xff]  ;;  %v1431_v22 = vld [vmem:[#allocation5 + $0x458] sm:$0xff] }
 0x16e   : > { %v5523_v1 = vpack.c.bf16 %v1431_v22, %v1430_v10 }
 0x16f   : > { %1848 = vmatmul.mubr.f32.gmra.mrb[46].mxu0 %v7072_v58  ;;  %5508 = vmatprep.subr.bf16.mxu1 %v5507_v27 }
 0x170   : > { %1852 = vmatprep.mubr.f32.mxu0 %v6934_v13  ;;  %v7084_v13 = vld [vmem:[#allocation2 + $0x13a] sm:$0xff]  ;;  %5510 = vmatpush3.bf16.msra.mxu1 %v5507_v27 }
 0x171   : > { %5512 = vmatprep.subr.bf16.mxu1 %v5511_v29  ;;  %v7098_v27 = vld [vmem:[#allocation2 + $0x180] sm:$0xff] }
 0x173   : > { %1853 = vmatmul.mubr.f32.gmra.mrb[48].mxu0 %v7076_v62 }
 0x174   : > { %1857 = vmatprep.mubr.f32.mxu0 %v6940_v16  ;;  %v7088_v16 = vld [vmem:[#allocation2 + $0x142] sm:$0xff]  ;;  %5514 = vmatpush3.bf16.msra.mxu1 %v5511_v29 }
 0x175   : > { %5516 = vmatprep.subr.bf16.mxu1 %v5515_v18  ;;  %v1433_v29 = vld [vmem:[#allocation5 + $0x468] sm:$0xff] }
 0x177   : > { %1858 = vmatmul.mubr.f32.gmra.mrb[50].mxu0 %v7080_v6 }
 0x178   : > { %1862 = vmatprep.mubr.f32.mxu0 %v6946_v20  ;;  %v7092_v20 = vld [vmem:[#allocation2 + $0x152] sm:$0xff]  ;;  %5518 = vmatpush3.bf16.msra.mxu1 %v5515_v18 }
 0x179   : > { %5520 = vmatprep.subr.bf16.mxu1 %v5519_v11  ;;  %v1434_v18 = vld [vmem:[#allocation5 + $0x470] sm:$0xff] }
 0x17a   : > { %v5531_v10 = vpack.c.bf16 %v1435_v3, %v1434_v18  ;;  %v1393_v18 = vld [vmem:[#allocation5 + $0x328] sm:$0xff]  ;;  %v1395_v3 = vld [vmem:[#allocation5 + $0x338] sm:$0xff] }
 0x17b   : > { %1863 = vmatmul.mubr.f32.gmra.mrb[52].mxu0 %v7084_v13 }
 0x17c   : > { %1867 = vmatprep.mubr.f32.mxu0 %v6954_v25  ;;  %v7096_v25 = vld [vmem:[#allocation2 + $0x15a] sm:$0xff]  ;;  %5522 = vmatpush3.bf16.msra.mxu1 %v5519_v11  ;;  %v1389_v11 = vld [vmem:[#allocation5 + $0x308] sm:$0xff] }
 0x17d   : > { %5524 = vmatprep.subr.bf16.mxu1 %v5523_v1  ;;  %v5456_v22 = vpack.c.bf16 %v1389_v11, %v1388_v5  ;;  %v1398_v5 = vld [vmem:[#allocation5 + $0x350] sm:$0xff]  ;;  %v1400_v11 = vld [vmem:[#allocation5 + $0x360] sm:$0xff] }
 0x17f   : > { %1868 = vmatmul.mubr.f32.gmra.mrb[54].mxu0 %v7088_v16 }
 0x180   : > { %1872 = vmatprep.mubr.f32.mxu0 %v6962_v33  ;;  %v7102_v33 = vld [vmem:[#allocation2 + $0x16a] sm:$0xff]  ;;  %5526 = vmatpush3.bf16.msra.mxu1 %v5523_v1 }
 0x181   : > { %v1390_v1 = vld [vmem:[#allocation5 + $0x310] sm:$0xff] }
 0x183   : > { %1873 = vmatmul.mubr.f32.gmra.mrb[56].mxu0 %v7092_v20 }
 0x184   : > { %1877 = vmatprep.mubr.f32.mxu0 %v6968_v37  ;;  %v5527_v37 = vpack.c.bf16 %v1433_v29, %v1432_v28  ;;  %v1391_v28 = vld [vmem:[#allocation5 + $0x318] sm:$0xff] }
 0x185   : > { %v5459_v29 = vpack.c.bf16 %v1391_v28, %v1390_v1  ;;  %v1406_v1 = vld [vmem:[#allocation5 + $0x390] sm:$0xff]  ;;  %v1408_v28 = vld [vmem:[#allocation5 + $0x3a0] sm:$0xff] }
 0x186   : > { %5528 = vmatprep.subr.bf16.mxu1 %v5527_v37 }
 0x187   : > { %1878 = vmatmul.mubr.f32.gmra.mrb[58].mxu0 %v7096_v25  ;;  %5530 = vmatpush3.bf16.msra.mxu1 %v5527_v37  ;;  %v1392_v37 = vld [vmem:[#allocation5 + $0x320] sm:$0xff] }
 0x188   : > { %1882 = vmatprep.mubr.f32.mxu0 %v7098_v27  ;;  %5532 = vmatprep.subr.bf16.mxu1 %v5531_v10 }
 0x18b   : > { %1883 = vmatmul.mubr.f32.gmra.mrb[60].mxu0 %v7102_v33  ;;  %5534 = vmatpush3.bf16.msra.mxu1 %v5531_v10  ;;  %v1402_v10 = vld [vmem:[#allocation5 + $0x370] sm:$0xff] }
 0x18c   : > { %1887 = vmatprep.mubr.f32.mxu0 %v7104_v0  ;;  %5535 = vmatprep.subr.bf16.mxu1 %v8101_v8 }
 0x18e   : > { %5184 = vmatmul.mubr.f32.vlgmr.msra.gmra.mrb[0].mxu1 %v6988_v44 }
 0x18f   : > { %1888 = vmatmul.mubr.f32.gmra.mrb[62].mxu0 %v7108_v36  ;;  %5186 = vmatprep.mubr.f32.mxu1 %v6993_v49 }
 0x190   : > { %1957 = vmatprep.mubr.f32.mxu0 %v6975_v63  ;;  %v1394_v63 = vld [vmem:[#allocation5 + $0x330] sm:$0xff] }
 0x192   : > { %5187 = vmatmul.mubr.f32.gmra.mrb[2].mxu1 %v6998_v23 }
 0x193   : > { %1958 = vmatmul.mubr.f32.vlgmr.msra.gmra.mrb[0].mxu0 %v6767_v26  ;;  %v5462_v26 = vpack.c.bf16 %v1393_v18, %v1392_v37  ;;  %5189 = vmatprep.mubr.f32.mxu1 %v7003_v38  ;;  %v1412_v37 = vld [vmem:[#allocation5 + $0x3c0] sm:$0xff]  ;;  %v1414_v18 = vld [vmem:[#allocation5 + $0x3d0] sm:$0xff] }
 0x194   : > { %5457 = vmatpush1.bf16.msra.mxu0 %v5456_v22  ;;  %1962 = vmatprep.mubr.f32.mxu0 %v6980_v34  ;;  %v1396_v34 = vld [vmem:[#allocation5 + $0x340] sm:$0xff] }
 0x195   : > { %5458 = vmatprep.subr.bf16.mxu0 %v8101_v8  ;;  %v1404_v22 = vld [vmem:[#allocation5 + $0x380] sm:$0xff] }
 0x196   : > { %5190 = vmatmul.mubr.f32.gmra.mrb[4].mxu1 %v7008_v21 }
 0x197   : > { %1963 = vmatmul.mubr.f32.gmra.mrb[2].mxu0 %v6774_v31  ;;  %v5465_v31 = vpack.c.bf16 %v1395_v3, %v1394_v63  ;;  %5192 = vmatprep.mubr.f32.mxu1 %v7013_v30  ;;  %v777_v63 = vld [vmem:[#allocation2 + $0x182] sm:$0xff]  ;;  %v1419_v3 = vld [vmem:[#allocation5 + $0x3f8] sm:$0xff] }
 0x198   : > { %1967 = vmatprep.mubr.f32.mxu0 %v6788_v40  ;;  %5460 = vmatpush1.bf16.msra.mxu0 %v5459_v29  ;;  %v1397_v40 = vld [vmem:[#allocation5 + $0x348] sm:$0xff]  ;;  %v1410_v29 = vld [vmem:[#allocation5 + $0x3b0] sm:$0xff] }
 0x199   : > { %5461 = vmatprep.subr.bf16.mxu0 %v8101_v8 }
 0x19a   : > { %5193 = vmatmul.mubr.f32.gmra.mrb[6].mxu1 %v7018_v54 }
 0x19b   : > { %1968 = vmatmul.mubr.f32.gmra.mrb[4].mxu0 %v6781_v35  ;;  %v5468_v35 = vpack.c.bf16 %v1397_v40, %v1396_v34  ;;  %5195 = vmatprep.mubr.f32.mxu1 %v7023_v59  ;;  %v3503_v34 = vld [vmem:[#allocation8 + $0x28] sm:$0xff]  ;;  %v813_v40 = vld [vmem:[#allocation2 + $0x38] sm:$0xff] }
 0x19c   : > { %1972 = vmatprep.mubr.f32.mxu0 %v6988_v44  ;;  %5463 = vmatpush1.bf16.msra.mxu0 %v5462_v26  ;;  %v1399_v44 = vld [vmem:[#allocation5 + $0x358] sm:$0xff]  ;;  %v1416_v26 = vld [vmem:[#allocation5 + $0x3e0] sm:$0xff] }
 0x19d   : > { %5464 = vmatprep.subr.bf16.mxu0 %v8101_v8 }
 0x19e   : > { %5196 = vmatmul.mubr.f32.gmra.mrb[8].mxu1 %v7028_v2 }
 0x19f   : > { %1973 = vmatmul.mubr.f32.gmra.mrb[6].mxu0 %v6790_v41  ;;  %v5471_v41 = vpack.c.bf16 %v1399_v44, %v1398_v5  ;;  %5198 = vmatprep.mubr.f32.mxu1 %v7033_v7  ;;  %v3504_v44 = vld [vmem:[#allocation8 + $0x30] sm:$0xff] }
 0x1a0   : > { %1977 = vmatprep.mubr.f32.mxu0 %v6993_v49  ;;  %5466 = vmatpush1.bf16.msra.mxu0 %v5465_v31  ;;  %v1401_v49 = vld [vmem:[#allocation5 + $0x368] sm:$0xff] }
 0x1a1   : > { %5467 = vmatprep.subr.bf16.mxu0 %v8101_v8  ;;  %v778_v31 = vld [vmem:[#allocation2 + $0x18a] sm:$0xff] }
 0x1a2   : > { %5199 = vmatmul.mubr.f32.gmra.mrb[10].mxu1 %v7038_v12 }
 0x1a3   : > { %1978 = vmatmul.mubr.f32.gmra.mrb[8].mxu0 %v6798_v46  ;;  %v5474_v46 = vpack.c.bf16 %v1401_v49, %v1400_v11  ;;  %5201 = vmatprep.mubr.f32.mxu1 %v7043_v42  ;;  %v3626_v11 = vld [vmem:[#allocation8 + $0x400] sm:$0xff]  ;;  %v814_v49 = vld [vmem:[#allocation2 + $0x48] sm:$0xff] }
 0x1a4   : > { %1982 = vmatprep.mubr.f32.mxu0 %v6998_v23  ;;  %5469 = vmatpush1.bf16.msra.mxu0 %v5468_v35  ;;  %v1403_v23 = vld [vmem:[#allocation5 + $0x378] sm:$0xff]  ;;  %v878_v35 = vld [vmem:[#allocation2 + $0x49] sm:$0xff] }
 0x1a5   : > { %5470 = vmatprep.subr.bf16.mxu0 %v8101_v8 }
 0x1a6   : > { %5202 = vmatmul.mubr.f32.gmra.mrb[12].mxu1 %v7048_v45 }
 0x1a7   : > { %1983 = vmatmul.mubr.f32.gmra.mrb[10].mxu0 %v6805_v51  ;;  %v5477_v51 = vpack.c.bf16 %v1403_v23, %v1402_v10  ;;  %5204 = vmatprep.mubr.f32.mxu1 %v7052_v15  ;;  %v879_v10 = vld [vmem:[#allocation2 + $0x51] sm:$0xff] }
 0x1a8   : > { %1987 = vmatprep.mubr.f32.mxu0 %v7003_v38  ;;  %5472 = vmatpush1.bf16.msra.mxu0 %v5471_v41  ;;  %v1405_v38 = vld [vmem:[#allocation5 + $0x388] sm:$0xff]  ;;  %v3505_v41 = vld [vmem:[#allocation8 + $0x38] sm:$0xff] }
 0x1a9   : > { %5473 = vmatprep.subr.bf16.mxu0 %v8101_v8 }
 0x1aa   : > { %5205 = vmatmul.mubr.f32.gmra.mrb[14].mxu1 %v7056_v48 }
 0x1ab   : > { %1988 = vmatmul.mubr.f32.gmra.mrb[12].mxu0 %v6812_v56  ;;  %v5480_v56 = vpack.c.bf16 %v1405_v38, %v1404_v22  ;;  %5207 = vmatprep.mubr.f32.mxu1 %v7060_v17  ;;  %v3506_v22 = vld [vmem:[#allocation8 + $0x40] sm:$0xff]  ;;  %v3507_v38 = vld [vmem:[#allocation8 + $0x48] sm:$0xff] }
 0x1ac   : > { %1992 = vmatprep.mubr.f32.mxu0 %v7008_v21  ;;  %5475 = vmatpush1.bf16.msra.mxu0 %v5474_v46  ;;  %v1407_v21 = vld [vmem:[#allocation5 + $0x398] sm:$0xff]  ;;  %v3627_v46 = vld [vmem:[#allocation8 + $0x408] sm:$0xff] }
 0x1ad   : > { %5476 = vmatprep.subr.bf16.mxu0 %v8101_v8  ;;  %v7222_v23 = vpack.c.bf16 %v3627_v46, %v3626_v11  ;;  %v891_v11 = vld [vmem:[#allocation2 + $0xe1] sm:$0xff]  ;;  %v892_v46 = vld [vmem:[#allocation2 + $0xf1] sm:$0xff] }
 0x1ae   : > { %5208 = vmatmul.mubr.f32.gmra.mrb[16].mxu1 %v7064_v52 }
 0x1af   : > { %1993 = vmatmul.mubr.f32.gmra.mrb[14].mxu0 %v6819_v61  ;;  %v5483_v61 = vpack.c.bf16 %v1407_v21, %v1406_v1  ;;  %5210 = vmatprep.mubr.f32.mxu1 %v7068_v55  ;;  %v880_v1 = vld [vmem:[#allocation2 + $0x61] sm:$0xff]  ;;  %v5548_v21 = vpack.c.bf16 %v3507_v38, %v3506_v22  ;;  %v829_v22 = vld [vmem:[#allocation2 + $0xf8] sm:$0xff]  ;;  %v894_v38 = vld [vmem:[#allocation2 + $0x109] sm:$0xff] }
 0x1b0   : > { %1997 = vmatprep.mubr.f32.mxu0 %v7013_v30  ;;  %5478 = vmatpush1.bf16.msra.mxu0 %v5477_v51  ;;  %v1409_v30 = vld [vmem:[#allocation5 + $0x3a8] sm:$0xff]  ;;  %v5545_v51 = vpack.c.bf16 %v3505_v41, %v3504_v44  ;;  %v890_v44 = vld [vmem:[#allocation2 + $0xd9] sm:$0xff] }
 0x1b1   : > { %5479 = vmatprep.subr.bf16.mxu0 %v8101_v8  ;;  %v826_v41 = vld [vmem:[#allocation2 + $0xd8] sm:$0xff] }
 0x1b2   : > { %5211 = vmatmul.mubr.f32.gmra.mrb[18].mxu1 %v7072_v58 }
 0x1b3   : > { %1998 = vmatmul.mubr.f32.gmra.mrb[16].mxu0 %v6826_v4  ;;  %v5486_v4 = vpack.c.bf16 %v1409_v30, %v1408_v28  ;;  %5213 = vmatprep.mubr.f32.mxu1 %v7076_v62  ;;  %v3509_v28 = vld [vmem:[#allocation8 + $0x58] sm:$0xff]  ;;  %v816_v30 = vld [vmem:[#allocation2 + $0x60] sm:$0xff] }
 0x1b4   : > { %2002 = vmatprep.mubr.f32.mxu0 %v7018_v54  ;;  %5481 = vmatpush1.bf16.msra.mxu0 %v5480_v56  ;;  %v1411_v54 = vld [vmem:[#allocation5 + $0x3b8] sm:$0xff]  ;;  %v815_v56 = vld [vmem:[#allocation2 + $0x50] sm:$0xff] }
 0x1b5   : > { %5482 = vmatprep.subr.bf16.mxu0 %v8101_v8 }
 0x1b6   : > { %5214 = vmatmul.mubr.f32.gmra.mrb[20].mxu1 %v7080_v6 }
 0x1b7   : > { %2003 = vmatmul.mubr.f32.gmra.mrb[18].mxu0 %v6833_v9  ;;  %v5489_v9 = vpack.c.bf16 %v1411_v54, %v1410_v29  ;;  %5216 = vmatprep.mubr.f32.mxu1 %v7084_v13  ;;  %v3510_v54 = vld [vmem:[#allocation8 + $0x60] sm:$0xff] }
 0x1b8   : > { %2007 = vmatprep.mubr.f32.mxu0 %v7023_v59  ;;  %5484 = vmatpush1.bf16.msra.mxu0 %v5483_v61  ;;  %v1413_v59 = vld [vmem:[#allocation5 + $0x3c8] sm:$0xff]  ;;  %v3508_v61 = vld [vmem:[#allocation8 + $0x50] sm:$0xff] }
 0x1b9   : > { %5485 = vmatprep.subr.bf16.mxu0 %v8101_v8  ;;  %v5551_v29 = vpack.c.bf16 %v3509_v28, %v3508_v61  ;;  %v896_v61 = vld [vmem:[#allocation2 + $0x121] sm:$0xff] }
 0x1ba   : > { %5217 = vmatmul.mubr.f32.gmra.mrb[22].mxu1 %v7088_v16  ;;  %v3526_v28 = vld [vmem:[#allocation8 + $0xe0] sm:$0xff] }
 0x1bb   : > { %2008 = vmatmul.mubr.f32.gmra.mrb[20].mxu0 %v6840_v14  ;;  %v5492_v14 = vpack.c.bf16 %v1413_v59, %v1412_v37  ;;  %5219 = vmatprep.mubr.f32.mxu1 %v7092_v20  ;;  %v817_v37 = vld [vmem:[#allocation2 + $0x68] sm:$0xff]  ;;  %v882_v59 = vld [vmem:[#allocation2 + $0x79] sm:$0xff] }
 0x1bc   : > { %2012 = vmatprep.mubr.f32.mxu0 %v7028_v2  ;;  %5487 = vmatpush1.bf16.msra.mxu0 %v5486_v4  ;;  %v1415_v2 = vld [vmem:[#allocation5 + $0x3d8] sm:$0xff]  ;;  %v881_v4 = vld [vmem:[#allocation2 + $0x69] sm:$0xff] }
 0x1bd   : > { %5488 = vmatprep.subr.bf16.mxu0 %v8101_v8 }
 0x1be   : > { %5220 = vmatmul.mubr.f32.gmra.mrb[24].mxu1 %v7096_v25 }
 0x1bf   : > { %2013 = vmatmul.mubr.f32.gmra.mrb[22].mxu0 %v6847_v19  ;;  %v5495_v19 = vpack.c.bf16 %v1415_v2, %v1414_v18  ;;  %5222 = vmatprep.mubr.f32.mxu1 %v7102_v33  ;;  %v3512_v18 = vld [vmem:[#allocation8 + $0x70] sm:$0xff]  ;;  %v3513_v2 = vld [vmem:[#allocation8 + $0x78] sm:$0xff] }
 0x1c0   : > { %2017 = vmatprep.mubr.f32.mxu0 %v7033_v7  ;;  %5490 = vmatpush1.bf16.msra.mxu0 %v5489_v9  ;;  %v1417_v7 = vld [vmem:[#allocation5 + $0x3e8] sm:$0xff] }
 0x1c1   : > { %5491 = vmatprep.subr.bf16.mxu0 %v8101_v8  ;;  %v3511_v9 = vld [vmem:[#allocation8 + $0x68] sm:$0xff] }
 0x1c2   : > { %5223 = vmatmul.mubr.f32.gmra.mrb[26].mxu1 %v7108_v36 }
 0x1c3   : > { %2018 = vmatmul.mubr.f32.gmra.mrb[24].mxu0 %v6854_v24  ;;  %v5498_v24 = vpack.c.bf16 %v1417_v7, %v1416_v26  ;;  %5225 = vmatprep.mubr.f32.mxu1 %v777_v63  ;;  %v883_v26 = vld [vmem:[#allocation2 + $0x81] sm:$0xff]  ;;  %v5557_v7 = vpack.c.bf16 %v3513_v2, %v3512_v18 }
 0x1c4   : > { %2022 = vmatprep.mubr.f32.mxu0 %v7038_v12  ;;  %5493 = vmatpush1.bf16.msra.mxu0 %v5492_v14  ;;  %v1418_v12 = vld [vmem:[#allocation5 + $0x3f0] sm:$0xff]  ;;  %v5554_v14 = vpack.c.bf16 %v3511_v9, %v3510_v54  ;;  %v833_v2 = vld [vmem:[#allocation2 + $0x128] sm:$0xff] }
 0x1c5   : > { %5494 = vmatprep.subr.bf16.mxu0 %v8101_v8  ;;  %v897_v54 = vld [vmem:[#allocation2 + $0x129] sm:$0xff] }
 0x1c6   : > { %5226 = vmatmul.mubr.f32.gmra.mrb[28].mxu1 %v778_v31  ;;  %v3528_v9 = vld [vmem:[#allocation8 + $0xf0] sm:$0xff] }
 0x1c7   : > { %2023 = vmatmul.mubr.f32.gmra.mrb[26].mxu0 %v6861_v32  ;;  %v5501_v32 = vpack.c.bf16 %v1419_v3, %v1418_v12  ;;  %v819_v12 = vld [vmem:[#allocation2 + $0x80] sm:$0xff]  ;;  %v884_v3 = vld [vmem:[#allocation2 + $0x91] sm:$0xff] }
 0x1c8   : > { %2027 = vmatprep.mubr.f32.mxu0 %v7043_v42  ;;  %5496 = vmatpush1.bf16.msra.mxu0 %v5495_v19  ;;  %v8109_v42 = vld [vmem:[#allocation21_spill] sm:$0xff]  ;;  %v818_v19 = vld [vmem:[#allocation2 + $0x78] sm:$0xff] }
 0x1c9   : > { %5497 = vmatprep.subr.bf16.mxu0 %v8101_v8 }
 0x1cb   : > { %2028 = vmatmul.mubr.f32.gmra.mrb[28].mxu0 %v6868_v39  ;;  %v8102_v39 = vld [vmem:[#allocation14_spill] sm:$0xff] }
 0x1cc   : > { %2032 = vmatprep.mubr.f32.mxu0 %v7048_v45  ;;  %5499 = vmatpush1.bf16.msra.mxu0 %v5498_v24  ;;  %v8110_v45 = vld [vmem:[#allocation22_spill] sm:$0xff]  ;;  %8111 = vst [vmem:[#allocation14_spill] sm:$0xff] %v7222_v23  ;;  %v3514_v24 = vld [vmem:[#allocation8 + $0x80] sm:$0xff] }
 0x1cd   : > { %5500 = vmatprep.subr.bf16.mxu0 %v8101_v8 }
 0x1cf   : > { %2033 = vmatmul.mubr.f32.gmra.mrb[30].mxu0 %v6875_v43  ;;  %v8103_v43 = vld [vmem:[#allocation15_spill] sm:$0xff] }
 0x1d0   : > { %2037 = vmatprep.mubr.f32.mxu0 %v7052_v15  ;;  %5502 = vmatpush1.bf16.msra.mxu0 %v5501_v32  ;;  %v7214_v15 = vld [vmem:[#allocation2 + $0x181] sm:$0xff]  ;;  %v3516_v32 = vld [vmem:[#allocation8 + $0x90] sm:$0xff] }
 0x1d1   : > { %5728 = vmatprep.subr.bf16.mxu0 %v7222_v23 }
 0x1d3   : > { %2038 = vmatmul.mubr.f32.gmra.mrb[32].mxu0 %v6882_v47  ;;  %v8104_v47 = vld [vmem:[#allocation16_spill] sm:$0xff] }
 0x1d4   : > { %2042 = vmatprep.mubr.f32.mxu0 %v7056_v48  ;;  %v970_v48 = vld [vmem:[#allocation2 + $0x19a] sm:$0xff] }
 0x1d5   : > { %5228 = vmatprep.mubr.f32.mxu1 %v970_v48  ;;  %v3520_v48 = vld [vmem:[#allocation8 + $0xb0] sm:$0xff] }
 0x1d7   : > { %2043 = vmatmul.mubr.f32.gmra.mrb[34].mxu0 %v6888_v50  ;;  %v8105_v50 = vld [vmem:[#allocation17_spill] sm:$0xff] }
 0x1d8   : > { %2047 = vmatprep.mubr.f32.mxu0 %v7060_v17  ;;  %v971_v17 = vld [vmem:[#allocation2 + $0x1a2] sm:$0xff] }
 0x1d9   : > { %5229 = vmatmul.mubr.f32.gmra.mrb[30].mxu1 %v971_v17  ;;  %v3521_v17 = vld [vmem:[#allocation8 + $0xb8] sm:$0xff] }
 0x1db   : > { %2048 = vmatmul.mubr.f32.gmra.mrb[36].mxu0 %v6894_v53  ;;  %v8106_v53 = vld [vmem:[#allocation18_spill] sm:$0xff] }
 0x1dc   : > { %2052 = vmatprep.mubr.f32.mxu0 %v7064_v52  ;;  %v7217_v52 = vld [vmem:[#allocation2 + $0x189] sm:$0xff] }
 0x1df   : > { %2053 = vmatmul.mubr.f32.gmra.mrb[38].mxu0 %v6900_v57  ;;  %v8107_v57 = vld [vmem:[#allocation19_spill] sm:$0xff] }
 0x1e0   : > { %2057 = vmatprep.mubr.f32.mxu0 %v7068_v55  ;;  %v876_v55 = vld [vmem:[#allocation2 + $0x31] sm:$0xff] }
 0x1e3   : > { %2058 = vmatmul.mubr.f32.gmra.mrb[40].mxu0 %v6906_v60  ;;  %v8108_v60 = vld [vmem:[#allocation20_spill] sm:$0xff] }
 0x1e4   : > { %2062 = vmatprep.mubr.f32.mxu0 %v7072_v58  ;;  %v3498_v58 = vld [vmem:[#allocation8] sm:$0xff] }
 0x1e7   : > { %2063 = vmatmul.mubr.f32.gmra.mrb[42].mxu0 %v8102_v39  ;;  %v3517_v39 = vld [vmem:[#allocation8 + $0x98] sm:$0xff] }
 0x1e8   : > { %2067 = vmatprep.mubr.f32.mxu0 %v7076_v62  ;;  %v3499_v62 = vld [vmem:[#allocation8 + $0x8] sm:$0xff] }
 0x1eb   : > { %2068 = vmatmul.mubr.f32.gmra.mrb[44].mxu0 %v8103_v43  ;;  %v820_v43 = vld [vmem:[#allocation2 + $0x90] sm:$0xff] }
 0x1ec   : > { %2072 = vmatprep.mubr.f32.mxu0 %v7080_v6  ;;  %v3500_v6 = vld [vmem:[#allocation8 + $0x10] sm:$0xff] }
 0x1ef   : > { %2073 = vmatmul.mubr.f32.gmra.mrb[46].mxu0 %v8104_v47  ;;  %v885_v47 = vld [vmem:[#allocation2 + $0x99] sm:$0xff] }
 0x1f0   : > { %2077 = vmatprep.mubr.f32.mxu0 %v7084_v13  ;;  %v812_v13 = vld [vmem:[#allocation2 + $0x30] sm:$0xff] }
 0x1f3   : > { %2078 = vmatmul.mubr.f32.gmra.mrb[48].mxu0 %v8105_v50  ;;  %v5563_v50 = vpack.c.bf16 %v3517_v39, %v3516_v32  ;;  %v899_v39 = vld [vmem:[#allocation2 + $0x141] sm:$0xff] }
 0x1f4   : > { %2082 = vmatprep.mubr.f32.mxu0 %v7088_v16  ;;  %v5536_v16 = vpack.c.bf16 %v3499_v62, %v3498_v58  ;;  %v887_v58 = vld [vmem:[#allocation2 + $0xb1] sm:$0xff]  ;;  %v5569_v62 = vpack.c.bf16 %v3521_v17, %v3520_v48  ;;  %v3634_v17 = vld [vmem:[#allocation8 + $0x440] sm:$0xff] }
 0x1f6   : > { %5537 = vmatpush1.bf16.msra.mxu1 %v5536_v16  ;;  %v823_v16 = vld [vmem:[#allocation2 + $0xb0] sm:$0xff] }
 0x1f7   : > { %2083 = vmatmul.mubr.f32.gmra.mrb[50].mxu0 %v8106_v53  ;;  %5538 = vmatprep.subr.bf16.mxu1 %v8101_v8  ;;  %v3518_v53 = vld [vmem:[#allocation8 + $0xa0] sm:$0xff] }
 0x1f8   : > { %2087 = vmatprep.mubr.f32.mxu0 %v7092_v20  ;;  %v3501_v20 = vld [vmem:[#allocation8 + $0x18] sm:$0xff] }
 0x1fb   : > { %2088 = vmatmul.mubr.f32.gmra.mrb[52].mxu0 %v8107_v57  ;;  %v3519_v57 = vld [vmem:[#allocation8 + $0xa8] sm:$0xff] }
 0x1fc   : > { %2092 = vmatprep.mubr.f32.mxu0 %v7096_v25  ;;  %v877_v25 = vld [vmem:[#allocation2 + $0x39] sm:$0xff] }
 0x1ff   : > { %2093 = vmatmul.mubr.f32.gmra.mrb[54].mxu0 %v8108_v60  ;;  %v821_v60 = vld [vmem:[#allocation2 + $0x98] sm:$0xff] }
 0x200   : > { %2097 = vmatprep.mubr.f32.mxu0 %v7102_v33  ;;  %v5539_v33 = vpack.c.bf16 %v3501_v20, %v3500_v6  ;;  %v3522_v6 = vld [vmem:[#allocation8 + $0xc0] sm:$0xff] }
 0x201   : > { %v888_v20 = vld [vmem:[#allocation2 + $0xc1] sm:$0xff] }
 0x202   : > { %5540 = vmatpush1.bf16.msra.mxu1 %v5539_v33  ;;  %v3524_v33 = vld [vmem:[#allocation8 + $0xd0] sm:$0xff] }
 0x203   : > { %2098 = vmatmul.mubr.f32.gmra.mrb[56].mxu0 %v8109_v42  ;;  %5541 = vmatprep.subr.bf16.mxu1 %v8101_v8  ;;  %v886_v42 = vld [vmem:[#allocation2 + $0xa9] sm:$0xff] }
 0x204   : > { %2102 = vmatprep.mubr.f32.mxu0 %v7108_v36  ;;  %v3502_v36 = vld [vmem:[#allocation8 + $0x20] sm:$0xff] }
 0x205   : > { %v5542_v5 = vpack.c.bf16 %v3503_v34, %v3502_v36  ;;  %v3525_v36 = vld [vmem:[#allocation8 + $0xd8] sm:$0xff]  ;;  %v824_v34 = vld [vmem:[#allocation2 + $0xc0] sm:$0xff] }
 0x207   : > { %2103 = vmatmul.mubr.f32.gmra.mrb[58].mxu0 %v8110_v45  ;;  %5543 = vmatpush1.bf16.msra.mxu1 %v5542_v5  ;;  %v5566_v45 = vpack.c.bf16 %v3519_v57, %v3518_v53  ;;  %v825_v5 = vld [vmem:[#allocation2 + $0xc8] sm:$0xff]  ;;  %v3633_v53 = vld [vmem:[#allocation8 + $0x438] sm:$0xff]  ;;  %v835_v57 = vld [vmem:[#allocation2 + $0x140] sm:$0xff] }
 0x208   : > { %2107 = vmatprep.mubr.f32.mxu0 %v777_v63  ;;  %5544 = vmatprep.subr.bf16.mxu1 %v8101_v8  ;;  %v3515_v63 = vld [vmem:[#allocation8 + $0x88] sm:$0xff] }
 0x20b   : > { %2108 = vmatmul.mubr.f32.gmra.mrb[60].mxu0 %v7214_v15  ;;  %5546 = vmatpush1.bf16.msra.mxu1 %v5545_v51  ;;  %v893_v51 = vld [vmem:[#allocation2 + $0xf9] sm:$0xff] }
 0x20c   : > { %2112 = vmatprep.mubr.f32.mxu0 %v778_v31  ;;  %5547 = vmatprep.subr.bf16.mxu1 %v8101_v8  ;;  %v5560_v31 = vpack.c.bf16 %v3515_v63, %v3514_v24  ;;  %v2697_v24 = vld [vmem:[#allocation3 + $0x1] sm:$0xff] }
 0x20d   : > { %3745 = vmatprep.mubr.f32.mxu1 %v2697_v24 }
 0x20f   : > { %2113 = vmatmul.mubr.f32.gmra.mrb[62].mxu0 %v7217_v52  ;;  %5549 = vmatpush1.bf16.msra.mxu1 %v5548_v21  ;;  %v831_v21 = vld [vmem:[#allocation2 + $0x110] sm:$0xff] }
 0x210   : > { %2182 = vmatprep.mubr.f32.mxu0 %v876_v55  ;;  %5550 = vmatprep.subr.bf16.mxu1 %v8101_v8  ;;  %v822_v55 = vld [vmem:[#allocation2 + $0xa8] sm:$0xff] }
 0x213   : > { %2183 = vmatmul.mubr.f32.vlgmr.msra.gmra.mrb[0].mxu0 %v812_v13  ;;  %5552 = vmatpush1.bf16.msra.mxu1 %v5551_v29  ;;  %v3523_v13 = vld [vmem:[#allocation8 + $0xc8] sm:$0xff]  ;;  %v832_v29 = vld [vmem:[#allocation2 + $0x120] sm:$0xff] }
 0x214   : > { %2187 = vmatprep.mubr.f32.mxu0 %v877_v25  ;;  %5730 = vmatpush3.bf16.msra.mxu0 %v7222_v23  ;;  %v5572_v25 = vpack.c.bf16 %v3523_v13, %v3522_v6  ;;  %v901_v6 = vld [vmem:[#allocation2 + $0x159] sm:$0xff] }
 0x215   : > { %5553 = vmatprep.subr.bf16.mxu1 %v8101_v8  ;;  %v3530_v13 = vld [vmem:[#allocation8 + $0x100] sm:$0xff] }
 0x217   : > { %2188 = vmatmul.mubr.f32.gmra.mrb[2].mxu0 %v813_v40  ;;  %5555 = vmatpush1.bf16.msra.mxu1 %v5554_v14  ;;  %v889_v40 = vld [vmem:[#allocation2 + $0xc9] sm:$0xff]  ;;  %v3629_v14 = vld [vmem:[#allocation8 + $0x418] sm:$0xff] }
 0x218   : > { %2192 = vmatprep.mubr.f32.mxu0 %v878_v35  ;;  %5556 = vmatprep.subr.bf16.mxu1 %v8101_v8  ;;  %v5575_v35 = vpack.c.bf16 %v3525_v36, %v3524_v33  ;;  %v3637_v33 = vld [vmem:[#allocation8 + $0x458] sm:$0xff] }
 0x219   : > { %v837_v36 = vld [vmem:[#allocation2 + $0x158] sm:$0xff] }
 0x21b   : > { %2193 = vmatmul.mubr.f32.gmra.mrb[4].mxu0 %v814_v49  ;;  %5558 = vmatpush1.bf16.msra.mxu1 %v5557_v7  ;;  %v827_v49 = vld [vmem:[#allocation2 + $0xe0] sm:$0xff] }
 0x21c   : > { %2197 = vmatprep.mubr.f32.mxu0 %v879_v10  ;;  %5559 = vmatprep.subr.bf16.mxu1 %v8101_v8  ;;  %v828_v10 = vld [vmem:[#allocation2 + $0xf0] sm:$0xff] }
 0x21f   : > { %2198 = vmatmul.mubr.f32.gmra.mrb[6].mxu0 %v815_v56  ;;  %5561 = vmatpush1.bf16.msra.mxu1 %v5560_v31  ;;  %v830_v56 = vld [vmem:[#allocation2 + $0x108] sm:$0xff]  ;;  %v834_v31 = vld [vmem:[#allocation2 + $0x138] sm:$0xff] }
 0x220   : > { %2202 = vmatprep.mubr.f32.mxu0 %v880_v1  ;;  %5562 = vmatprep.subr.bf16.mxu1 %v8101_v8  ;;  %v895_v1 = vld [vmem:[#allocation2 + $0x111] sm:$0xff] }
 0x223   : > { %2203 = vmatmul.mubr.f32.gmra.mrb[8].mxu0 %v816_v30  ;;  %5564 = vmatpush1.bf16.msra.mxu1 %v5563_v50  ;;  %v3527_v30 = vld [vmem:[#allocation8 + $0xe8] sm:$0xff]  ;;  %v3632_v50 = vld [vmem:[#allocation8 + $0x430] sm:$0xff] }
 0x224   : > { %2207 = vmatprep.mubr.f32.mxu0 %v881_v4  ;;  %5565 = vmatprep.subr.bf16.mxu1 %v8101_v8  ;;  %v5578_v4 = vpack.c.bf16 %v3527_v30, %v3526_v28  ;;  %v3534_v30 = vld [vmem:[#allocation8 + $0x120] sm:$0xff] }
 0x227   : > { %2208 = vmatmul.mubr.f32.gmra.mrb[10].mxu0 %v817_v37  ;;  %5567 = vmatpush1.bf16.msra.mxu1 %v5566_v45  ;;  %v3529_v37 = vld [vmem:[#allocation8 + $0xf8] sm:$0xff] }
 0x228   : > { %2212 = vmatprep.mubr.f32.mxu0 %v882_v59  ;;  %5568 = vmatprep.subr.bf16.mxu1 %v8101_v8  ;;  %v3628_v59 = vld [vmem:[#allocation8 + $0x410] sm:$0xff]  ;;  %v5581_v18 = vpack.c.bf16 %v3529_v37, %v3528_v9 }
 0x22b   : > { %2213 = vmatmul.mubr.f32.gmra.mrb[12].mxu0 %v818_v19  ;;  %5570 = vmatpush1.bf16.msra.mxu1 %v5569_v62  ;;  %v7239_v19 = vpack.c.bf16 %v3629_v14, %v3628_v59  ;;  %v3536_v59 = vld [vmem:[#allocation8 + $0x130] sm:$0xff]  ;;  %v3537_v14 = vld [vmem:[#allocation8 + $0x138] sm:$0xff] }
 0x22c   : > { %2217 = vmatprep.mubr.f32.mxu0 %v883_v26  ;;  %5571 = vmatprep.subr.bf16.mxu1 %v8101_v8  ;;  %v898_v26 = vld [vmem:[#allocation2 + $0x139] sm:$0xff] }
 0x22d   : > { %8112 = vst [vmem:[#allocation15_spill] sm:$0xff] %v7239_v19  ;;  %5732 = vmatprep.subr.bf16.mxu0 %v7239_v19 }
 0x22e   : > { %5734 = vmatpush3.bf16.msra.mxu0 %v7239_v19 }
 0x22f   : > { %2218 = vmatmul.mubr.f32.gmra.mrb[14].mxu0 %v819_v12  ;;  %5573 = vmatpush1.bf16.msra.mxu1 %v5572_v25  ;;  %v3630_v12 = vld [vmem:[#allocation8 + $0x420] sm:$0xff]  ;;  %v3636_v25 = vld [vmem:[#allocation8 + $0x450] sm:$0xff] }
 0x230   : > { %2222 = vmatprep.mubr.f32.mxu0 %v884_v3  ;;  %5574 = vmatprep.subr.bf16.mxu1 %v8101_v8  ;;  %v3631_v3 = vld [vmem:[#allocation8 + $0x428] sm:$0xff] }
 0x231   : > { %v7248_v32 = vpack.c.bf16 %v3631_v3, %v3630_v12  ;;  %v3540_v3 = vld [vmem:[#allocation8 + $0x150] sm:$0xff] }
 0x233   : > { %2223 = vmatmul.mubr.f32.gmra.mrb[16].mxu0 %v820_v43  ;;  %5576 = vmatpush1.bf16.msra.mxu1 %v5575_v35  ;;  %8113 = vst [vmem:[#allocation16_spill] sm:$0xff] %v7248_v32  ;;  %v7250_v43 = vld [vmem:[#allocation2] sm:$0xff] }
 0x234   : > { %2227 = vmatprep.mubr.f32.mxu0 %v885_v47  ;;  %5577 = vmatprep.subr.bf16.mxu1 %v8101_v8  ;;  %v2698_v47 = vld [vmem:[#allocation3 + $0x9] sm:$0xff] }
 0x235   : > { %5736 = vmatprep.subr.bf16.mxu0 %v7248_v32 }
 0x236   : > { %5738 = vmatpush3.bf16.msra.mxu0 %v7248_v32 }
 0x237   : > { %2228 = vmatmul.mubr.f32.gmra.mrb[18].mxu0 %v821_v60  ;;  %5579 = vmatpush1.bf16.msra.mxu1 %v5578_v4  ;;  %v7255_v60 = vpack.c.bf16 %v3633_v53, %v3632_v50  ;;  %v3535_v4 = vld [vmem:[#allocation8 + $0x128] sm:$0xff]  ;;  %v3542_v50 = vld [vmem:[#allocation8 + $0x160] sm:$0xff] }
 0x238   : > { %2232 = vmatprep.mubr.f32.mxu0 %v886_v42  ;;  %5580 = vmatprep.subr.bf16.mxu1 %v8101_v8  ;;  %v900_v42 = vld [vmem:[#allocation2 + $0x151] sm:$0xff]  ;;  %v3543_v53 = vld [vmem:[#allocation8 + $0x168] sm:$0xff] }
 0x239   : > { %8114 = vst [vmem:[#allocation17_spill] sm:$0xff] %v7255_v60  ;;  %5740 = vmatprep.subr.bf16.mxu0 %v7255_v60 }
 0x23a   : > { %5742 = vmatpush3.bf16.msra.mxu0 %v7255_v60 }
 0x23b   : > { %2233 = vmatmul.mubr.f32.gmra.mrb[20].mxu0 %v822_v55  ;;  %5582 = vmatpush1.bf16.msra.mxu1 %v5581_v18  ;;  %v3635_v55 = vld [vmem:[#allocation8 + $0x448] sm:$0xff]  ;;  %v5593_v18 = vpack.c.bf16 %v3537_v14, %v3536_v59  ;;  %v3554_v59 = vld [vmem:[#allocation8 + $0x1c0] sm:$0xff] }
 0x23c   : > { %2237 = vmatprep.mubr.f32.mxu0 %v887_v58  ;;  %5583 = vmatprep.subr.bf16.mxu1 %v8101_v8  ;;  %v836_v58 = vld [vmem:[#allocation2 + $0x150] sm:$0xff]  ;;  %v7264_v62 = vpack.c.bf16 %v3635_v55, %v3634_v17  ;;  %v3555_v14 = vld [vmem:[#allocation8 + $0x1c8] sm:$0xff] }
 0x23d   : > { %v3544_v55 = vld [vmem:[#allocation8 + $0x170] sm:$0xff] }
 0x23e   : > { %3746 = vmatmul.mubr.f32.vlgmr.msra.gmra.mrb[32].mxu1 %v7250_v43  ;;  %8115 = vst [vmem:[#allocation18_spill] sm:$0xff] %v7264_v62  ;;  %5744 = vmatprep.subr.bf16.mxu0 %v7264_v62 }
 0x23f   : > { %2238 = vmatmul.mubr.f32.gmra.mrb[22].mxu0 %v823_v16  ;;  %3750 = vmatprep.mubr.f32.mxu1 %v2698_v47  ;;  %v3531_v16 = vld [vmem:[#allocation8 + $0x108] sm:$0xff] }
 0x240   : > { %2242 = vmatprep.mubr.f32.mxu0 %v888_v20  ;;  %v5584_v20 = vpack.c.bf16 %v3531_v16, %v3530_v13  ;;  %5746 = vmatpush3.bf16.msra.mxu0 %v7264_v62 }
 0x242   : > { %3751 = vmatmul.mubr.f32.gmra.mrb[34].mxu1 %v7250_v43 }
 0x243   : > { %2243 = vmatmul.mubr.f32.gmra.mrb[24].mxu0 %v824_v34  ;;  %5585 = vmatpush1.bf16.msra.mxu1 %v5584_v20  ;;  %v7267_v34 = vpack.c.bf16 %v3637_v33, %v3636_v25  ;;  %v3546_v20 = vld [vmem:[#allocation8 + $0x180] sm:$0xff]  ;;  %v3547_v25 = vld [vmem:[#allocation8 + $0x188] sm:$0xff] }
 0x244   : > { %2247 = vmatprep.mubr.f32.mxu0 %v889_v40  ;;  %v902_v40 = vld [vmem:[#allocation2 + $0x169] sm:$0xff]  ;;  %5586 = vmatprep.subr.bf16.mxu1 %v8101_v8  ;;  %v5608_v33 = vpack.c.bf16 %v3547_v25, %v3546_v20 }
 0x245   : > { %8116 = vst [vmem:[#allocation19_spill] sm:$0xff] %v7267_v34  ;;  %5748 = vmatprep.subr.bf16.mxu0 %v7267_v34 }
 0x246   : > { %5750 = vmatpush3.bf16.msra.mxu0 %v7267_v34 }
 0x247   : > { %2248 = vmatmul.mubr.f32.gmra.mrb[26].mxu0 %v825_v5 }
 0x248   : > { %2252 = vmatprep.mubr.f32.mxu0 %v890_v44  ;;  %v3638_v44 = vld [vmem:[#allocation8 + $0x460] sm:$0xff] }
 0x24b   : > { %2253 = vmatmul.mubr.f32.gmra.mrb[28].mxu0 %v826_v41  ;;  %v3639_v41 = vld [vmem:[#allocation8 + $0x468] sm:$0xff] }
 0x24c   : > { %2257 = vmatprep.mubr.f32.mxu0 %v891_v11  ;;  %v838_v11 = vld [vmem:[#allocation2 + $0x168] sm:$0xff] }
 0x24f   : > { %2258 = vmatmul.mubr.f32.gmra.mrb[30].mxu0 %v827_v49  ;;  %v7276_v49 = vpack.c.bf16 %v3639_v41, %v3638_v44  ;;  %v3548_v44 = vld [vmem:[#allocation8 + $0x190] sm:$0xff]  ;;  %v3549_v41 = vld [vmem:[#allocation8 + $0x198] sm:$0xff] }
 0x250   : > { %2262 = vmatprep.mubr.f32.mxu0 %v892_v46  ;;  %v903_v46 = vld [vmem:[#allocation2 + $0x171] sm:$0xff] }
 0x251   : > { %8117 = vst [vmem:[#allocation20_spill] sm:$0xff] %v7276_v49  ;;  %5752 = vmatprep.subr.bf16.mxu0 %v7276_v49 }
 0x252   : > { %5754 = vmatpush3.bf16.msra.mxu0 %v7276_v49 }
 0x253   : > { %2263 = vmatmul.mubr.f32.gmra.mrb[32].mxu0 %v828_v10  ;;  %v3532_v10 = vld [vmem:[#allocation8 + $0x110] sm:$0xff] }
 0x254   : > { %2267 = vmatprep.mubr.f32.mxu0 %v893_v51  ;;  %v3533_v51 = vld [vmem:[#allocation8 + $0x118] sm:$0xff] }
 0x257   : > { %2268 = vmatmul.mubr.f32.gmra.mrb[34].mxu0 %v829_v22  ;;  %v5587_v22 = vpack.c.bf16 %v3533_v51, %v3532_v10  ;;  %v3550_v51 = vld [vmem:[#allocation8 + $0x1a0] sm:$0xff] }
 0x258   : > { %2272 = vmatprep.mubr.f32.mxu0 %v894_v38  ;;  %v3640_v38 = vld [vmem:[#allocation8 + $0x470] sm:$0xff] }
 0x259   : > { %5588 = vmatpush1.bf16.msra.mxu1 %v5587_v22  ;;  %v3551_v22 = vld [vmem:[#allocation8 + $0x1a8] sm:$0xff] }
 0x25a   : > { %5589 = vmatprep.subr.bf16.mxu1 %v8101_v8 }
 0x25b   : > { %2273 = vmatmul.mubr.f32.gmra.mrb[36].mxu0 %v830_v56  ;;  %v3641_v56 = vld [vmem:[#allocation8 + $0x478] sm:$0xff] }
 0x25c   : > { %2277 = vmatprep.mubr.f32.mxu0 %v895_v1  ;;  %v839_v1 = vld [vmem:[#allocation2 + $0x170] sm:$0xff] }
 0x25f   : > { %2278 = vmatmul.mubr.f32.gmra.mrb[38].mxu0 %v831_v21  ;;  %v7280_v21 = vpack.c.bf16 %v3641_v56, %v3640_v38  ;;  %v5614_v38 = vpack.c.bf16 %v3551_v22, %v3550_v51 }
 0x260   : > { %2282 = vmatprep.mubr.f32.mxu0 %v896_v61 }
 0x261   : > { %v7242_v7 = vpop.f32.mrb[0].mxu1  ;;  %8118 = vst [vmem:[#allocation21_spill] sm:$0xff] %v7280_v21  ;;  %5756 = vmatprep.subr.bf16.mxu0 %v7280_v21 }
 0x262   : > { %v7245_v63 = vpop.f32.mrb[1].mxu1  ;;  %5758 = vmatpush3.bf16.msra.mxu0 %v7280_v21 }
 0x263   : > { %2283 = vmatmul.mubr.f32.gmra.mrb[40].mxu0 %v832_v29  ;;  %v5590_v29 = vpack.c.bf16 %v3535_v4, %v3534_v30  ;;  %v3552_v30 = vld [vmem:[#allocation8 + $0x1b0] sm:$0xff]  ;;  %v3553_v4 = vld [vmem:[#allocation8 + $0x1b8] sm:$0xff] }
 0x264   : > { %2287 = vmatprep.mubr.f32.mxu0 %v897_v54  ;;  %v906_v54 = vld [vmem:[#allocation2 + $0x199] sm:$0xff] }
 0x265   : > { %v7259_v45 = vpop.f32.mrb[2].mxu1  ;;  %5591 = vmatpush1.bf16.msra.mxu1 %v5590_v29  ;;  %v5617_v29 = vpack.c.bf16 %v3553_v4, %v3552_v30 }
 0x266   : > { %v7261_v48 = vpop.f32.mrb[3].mxu1  ;;  %5592 = vmatprep.subr.bf16.mxu1 %v8101_v8 }
 0x267   : > { %2288 = vmatmul.mubr.f32.gmra.mrb[42].mxu0 %v833_v2  ;;  %v3539_v2 = vld [vmem:[#allocation8 + $0x148] sm:$0xff] }
 0x268   : > { %2292 = vmatprep.mubr.f32.mxu0 %v898_v26 }
 0x269   : > { %v7272_v35 = vpop.f32.mrb[4].mxu1  ;;  %5594 = vmatpush1.bf16.msra.mxu1 %v5593_v18  ;;  %v5620_v18 = vpack.c.bf16 %v3555_v14, %v3554_v59 }
 0x26a   : > { %v7274_v5 = vpop.f32.mrb[5].mxu1  ;;  %5595 = vmatprep.subr.bf16.mxu1 %v8101_v8 }
 0x26b   : > { %2293 = vmatmul.mubr.f32.gmra.mrb[44].mxu0 %v834_v31  ;;  %v3541_v31 = vld [vmem:[#allocation8 + $0x158] sm:$0xff] }
 0x26c   : > { %2297 = vmatprep.mubr.f32.mxu0 %v899_v39  ;;  %v5599_v39 = vpack.c.bf16 %v3541_v31, %v3540_v3  ;;  %v3557_v3 = vld [vmem:[#allocation8 + $0x1d8] sm:$0xff] }
 0x26d   : > { %v7285_v61 = vpop.f32.mrb[6].mxu1 }
 0x26e   : > { %v7287_v28 = vpop.f32.mrb[7].mxu1 }
 0x26f   : > { %2298 = vmatmul.mubr.f32.gmra.mrb[46].mxu0 %v835_v57  ;;  %v5602_v57 = vpack.c.bf16 %v3543_v53, %v3542_v50  ;;  %v3558_v53 = vld [vmem:[#allocation8 + $0x1e0] sm:$0xff] }
 0x270   : > { %2302 = vmatprep.mubr.f32.mxu0 %v900_v42 }
 0x271   : > { %v7294_v9 = vpop.f32.mrb[8].mxu1 }
 0x272   : > { %v7297_v37 = vpop.f32.mrb[9].mxu1 }
 0x273   : > { %2303 = vmatmul.mubr.f32.gmra.mrb[48].mxu0 %v836_v58  ;;  %v3545_v58 = vld [vmem:[#allocation8 + $0x178] sm:$0xff] }
 0x274   : > { %2307 = vmatprep.mubr.f32.mxu0 %v901_v6  ;;  %v5605_v6 = vpack.c.bf16 %v3545_v58, %v3544_v55  ;;  %v7359_v58 = vld [vmem:[%s8034_s2] ss:$0 sm:$0xff] }
 0x277   : > { %2308 = vmatmul.mubr.f32.gmra.mrb[50].mxu0 %v837_v36 }
 0x278   : > { %2312 = vmatprep.mubr.f32.mxu0 %v902_v40 }
 0x27b   : > { %2313 = vmatmul.mubr.f32.gmra.mrb[52].mxu0 %v838_v11  ;;  %v5611_v11 = vpack.c.bf16 %v3549_v41, %v3548_v44  ;;  %v3561_v44 = vld [vmem:[#allocation8 + $0x1f8] sm:$0xff] }
 0x27c   : > { %2317 = vmatprep.mubr.f32.mxu0 %v903_v46 }
 0x27f   : > { %2318 = vmatmul.mubr.f32.gmra.mrb[54].mxu0 %v839_v1 }
 0x280   : > { %2322 = vmatprep.mubr.f32.mxu0 %v7214_v15  ;;  %v907_v15 = vld [vmem:[#allocation2 + $0x1a1] sm:$0xff] }
 0x283   : > { %2323 = vmatmul.mubr.f32.gmra.mrb[56].mxu0 %v7098_v27  ;;  %v7301_v27 = vpop.f32.mrb[10].mxu1 }
 0x284   : > { %2327 = vmatprep.mubr.f32.mxu0 %v7217_v52  ;;  %v7304_v52 = vpop.f32.mrb[11].mxu1 }
 0x285   : > { %v7307_v24 = vpop.f32.mrb[12].mxu1 }
 0x286   : > { %v7309_v12 = vpop.f32.mrb[13].mxu1 }
 0x287   : > { %2328 = vmatmul.mubr.f32.gmra.mrb[58].mxu0 %v7104_v0  ;;  %v3538_v0 = vld [vmem:[#allocation8 + $0x140] sm:$0xff]  ;;  %v7312_v47 = vpop.f32.mrb[14].mxu1 }
 0x288   : > { %2332 = vmatprep.mubr.f32.mxu0 %v906_v54  ;;  %v5596_v26 = vpack.c.bf16 %v3539_v2, %v3538_v0 }
 0x28a   : > { %5597 = vmatpush1.bf16.msra.mxu1 %v5596_v26  ;;  %v3556_v26 = vld [vmem:[#allocation8 + $0x1d0] sm:$0xff] }
 0x28b   : > { %2333 = vmatmul.mubr.f32.gmra.mrb[60].mxu0 %v7250_v43  ;;  %5598 = vmatprep.subr.bf16.mxu1 %v8101_v8  ;;  %v5623_v31 = vpack.c.bf16 %v3557_v3, %v3556_v26 }
 0x28c   : > { %2337 = vmatprep.mubr.f32.mxu0 %v907_v15 }
 0x28e   : > { %5600 = vmatpush1.bf16.msra.mxu1 %v5599_v39 }
 0x28f   : > { %2338 = vmatmul.mubr.f32.gmra.mrb[62].mxu0 %v7250_v43  ;;  %5601 = vmatprep.subr.bf16.mxu1 %v8101_v8  ;;  %v7314_v43 = vpop.f32.mrb[15].mxu1 }
 0x290   : > { %v7317_v42 = vpop.f32.mrb[16].mxu1 }
 0x291   : > { %v7319_v17 = vpop.f32.mrb[17].mxu1 }
 0x292   : > { %5603 = vmatpush1.bf16.msra.mxu1 %v5602_v57  ;;  %v7322_v13 = vpop.f32.mrb[18].mxu1  ;;  %v3559_v57 = vld [vmem:[#allocation8 + $0x1e8] sm:$0xff] }
 0x293   : > { %5604 = vmatprep.subr.bf16.mxu1 %v8101_v8  ;;  %v7324_v16 = vpop.f32.mrb[19].mxu1  ;;  %v5626_v55 = vpack.c.bf16 %v3559_v57, %v3558_v53 }
 0x294   : > { %v7327_v36 = vpop.f32.mrb[20].mxu1 }
 0x295   : > { %v7329_v40 = vpop.f32.mrb[21].mxu1 }
 0x296   : > { %5606 = vmatpush1.bf16.msra.mxu1 %v5605_v6  ;;  %v7332_v46 = vpop.f32.mrb[22].mxu1 }
 0x297   : > { %5607 = vmatprep.subr.bf16.mxu1 %v8101_v8  ;;  %v7334_v10 = vpop.f32.mrb[23].mxu1 }
 0x298   : > { %v7337_v56 = vpop.f32.mrb[24].mxu1 }
 0x299   : > { %v7339_v1 = vpop.f32.mrb[25].mxu1 }
 0x29a   : > { %5609 = vmatpush1.bf16.msra.mxu1 %v5608_v33  ;;  %v7342_v54 = vpop.f32.mrb[26].mxu1  ;;  %v3560_v33 = vld [vmem:[#allocation8 + $0x1f0] sm:$0xff] }
 0x29b   : > { %5610 = vmatprep.subr.bf16.mxu1 %v8101_v8  ;;  %v7344_v15 = vpop.f32.mrb[27].mxu1  ;;  %v5629_v41 = vpack.c.bf16 %v3561_v44, %v3560_v33 }
 0x29c   : > { %v7347_v0 = vpop.f32.mrb[28].mxu1 }
 0x29d   : > { %v7349_v2 = vpop.f32.mrb[29].mxu1 }
 0x29e   : > { %5612 = vmatpush1.bf16.msra.mxu1 %v5611_v11 }
 0x29f   : > { %5613 = vmatprep.subr.bf16.mxu1 %v8101_v8 }
 0x2a2   : > { %5615 = vmatpush1.bf16.msra.mxu1 %v5614_v38 }
 0x2a3   : > { %5616 = vmatprep.subr.bf16.mxu1 %v8101_v8 }
 0x2a6   : > { %5618 = vmatpush1.bf16.msra.mxu1 %v5617_v29 }
 0x2a7   : > { %5619 = vmatprep.subr.bf16.mxu1 %v8101_v8 }
 0x2aa   : > { %5621 = vmatpush1.bf16.msra.mxu1 %v5620_v18 }
 0x2ab   : > { %5622 = vmatprep.subr.bf16.mxu1 %v8101_v8 }
 0x2ac   : > { %v7352_v39 = vpop.f32.mrb[30].mxu1 }
 0x2ad   : > { %v7354_v50 = vpop.f32.mrb[31].mxu1 }
 0x2ae   : > { %5624 = vmatpush1.bf16.msra.mxu1 %v5623_v31 }
 0x2af   : > { %5625 = vmatprep.subr.bf16.mxu1 %v8101_v8 }
 0x2b2   : > { %5627 = vmatpush1.bf16.msra.mxu1 %v5626_v55 }
 0x2b3   : > { %5628 = vmatprep.subr.bf16.mxu1 %v8101_v8 }
 0x2b6   : > { %5630 = vmatpush1.bf16.msra.mxu1 %v5629_v41 }
 0x2b7   : > { %5631 = vmatprep.subr.bf16.mxu1 %v8101_v8 }
 0x2e6   : > { %v2184_v6 = vpop.f32.mrb[0].mxu0 }
 0x2e7   : > { %v5775_v20 = vadd.f32 %v7359_v58, %v2184_v6  ;;  %v2186_v25 = vpop.f32.mrb[1].mxu0 }
 0x2e9   : > { %v2410_v11 = vadd.f32 %v5775_v20, %v7245_v63 }
 0x2ea   : > { %v2189_v51 = vpop.f32.mrb[2].mxu0 }
 0x2eb   : > { %v2568_v22 = vmax.f32 %v2410_v11, 0.0  ;;  %v5776_v38 = vadd.f32 %v7359_v58, %v2189_v51  ;;  %v2191_v30 = vpop.f32.mrb[3].mxu0 }
 0x2ed   : > { %2601 = vst [vmem:[#allocation3 + $0x19] sm:$0xff] %v2568_v22  ;;  %v2415_v4 = vadd.f32 %v5776_v38, %v7242_v7  ;;  %3755 = vmatprep.mubr.f32.mxu1 %v2568_v22 }
 0x2ee   : > { %v2194_v29 = vpop.f32.mrb[4].mxu0 }
 0x2ef   : > { %v2569_v59 = vmax.f32 %v2415_v4, 0.0  ;;  %v5777_v14 = vadd.f32 %v7359_v58, %v2194_v29  ;;  %v2196_v18 = vpop.f32.mrb[5].mxu0 }
 0x2f1   : > { %2602 = vst [vmem:[#allocation3 + $0x21] sm:$0xff] %v2569_v59  ;;  %v2420_v63 = vadd.f32 %v5777_v14, %v7261_v48 }
 0x2f2   : > { %v2199_v26 = vpop.f32.mrb[6].mxu0 }
 0x2f3   : > { %v2570_v3 = vmax.f32 %v2420_v63, 0.0  ;;  %v5778_v31 = vadd.f32 %v7359_v58, %v2199_v26  ;;  %v2201_v53 = vpop.f32.mrb[7].mxu0 }
 0x2f4   : > { %v7370_v57 = vld [vmem:[#allocation3 + $0x18] sm:$0xff] }
 0x2f5   : > { %2603 = vst [vmem:[#allocation3 + $0x31] sm:$0xff] %v2570_v3  ;;  %v2425_v55 = vadd.f32 %v5778_v31, %v7259_v45  ;;  %3756 = vmatmul.mubr.f32.gmra.mrb[36].mxu1 %v7370_v57 }
 0x2f6   : > { %v2204_v7 = vpop.f32.mrb[8].mxu0  ;;  %3760 = vmatprep.mubr.f32.mxu1 %v2569_v59 }
 0x2f7   : > { %v2571_v6 = vmax.f32 %v2425_v55, 0.0  ;;  %v5779_v20 = vadd.f32 %v7359_v58, %v2204_v7  ;;  %v2206_v25 = vpop.f32.mrb[9].mxu0 }
 0x2f8   : > { %v7375_v33 = vld [vmem:[#allocation3 + $0x20] sm:$0xff] }
 0x2f9   : > { %2604 = vst [vmem:[#allocation3 + $0x39] sm:$0xff] %v2571_v6  ;;  %v2430_v48 = vadd.f32 %v5779_v20, %v7274_v5  ;;  %3761 = vmatmul.mubr.f32.gmra.mrb[38].mxu1 %v7375_v33 }
 0x2fa   : > { %v2209_v44 = vpop.f32.mrb[10].mxu0  ;;  %3765 = vmatprep.mubr.f32.mxu1 %v2570_v3 }
 0x2fb   : > { %v2572_v41 = vmax.f32 %v2430_v48, 0.0  ;;  %v5780_v45 = vadd.f32 %v7359_v58, %v2209_v44  ;;  %v2211_v11 = vpop.f32.mrb[11].mxu0 }
 0x2fc   : > { %v7380_v51 = vld [vmem:[#allocation3 + $0x30] sm:$0xff] }
 0x2fd   : > { %2605 = vst [vmem:[#allocation3 + $0x49] sm:$0xff] %v2572_v41  ;;  %v2435_v22 = vadd.f32 %v5780_v45, %v7272_v35  ;;  %3766 = vmatmul.mubr.f32.gmra.mrb[40].mxu1 %v7380_v51 }
 0x2fe   : > { %v2214_v38 = vpop.f32.mrb[12].mxu0  ;;  %3770 = vmatprep.mubr.f32.mxu1 %v2571_v6 }
 0x2ff   : > { %v2573_v30 = vmax.f32 %v2435_v22, 0.0  ;;  %v5781_v5 = vadd.f32 %v7359_v58, %v2214_v38  ;;  %v2216_v4 = vpop.f32.mrb[13].mxu0 }
 0x300   : > { %v7385_v29 = vld [vmem:[#allocation3 + $0x32] sm:$0xff]  ;;  %v7389_v14 = vld [vmem:[#allocation3 + $0x3a] sm:$0xff] }
 0x301   : > { %v7387_v59 = vld [vmem:[#allocation3 + $0x38] sm:$0xff]  ;;  %2606 = vst [vmem:[#allocation3 + $0x51] sm:$0xff] %v2573_v30  ;;  %v2440_v18 = vadd.f32 %v5781_v5, %v7287_v28  ;;  %5263 = vmatprep.mubr.f32.mxu0 %v7385_v29 }
 0x302   : > { %3771 = vmatmul.mubr.f32.gmra.mrb[42].mxu1 %v7387_v59  ;;  %v2219_v35 = vpop.f32.mrb[14].mxu0  ;;  %5264 = vmatmul.mubr.f32.vlgmr.msra.gmra.mrb[64].mxu0 %v7389_v14 }
 0x303   : > { %3775 = vmatprep.mubr.f32.mxu1 %v2572_v41  ;;  %v2574_v63 = vmax.f32 %v2440_v18, 0.0  ;;  %v5782_v26 = vadd.f32 %v7359_v58, %v2219_v35  ;;  %v2221_v3 = vpop.f32.mrb[15].mxu0 }
 0x304   : > { %v7396_v31 = vld [vmem:[#allocation3 + $0x48] sm:$0xff] }
 0x305   : > { %2607 = vst [vmem:[#allocation3 + $0x61] sm:$0xff] %v2574_v63  ;;  %v2445_v53 = vadd.f32 %v5782_v26, %v7285_v61 }
 0x306   : > { %3776 = vmatmul.mubr.f32.gmra.mrb[44].mxu1 %v7396_v31  ;;  %v2224_v28 = vpop.f32.mrb[16].mxu0 }
 0x307   : > { %3780 = vmatprep.mubr.f32.mxu1 %v2573_v30  ;;  %v2575_v55 = vmax.f32 %v2445_v53, 0.0  ;;  %v5783_v7 = vadd.f32 %v7359_v58, %v2224_v28  ;;  %v2226_v6 = vpop.f32.mrb[17].mxu0 }
 0x308   : > { %v7401_v20 = vld [vmem:[#allocation3 + $0x4a] sm:$0xff]  ;;  %v7405_v48 = vld [vmem:[#allocation3 + $0x52] sm:$0xff] }
 0x309   : > { %v7403_v25 = vld [vmem:[#allocation3 + $0x50] sm:$0xff]  ;;  %2608 = vst [vmem:[#allocation3 + $0x69] sm:$0xff] %v2575_v55  ;;  %v2450_v44 = vadd.f32 %v5783_v7, %v7297_v37  ;;  %5266 = vmatprep.mubr.f32.mxu0 %v7401_v20 }
 0x30a   : > { %3781 = vmatmul.mubr.f32.gmra.mrb[46].mxu1 %v7403_v25  ;;  %v2229_v61 = vpop.f32.mrb[18].mxu0  ;;  %5267 = vmatmul.mubr.f32.gmra.mrb[66].mxu0 %v7405_v48 }
 0x30b   : > { %3785 = vmatprep.mubr.f32.mxu1 %v2574_v63  ;;  %v2576_v41 = vmax.f32 %v2450_v44, 0.0  ;;  %v5784_v45 = vadd.f32 %v7359_v58, %v2229_v61  ;;  %v2231_v11 = vpop.f32.mrb[19].mxu0 }
 0x30c   : > { %v7412_v22 = vld [vmem:[#allocation3 + $0x60] sm:$0xff] }
 0x30d   : > { %2609 = vst [vmem:[#allocation3 + $0x79] sm:$0xff] %v2576_v41  ;;  %v2455_v38 = vadd.f32 %v5784_v45, %v7294_v9 }
 0x30e   : > { %3786 = vmatmul.mubr.f32.gmra.mrb[48].mxu1 %v7412_v22  ;;  %v2234_v37 = vpop.f32.mrb[20].mxu0 }
 0x30f   : > { %3790 = vmatprep.mubr.f32.mxu1 %v2575_v55  ;;  %v2577_v30 = vmax.f32 %v2455_v38, 0.0  ;;  %v5785_v5 = vadd.f32 %v7359_v58, %v2234_v37  ;;  %v2236_v4 = vpop.f32.mrb[21].mxu0 }
 0x310   : > { %v7417_v18 = vld [vmem:[#allocation3 + $0x62] sm:$0xff]  ;;  %v7421_v63 = vld [vmem:[#allocation3 + $0x6a] sm:$0xff] }
 0x311   : > { %v7419_v35 = vld [vmem:[#allocation3 + $0x68] sm:$0xff]  ;;  %2610 = vst [vmem:[#allocation3 + $0x81] sm:$0xff] %v2577_v30  ;;  %v2460_v26 = vadd.f32 %v5785_v5, %v7304_v52  ;;  %5269 = vmatprep.mubr.f32.mxu0 %v7417_v18 }
 0x312   : > { %3791 = vmatmul.mubr.f32.gmra.mrb[50].mxu1 %v7419_v35  ;;  %v2239_v9 = vpop.f32.mrb[22].mxu0  ;;  %5270 = vmatmul.mubr.f32.gmra.mrb[68].mxu0 %v7421_v63 }
 0x313   : > { %3795 = vmatprep.mubr.f32.mxu1 %v2576_v41  ;;  %v2578_v3 = vmax.f32 %v2460_v26, 0.0  ;;  %v5786_v53 = vadd.f32 %v7359_v58, %v2239_v9  ;;  %v2241_v28 = vpop.f32.mrb[23].mxu0 }
 0x314   : > { %v7428_v55 = vld [vmem:[#allocation3 + $0x78] sm:$0xff] }
 0x315   : > { %2611 = vst [vmem:[#allocation3 + $0x91] sm:$0xff] %v2578_v3  ;;  %v2465_v7 = vadd.f32 %v5786_v53, %v7301_v27 }
 0x316   : > { %3796 = vmatmul.mubr.f32.gmra.mrb[52].mxu1 %v7428_v55  ;;  %v2244_v52 = vpop.f32.mrb[24].mxu0 }
 0x317   : > { %3800 = vmatprep.mubr.f32.mxu1 %v2577_v30  ;;  %v2579_v6 = vmax.f32 %v2465_v7, 0.0  ;;  %v5787_v44 = vadd.f32 %v7359_v58, %v2244_v52  ;;  %v2246_v61 = vpop.f32.mrb[25].mxu0 }
 0x318   : > { %v7433_v45 = vld [vmem:[#allocation3 + $0x7a] sm:$0xff]  ;;  %v7437_v11 = vld [vmem:[#allocation3 + $0x82] sm:$0xff] }
 0x319   : > { %v7435_v41 = vld [vmem:[#allocation3 + $0x80] sm:$0xff]  ;;  %2612 = vst [vmem:[#allocation3 + $0x99] sm:$0xff] %v2579_v6  ;;  %v2470_v38 = vadd.f32 %v5787_v44, %v7309_v12  ;;  %5272 = vmatprep.mubr.f32.mxu0 %v7433_v45 }
 0x31a   : > { %3801 = vmatmul.mubr.f32.gmra.mrb[54].mxu1 %v7435_v41  ;;  %v2249_v27 = vpop.f32.mrb[26].mxu0  ;;  %5273 = vmatmul.mubr.f32.gmra.mrb[70].mxu0 %v7437_v11 }
 0x31b   : > { %3805 = vmatprep.mubr.f32.mxu1 %v2578_v3  ;;  %v2580_v37 = vmax.f32 %v2470_v38, 0.0  ;;  %v5788_v30 = vadd.f32 %v7359_v58, %v2249_v27  ;;  %v2251_v5 = vpop.f32.mrb[27].mxu0 }
 0x31c   : > { %v7444_v4 = vld [vmem:[#allocation3 + $0x90] sm:$0xff] }
 0x31d   : > { %2613 = vst [vmem:[#allocation3 + $0xa9] sm:$0xff] %v2580_v37  ;;  %v2475_v26 = vadd.f32 %v5788_v30, %v7307_v24 }
 0x31e   : > { %3806 = vmatmul.mubr.f32.gmra.mrb[56].mxu1 %v7444_v4  ;;  %v2254_v12 = vpop.f32.mrb[28].mxu0 }
 0x31f   : > { %3810 = vmatprep.mubr.f32.mxu1 %v2579_v6  ;;  %v2581_v9 = vmax.f32 %v2475_v26, 0.0  ;;  %v5789_v53 = vadd.f32 %v7359_v58, %v2254_v12  ;;  %v2256_v28 = vpop.f32.mrb[29].mxu0 }
 0x320   : > { %v7449_v7 = vld [vmem:[#allocation3 + $0x92] sm:$0xff]  ;;  %v7453_v52 = vld [vmem:[#allocation3 + $0x9a] sm:$0xff] }
 0x321   : > { %v7451_v3 = vld [vmem:[#allocation3 + $0x98] sm:$0xff]  ;;  %2614 = vst [vmem:[#allocation3 + $0xb1] sm:$0xff] %v2581_v9  ;;  %v2480_v44 = vadd.f32 %v5789_v53, %v7314_v43  ;;  %5275 = vmatprep.mubr.f32.mxu0 %v7449_v7 }
 0x322   : > { %3811 = vmatmul.mubr.f32.gmra.mrb[58].mxu1 %v7451_v3  ;;  %v2259_v24 = vpop.f32.mrb[30].mxu0  ;;  %5276 = vmatmul.mubr.f32.gmra.mrb[72].mxu0 %v7453_v52 }
 0x323   : > { %3815 = vmatprep.mubr.f32.mxu1 %v2580_v37  ;;  %v2582_v6 = vmax.f32 %v2480_v44, 0.0  ;;  %v5790_v61 = vadd.f32 %v7359_v58, %v2259_v24  ;;  %v2261_v38 = vpop.f32.mrb[31].mxu0 }
 0x324   : > { %v7460_v27 = vld [vmem:[#allocation3 + $0xa8] sm:$0xff] }
 0x325   : > { %2615 = vst [vmem:[#allocation3 + $0xc1] sm:$0xff] %v2582_v6  ;;  %v2485_v30 = vadd.f32 %v5790_v61, %v7312_v47 }
 0x326   : > { %3816 = vmatmul.mubr.f32.gmra.mrb[60].mxu1 %v7460_v27  ;;  %v2264_v43 = vpop.f32.mrb[32].mxu0 }
 0x327   : > { %3820 = vmatprep.mubr.f32.mxu1 %v2581_v9  ;;  %v2583_v5 = vmax.f32 %v2485_v30, 0.0  ;;  %v5791_v26 = vadd.f32 %v7359_v58, %v2264_v43  ;;  %v2266_v12 = vpop.f32.mrb[33].mxu0 }
 0x328   : > { %v7465_v53 = vld [vmem:[#allocation3 + $0xaa] sm:$0xff]  ;;  %v7469_v28 = vld [vmem:[#allocation3 + $0xb2] sm:$0xff] }
 0x329   : > { %v7467_v37 = vld [vmem:[#allocation3 + $0xb0] sm:$0xff]  ;;  %2616 = vst [vmem:[#allocation3 + $0xc9] sm:$0xff] %v2583_v5  ;;  %v2490_v44 = vadd.f32 %v5791_v26, %v7319_v17  ;;  %5278 = vmatprep.mubr.f32.mxu0 %v7465_v53 }
 0x32a   : > { %3821 = vmatmul.mubr.f32.gmra.mrb[62].mxu1 %v7467_v37  ;;  %v2269_v47 = vpop.f32.mrb[34].mxu0  ;;  %5279 = vmatmul.mubr.f32.gmra.mrb[74].mxu0 %v7469_v28 }
 0x32b   : > { %3825 = vmatprep.mubr.f32.mxu1 %v2582_v6  ;;  %v2584_v9 = vmax.f32 %v2490_v44, 0.0  ;;  %v5792_v24 = vadd.f32 %v7359_v58, %v2269_v47  ;;  %v2271_v61 = vpop.f32.mrb[35].mxu0 }
 0x32c   : > { %v7476_v38 = vld [vmem:[#allocation3 + $0xc0] sm:$0xff] }
 0x32d   : > { %2617 = vst [vmem:[#allocation3 + $0xd9] sm:$0xff] %v2584_v9  ;;  %v2495_v30 = vadd.f32 %v5792_v24, %v7317_v42 }
 0x32e   : > { %3826 = vmatmul.mubr.f32.gmra.mrb[64].mxu1 %v7476_v38  ;;  %v2274_v17 = vpop.f32.mrb[36].mxu0 }
 0x32f   : > { %3830 = vmatprep.mubr.f32.mxu1 %v2583_v5  ;;  %v2585_v43 = vmax.f32 %v2495_v30, 0.0  ;;  %v5793_v26 = vadd.f32 %v7359_v58, %v2274_v17  ;;  %v2276_v12 = vpop.f32.mrb[37].mxu0 }
 0x330   : > { %v7481_v21 = vld [vmem:[#allocation3 + $0xc2] sm:$0xff]  ;;  %v7485_v44 = vld [vmem:[#allocation3 + $0xca] sm:$0xff] }
 0x331   : > { %v7483_v6 = vld [vmem:[#allocation3 + $0xc8] sm:$0xff]  ;;  %2618 = vst [vmem:[#allocation3 + $0xe1] sm:$0xff] %v2585_v43  ;;  %v2500_v47 = vadd.f32 %v5793_v26, %v7324_v16  ;;  %5281 = vmatprep.mubr.f32.mxu0 %v7481_v21 }
 0x332   : > { %3831 = vmatmul.mubr.f32.gmra.mrb[66].mxu1 %v7483_v6  ;;  %v2279_v42 = vpop.f32.mrb[38].mxu0  ;;  %5282 = vmatmul.mubr.f32.gmra.mrb[76].mxu0 %v7485_v44 }
 0x333   : > { %3835 = vmatprep.mubr.f32.mxu1 %v2584_v9  ;;  %v2586_v5 = vmax.f32 %v2500_v47, 0.0  ;;  %v5794_v24 = vadd.f32 %v7359_v58, %v2279_v42  ;;  %v2281_v61 = vpop.f32.mrb[39].mxu0 }
 0x334   : > { %v7492_v30 = vld [vmem:[#allocation3 + $0xd8] sm:$0xff] }
 0x335   : > { %2619 = vst [vmem:[#allocation3 + $0xf1] sm:$0xff] %v2586_v5  ;;  %v2505_v17 = vadd.f32 %v5794_v24, %v7322_v13 }
 0x336   : > { %3836 = vmatmul.mubr.f32.gmra.mrb[68].mxu1 %v7492_v30  ;;  %v2284_v16 = vpop.f32.mrb[40].mxu0 }
 0x337   : > { %3840 = vmatprep.mubr.f32.mxu1 %v2585_v43  ;;  %v2587_v26 = vmax.f32 %v2505_v17, 0.0  ;;  %v5795_v12 = vadd.f32 %v7359_v58, %v2284_v16  ;;  %v2286_v49 = vpop.f32.mrb[41].mxu0 }
 0x338   : > { %v7497_v34 = vld [vmem:[#allocation3 + $0xda] sm:$0xff]  ;;  %v7501_v47 = vld [vmem:[#allocation3 + $0xe2] sm:$0xff] }
 0x339   : > { %v7499_v9 = vld [vmem:[#allocation3 + $0xe0] sm:$0xff]  ;;  %2620 = vst [vmem:[#allocation3 + $0xf9] sm:$0xff] %v2587_v26  ;;  %v2510_v42 = vadd.f32 %v5795_v12, %v7329_v40  ;;  %5284 = vmatprep.mubr.f32.mxu0 %v7497_v34 }
 0x33a   : > { %3841 = vmatmul.mubr.f32.gmra.mrb[70].mxu1 %v7499_v9  ;;  %v2289_v13 = vpop.f32.mrb[42].mxu0  ;;  %5285 = vmatmul.mubr.f32.gmra.mrb[78].mxu0 %v7501_v47 }
 0x33b   : > { %3845 = vmatprep.mubr.f32.mxu1 %v2586_v5  ;;  %v2588_v43 = vmax.f32 %v2510_v42, 0.0  ;;  %v5796_v49 = vadd.f32 %v7359_v58, %v2289_v13  ;;  %v2291_v24 = vpop.f32.mrb[43].mxu0 }
 0x33c   : > { %v7508_v61 = vld [vmem:[#allocation3 + $0xf0] sm:$0xff] }
 0x33d   : > { %2621 = vst [vmem:[#allocation3 + $0x109] sm:$0xff] %v2588_v43  ;;  %v2515_v17 = vadd.f32 %v5796_v49, %v7327_v36 }
 0x33e   : > { %3846 = vmatmul.mubr.f32.gmra.mrb[72].mxu1 %v7508_v61  ;;  %v2294_v40 = vpop.f32.mrb[44].mxu0 }
 0x33f   : > { %3850 = vmatprep.mubr.f32.mxu1 %v2587_v26  ;;  %v2589_v16 = vmax.f32 %v2515_v17, 0.0  ;;  %v5797_v12 = vadd.f32 %v7359_v58, %v2294_v40  ;;  %v2296_v62 = vpop.f32.mrb[45].mxu0 }
 0x340   : > { %v7513_v60 = vld [vmem:[#allocation3 + $0xf2] sm:$0xff]  ;;  %v7517_v42 = vld [vmem:[#allocation3 + $0xfa] sm:$0xff] }
 0x341   : > { %v7515_v5 = vld [vmem:[#allocation3 + $0xf8] sm:$0xff]  ;;  %2622 = vst [vmem:[#allocation3 + $0x111] sm:$0xff] %v2589_v16  ;;  %v2520_v13 = vadd.f32 %v5797_v12, %v7334_v10  ;;  %5287 = vmatprep.mubr.f32.mxu0 %v7513_v60 }
 0x342   : > { %3851 = vmatmul.mubr.f32.gmra.mrb[74].mxu1 %v7515_v5  ;;  %v2299_v36 = vpop.f32.mrb[46].mxu0  ;;  %5288 = vmatmul.mubr.f32.gmra.mrb[80].mxu0 %v7517_v42 }
 0x343   : > { %3855 = vmatprep.mubr.f32.mxu1 %v2588_v43  ;;  %v2590_v26 = vmax.f32 %v2520_v13, 0.0  ;;  %v5798_v62 = vadd.f32 %v7359_v58, %v2299_v36  ;;  %v2301_v49 = vpop.f32.mrb[47].mxu0 }
 0x344   : > { %v7524_v24 = vld [vmem:[#allocation3 + $0x108] sm:$0xff] }
 0x345   : > { %2623 = vst [vmem:[#allocation3 + $0x121] sm:$0xff] %v2590_v26  ;;  %v2525_v17 = vadd.f32 %v5798_v62, %v7332_v46 }
 0x346   : > { %3856 = vmatmul.mubr.f32.gmra.mrb[76].mxu1 %v7524_v24  ;;  %v2304_v10 = vpop.f32.mrb[48].mxu0 }
 0x347   : > { %3860 = vmatprep.mubr.f32.mxu1 %v2589_v16  ;;  %v2591_v40 = vmax.f32 %v2525_v17, 0.0  ;;  %v5799_v12 = vadd.f32 %v7359_v58, %v2304_v10  ;;  %v2306_v32 = vpop.f32.mrb[49].mxu0 }
 0x348   : > { %v7529_v19 = vld [vmem:[#allocation3 + $0x10a] sm:$0xff]  ;;  %v7533_v13 = vld [vmem:[#allocation3 + $0x112] sm:$0xff] }
 0x349   : > { %v7531_v43 = vld [vmem:[#allocation3 + $0x110] sm:$0xff]  ;;  %2624 = vst [vmem:[#allocation3 + $0x129] sm:$0xff] %v2591_v40  ;;  %v2530_v36 = vadd.f32 %v5799_v12, %v7339_v1  ;;  %5290 = vmatprep.mubr.f32.mxu0 %v7529_v19 }
 0x34a   : > { %3861 = vmatmul.mubr.f32.gmra.mrb[78].mxu1 %v7531_v43  ;;  %v2309_v46 = vpop.f32.mrb[50].mxu0  ;;  %5291 = vmatmul.mubr.f32.gmra.mrb[82].mxu0 %v7533_v13 }
 0x34b   : > { %3865 = vmatprep.mubr.f32.mxu1 %v2590_v26  ;;  %v7539_v16 = vmax.f32 %v2530_v36, 0.0  ;;  %v5800_v32 = vadd.f32 %v7359_v58, %v2309_v46  ;;  %v2311_v62 = vpop.f32.mrb[51].mxu0 }
 0x34c   : > { %v7542_v49 = vld [vmem:[#allocation3 + $0x120] sm:$0xff] }
 0x34d   : > { %8119 = vst [vmem:[#allocation22_spill] sm:$0xff] %v7539_v16  ;;  %2625 = vst [vmem:[#allocation3 + $0x139] sm:$0xff] %v7539_v16  ;;  %v2535_v17 = vadd.f32 %v5800_v32, %v7337_v56 }
 0x34e   : > { %3866 = vmatmul.mubr.f32.gmra.mrb[80].mxu1 %v7542_v49  ;;  %v2314_v1 = vpop.f32.mrb[52].mxu0 }
 0x34f   : > { %3870 = vmatprep.mubr.f32.mxu1 %v2591_v40  ;;  %v7547_v10 = vmax.f32 %v2535_v17, 0.0  ;;  %v5801_v12 = vadd.f32 %v7359_v58, %v2314_v1  ;;  %v2316_v26 = vpop.f32.mrb[53].mxu0 }
 0x350   : > { %v7550_v36 = vld [vmem:[#allocation3 + $0x122] sm:$0xff]  ;;  %v7554_v46 = vld [vmem:[#allocation3 + $0x12a] sm:$0xff] }
 0x351   : > { %8120 = vst [vmem:[#allocation23_spill] sm:$0xff] %v7547_v10  ;;  %v7552_v23 = vld [vmem:[#allocation3 + $0x128] sm:$0xff]  ;;  %8121 = vst [vmem:[#allocation24_spill] sm:$0xff] %v7554_v46  ;;  %v2540_v62 = vadd.f32 %v5801_v12, %v7344_v15  ;;  %5293 = vmatprep.mubr.f32.mxu0 %v7550_v36 }
 0x352   : > { %2626 = vst [vmem:[#allocation3 + $0x141] sm:$0xff] %v7547_v10  ;;  %3871 = vmatmul.mubr.f32.gmra.mrb[82].mxu1 %v7552_v23  ;;  %v2319_v56 = vpop.f32.mrb[54].mxu0  ;;  %5294 = vmatmul.mubr.f32.gmra.mrb[84].mxu0 %v7554_v46 }
 0x353   : > { %3875 = vmatprep.mubr.f32.mxu1 %v7539_v16  ;;  %v7562_v40 = vmax.f32 %v2540_v62, 0.0  ;;  %v5802_v32 = vadd.f32 %v7359_v58, %v2319_v56  ;;  %v2321_v17 = vpop.f32.mrb[55].mxu0 }
 0x354   : > { %v7565_v1 = vld [vmem:[#allocation3 + $0x138] sm:$0xff] }
 0x355   : > { %8122 = vst [vmem:[#allocation25_spill] sm:$0xff] %v7562_v40  ;;  %2627 = vst [vmem:[#allocation3 + $0x151] sm:$0xff] %v7562_v40  ;;  %v2545_v15 = vadd.f32 %v5802_v32, %v7342_v54 }
 0x356   : > { %3876 = vmatmul.mubr.f32.gmra.mrb[84].mxu1 %v7565_v1  ;;  %v2324_v12 = vpop.f32.mrb[56].mxu0 }
 0x357   : > { %3880 = vmatprep.mubr.f32.mxu1 %v7547_v10  ;;  %v7571_v26 = vmax.f32 %v2545_v15, 0.0  ;;  %v5803_v16 = vadd.f32 %v7359_v58, %v2324_v12  ;;  %v2326_v62 = vpop.f32.mrb[57].mxu0 }
 0x359   : > { %8123 = vst [vmem:[#allocation26_spill] sm:$0xff] %v7571_v26  ;;  %v7574_v46 = vld [vmem:[#allocation3 + $0x13a] sm:$0xff]  ;;  %v7578_v17 = vld [vmem:[#allocation3 + $0x142] sm:$0xff]  ;;  %2628 = vst [vmem:[#allocation3 + $0x159] sm:$0xff] %v7571_v26  ;;  %v2550_v54 = vadd.f32 %v5803_v16, %v7349_v2 }
 0x35a   : > { %8124 = vst [vmem:[#allocation27_spill] sm:$0xff] %v7574_v46  ;;  %v7576_v56 = vld [vmem:[#allocation3 + $0x140] sm:$0xff]  ;;  %8125 = vst [vmem:[#allocation28_spill] sm:$0xff] %v7578_v17  ;;  %5296 = vmatprep.mubr.f32.mxu0 %v7574_v46  ;;  %v2329_v32 = vpop.f32.mrb[58].mxu0 }
 0x35b   : > { %3881 = vmatmul.mubr.f32.gmra.mrb[86].mxu1 %v7576_v56  ;;  %5297 = vmatmul.mubr.f32.gmra.mrb[86].mxu0 %v7578_v17  ;;  %v7586_v15 = vmax.f32 %v2550_v54, 0.0  ;;  %v5804_v12 = vadd.f32 %v7359_v58, %v2329_v32  ;;  %v2331_v62 = vpop.f32.mrb[59].mxu0 }
 0x35c   : > { %3885 = vmatprep.mubr.f32.mxu1 %v7562_v40  ;;  %v7589_v10 = vld [vmem:[#allocation3 + $0x150] sm:$0xff] }
 0x35d   : > { %8126 = vst [vmem:[#allocation29_spill] sm:$0xff] %v7586_v15  ;;  %2629 = vst [vmem:[#allocation3 + $0x169] sm:$0xff] %v7586_v15  ;;  %v2555_v2 = vadd.f32 %v5804_v12, %v7347_v0 }
 0x35e   : > { %v2334_v16 = vpop.f32.mrb[60].mxu0 }
 0x35f   : > { %3886 = vmatmul.mubr.f32.gmra.mrb[88].mxu1 %v7589_v10  ;;  %v7595_v46 = vmax.f32 %v2555_v2, 0.0  ;;  %v5805_v40 = vadd.f32 %v7359_v58, %v2334_v16  ;;  %v2336_v54 = vpop.f32.mrb[61].mxu0 }
 0x360   : > { %3890 = vmatprep.mubr.f32.mxu1 %v7571_v26  ;;  %v7598_v17 = vld [vmem:[#allocation3 + $0x158] sm:$0xff] }
 0x361   : > { %8127 = vst [vmem:[#allocation30_spill] sm:$0xff] %v7595_v46  ;;  %2630 = vst [vmem:[#allocation3 + $0x171] sm:$0xff] %v7595_v46  ;;  %v7602_v32 = vadd.f32 %v5805_v40, %v7354_v50  ;;  %v3562_v40 = vld [vmem:[#allocation8 + $0x200] sm:$0xff]  ;;  %v3563_v54 = vld [vmem:[#allocation8 + $0x208] sm:$0xff] }
 0x362   : > { %v2339_v0 = vpop.f32.mrb[62].mxu0 }
 0x363   : > { %8128 = vst [vmem:[#allocation31_spill] sm:$0xff] %v7602_v32  ;;  %3891 = vmatmul.mubr.f32.gmra.mrb[90].mxu1 %v7598_v17  ;;  %v8079_v12 = vmax.f32 %v7602_v32, 0.0  ;;  %v5806_v62 = vadd.f32 %v7359_v58, %v2339_v0  ;;  %v2341_v2 = vpop.f32.mrb[63].mxu0  ;;  %v2761_v58 = vld [vmem:[#allocation3 + $0x2] sm:$0xff]  ;;  %v3566_v32 = vld [vmem:[#allocation8 + $0x220] sm:$0xff] }
 0x364   : > { %3895 = vmatprep.mubr.f32.mxu1 %v7586_v15  ;;  %v7608_v26 = vld [vmem:[#allocation3 + $0x168] sm:$0xff]  ;;  %v3564_v0 = vld [vmem:[#allocation8 + $0x210] sm:$0xff] }
 0x365   : > { %2631 = vst [vmem:[#allocation3 + $0x181] sm:$0xff] %v8079_v12  ;;  %v7613_v16 = vadd.f32 %v5806_v62, %v7352_v39  ;;  %v5632_v39 = vpack.c.bf16 %v3563_v54, %v3562_v40  ;;  %v3565_v62 = vld [vmem:[#allocation8 + $0x218] sm:$0xff]  ;;  %v7628_v54 = vld [vmem:[#allocation3 + $0x1a] sm:$0xff] }
 0x366   : > { %v2762_v2 = vld [vmem:[#allocation3 + $0xa] sm:$0xff]  ;;  %v5635_v12 = vpack.c.bf16 %v3565_v62, %v3564_v0  ;;  %v7633_v0 = vld [vmem:[#allocation3 + $0x22] sm:$0xff] }
 0x367   : > { %3896 = vmatmul.mubr.f32.gmra.mrb[92].mxu1 %v7608_v26  ;;  %v8082_v50 = vmax.f32 %v7613_v16, 0.0  ;;  %v3569_v40 = vld [vmem:[#allocation8 + $0x238] sm:$0xff]  ;;  %v3576_v62 = vld [vmem:[#allocation8 + $0x270] sm:$0xff] }
 0x368   : > { %3900 = vmatprep.mubr.f32.mxu1 %v7595_v46  ;;  %v7618_v15 = vld [vmem:[#allocation3 + $0x170] sm:$0xff]  ;;  %v3567_v46 = vld [vmem:[#allocation8 + $0x228] sm:$0xff] }
 0x369   : > { %2632 = vst [vmem:[#allocation3 + $0x189] sm:$0xff] %v8082_v50  ;;  %v5638_v50 = vpack.c.bf16 %v3567_v46, %v3566_v32  ;;  %v3572_v46 = vld [vmem:[#allocation8 + $0x250] sm:$0xff]  ;;  %v3573_v32 = vld [vmem:[#allocation8 + $0x258] sm:$0xff] }
 0x36b   : > { %3901 = vmatmul.mubr.f32.gmra.mrb[94].mxu1 %v7618_v15 }
 0x36c   : > { %3970 = vmatprep.mubr.f32.mxu1 %v7370_v57  ;;  %v3568_v57 = vld [vmem:[#allocation8 + $0x230] sm:$0xff] }
 0x36f   : > { %3971 = vmatmul.mubr.f32.vlgmr.msra.gmra.mrb[32].mxu1 %v2761_v58  ;;  %v3570_v58 = vld [vmem:[#allocation8 + $0x240] sm:$0xff] }
 0x370   : > { %3975 = vmatprep.mubr.f32.mxu1 %v7375_v33  ;;  %5633 = vmatpush1.bf16.msra.mxu1 %v5632_v39  ;;  %v5641_v33 = vpack.c.bf16 %v3569_v40, %v3568_v57  ;;  %v3571_v39 = vld [vmem:[#allocation8 + $0x248] sm:$0xff]  ;;  %v3581_v40 = vld [vmem:[#allocation8 + $0x298] sm:$0xff] }
 0x371   : > { %5634 = vmatprep.subr.bf16.mxu1 %v8101_v8  ;;  %v3579_v57 = vld [vmem:[#allocation8 + $0x288] sm:$0xff] }
 0x373   : > { %3976 = vmatmul.mubr.f32.gmra.mrb[34].mxu1 %v2762_v2  ;;  %v3577_v2 = vld [vmem:[#allocation8 + $0x278] sm:$0xff] }
 0x374   : > { %3980 = vmatprep.mubr.f32.mxu1 %v7380_v51  ;;  %5636 = vmatpush1.bf16.msra.mxu1 %v5635_v12  ;;  %v5644_v51 = vpack.c.bf16 %v3571_v39, %v3570_v58  ;;  %v3574_v12 = vld [vmem:[#allocation8 + $0x260] sm:$0xff]  ;;  %v3585_v58 = vld [vmem:[#allocation8 + $0x2b8] sm:$0xff]  ;;  %v3587_v39 = vld [vmem:[#allocation8 + $0x2c8] sm:$0xff] }
 0x375   : > { %5637 = vmatprep.subr.bf16.mxu1 %v8101_v8 }
 0x377   : > { %3981 = vmatmul.mubr.f32.gmra.mrb[36].mxu1 %v7628_v54 }
 0x378   : > { %3985 = vmatprep.mubr.f32.mxu1 %v7387_v59  ;;  %5639 = vmatpush1.bf16.msra.mxu1 %v5638_v50  ;;  %v5647_v59 = vpack.c.bf16 %v3573_v32, %v3572_v46  ;;  %v3575_v50 = vld [vmem:[#allocation8 + $0x268] sm:$0xff]  ;;  %v3593_v32 = vld [vmem:[#allocation8 + $0x2f8] sm:$0xff] }
 0x379   : > { %5640 = vmatprep.subr.bf16.mxu1 %v8101_v8  ;;  %v3591_v46 = vld [vmem:[#allocation8 + $0x2e8] sm:$0xff] }
 0x37b   : > { %3986 = vmatmul.mubr.f32.gmra.mrb[38].mxu1 %v7633_v0 }
 0x37c   : > { %3990 = vmatprep.mubr.f32.mxu1 %v7396_v31  ;;  %5642 = vmatpush1.bf16.msra.mxu1 %v5641_v33  ;;  %v5650_v31 = vpack.c.bf16 %v3575_v50, %v3574_v12  ;;  %v3583_v33 = vld [vmem:[#allocation8 + $0x2a8] sm:$0xff]  ;;  %v3598_v50 = vld [vmem:[#allocation8 + $0x320] sm:$0xff] }
 0x37d   : > { %5643 = vmatprep.subr.bf16.mxu1 %v8101_v8 }
 0x37f   : > { %3991 = vmatmul.mubr.f32.gmra.mrb[40].mxu1 %v7385_v29  ;;  %v5653_v29 = vpack.c.bf16 %v3577_v2, %v3576_v62  ;;  %v2890_v62 = vld [vmem:[#allocation3 + $0x21] sm:$0xff] }
 0x380   : > { %3995 = vmatprep.mubr.f32.mxu1 %v7403_v25  ;;  %5645 = vmatpush1.bf16.msra.mxu1 %v5644_v51  ;;  %v3578_v25 = vld [vmem:[#allocation8 + $0x280] sm:$0xff]  ;;  %v3589_v51 = vld [vmem:[#allocation8 + $0x2d8] sm:$0xff] }
 0x381   : > { %5646 = vmatprep.subr.bf16.mxu1 %v8101_v8 }
 0x383   : > { %3996 = vmatmul.mubr.f32.gmra.mrb[42].mxu1 %v7389_v14  ;;  %v5656_v14 = vpack.c.bf16 %v3579_v57, %v3578_v25  ;;  %v3601_v25 = vld [vmem:[#allocation8 + $0x338] sm:$0xff]  ;;  %v7737_v57 = vld [vmem:[#allocation3 + $0x31] sm:$0xff] }
 0x384   : > { %4000 = vmatprep.mubr.f32.mxu1 %v7412_v22  ;;  %5648 = vmatpush1.bf16.msra.mxu1 %v5647_v59  ;;  %v3580_v22 = vld [vmem:[#allocation8 + $0x290] sm:$0xff] }
 0x385   : > { %5649 = vmatprep.subr.bf16.mxu1 %v8101_v8 }
 0x387   : > { %4001 = vmatmul.mubr.f32.gmra.mrb[44].mxu1 %v7401_v20  ;;  %v5659_v20 = vpack.c.bf16 %v3581_v40, %v3580_v22 }
 0x388   : > { %4005 = vmatprep.mubr.f32.mxu1 %v7419_v35  ;;  %5651 = vmatpush1.bf16.msra.mxu1 %v5650_v31  ;;  %v3582_v35 = vld [vmem:[#allocation8 + $0x2a0] sm:$0xff]  ;;  %v3599_v31 = vld [vmem:[#allocation8 + $0x328] sm:$0xff] }
 0x389   : > { %5652 = vmatprep.subr.bf16.mxu1 %v8101_v8  ;;  %v5686_v2 = vpack.c.bf16 %v3599_v31, %v3598_v50  ;;  %v7769_v50 = vld [vmem:[#allocation3 + $0x69] sm:$0xff]  ;;  %v2961_v31 = vld [vmem:[#allocation3 + $0x7a] sm:$0xff] }
 0x38b   : > { %4006 = vmatmul.mubr.f32.gmra.mrb[46].mxu1 %v7405_v48  ;;  %v5662_v48 = vpack.c.bf16 %v3583_v33, %v3582_v35  ;;  %v3603_v35 = vld [vmem:[#allocation8 + $0x348] sm:$0xff] }
 0x38c   : > { %4010 = vmatprep.mubr.f32.mxu1 %v7428_v55  ;;  %5654 = vmatpush1.bf16.msra.mxu1 %v5653_v29  ;;  %v3584_v55 = vld [vmem:[#allocation8 + $0x2b0] sm:$0xff] }
 0x38d   : > { %5655 = vmatprep.subr.bf16.mxu1 %v8101_v8  ;;  %v3600_v29 = vld [vmem:[#allocation8 + $0x330] sm:$0xff] }
 0x38e   : > { %v5689_v40 = vpack.c.bf16 %v3601_v25, %v3600_v29  ;;  %v7745_v33 = vld [vmem:[#allocation3 + $0x39] sm:$0xff] }
 0x38f   : > { %4011 = vmatmul.mubr.f32.gmra.mrb[48].mxu1 %v7417_v18  ;;  %v5665_v18 = vpack.c.bf16 %v3585_v58, %v3584_v55  ;;  %v3604_v58 = vld [vmem:[#allocation8 + $0x350] sm:$0xff] }
 0x390   : > { %4015 = vmatprep.mubr.f32.mxu1 %v7435_v41  ;;  %5657 = vmatpush1.bf16.msra.mxu1 %v5656_v14  ;;  %v3586_v41 = vld [vmem:[#allocation8 + $0x2c0] sm:$0xff]  ;;  %v7773_v29 = vld [vmem:[#allocation3 + $0x79] sm:$0xff] }
 0x391   : > { %5658 = vmatprep.subr.bf16.mxu1 %v8101_v8 }
 0x393   : > { %4016 = vmatmul.mubr.f32.gmra.mrb[50].mxu1 %v7421_v63  ;;  %v5668_v63 = vpack.c.bf16 %v3587_v39, %v3586_v41  ;;  %v7749_v41 = vld [vmem:[#allocation3 + $0x49] sm:$0xff] }
 0x394   : > { %4020 = vmatprep.mubr.f32.mxu1 %v7444_v4  ;;  %5660 = vmatpush1.bf16.msra.mxu1 %v5659_v20  ;;  %v3588_v4 = vld [vmem:[#allocation8 + $0x2d0] sm:$0xff]  ;;  %v3602_v20 = vld [vmem:[#allocation8 + $0x340] sm:$0xff] }
 0x395   : > { %5661 = vmatprep.subr.bf16.mxu1 %v8101_v8  ;;  %v5692_v55 = vpack.c.bf16 %v3603_v35, %v3602_v20  ;;  %v3614_v35 = vld [vmem:[#allocation8 + $0x3a0] sm:$0xff] }
 0x397   : > { %4021 = vmatmul.mubr.f32.gmra.mrb[52].mxu1 %v7433_v45  ;;  %v5671_v45 = vpack.c.bf16 %v3589_v51, %v3588_v4 }
 0x398   : > { %4025 = vmatprep.mubr.f32.mxu1 %v7451_v3  ;;  %5663 = vmatpush1.bf16.msra.mxu1 %v5662_v48  ;;  %v3590_v3 = vld [vmem:[#allocation8 + $0x2e0] sm:$0xff] }
 0x399   : > { %5664 = vmatprep.subr.bf16.mxu1 %v8101_v8  ;;  %v2957_v48 = vld [vmem:[#allocation3 + $0x4a] sm:$0xff] }
 0x39b   : > { %4026 = vmatmul.mubr.f32.gmra.mrb[54].mxu1 %v7437_v11  ;;  %v5674_v11 = vpack.c.bf16 %v3591_v46, %v3590_v3  ;;  %v3607_v3 = vld [vmem:[#allocation8 + $0x368] sm:$0xff] }
 0x39c   : > { %4030 = vmatprep.mubr.f32.mxu1 %v7460_v27  ;;  %5666 = vmatpush1.bf16.msra.mxu1 %v5665_v18  ;;  %v3592_v27 = vld [vmem:[#allocation8 + $0x2f0] sm:$0xff]  ;;  %v3605_v18 = vld [vmem:[#allocation8 + $0x358] sm:$0xff]  ;;  %v7757_v46 = vld [vmem:[#allocation3 + $0x51] sm:$0xff] }
 0x39d   : > { %5667 = vmatprep.subr.bf16.mxu1 %v8101_v8  ;;  %v5695_v51 = vpack.c.bf16 %v3605_v18, %v3604_v58  ;;  %v2963_v58 = vld [vmem:[#allocation3 + $0x92] sm:$0xff] }
 0x39f   : > { %4031 = vmatmul.mubr.f32.gmra.mrb[56].mxu1 %v7449_v7  ;;  %v5677_v7 = vpack.c.bf16 %v3593_v32, %v3592_v27  ;;  %v3608_v32 = vld [vmem:[#allocation8 + $0x370] sm:$0xff] }
 0x3a0   : > { %4035 = vmatprep.mubr.f32.mxu1 %v7467_v37  ;;  %5669 = vmatpush1.bf16.msra.mxu1 %v5668_v63  ;;  %v2958_v63 = vld [vmem:[#allocation3 + $0x52] sm:$0xff] }
 0x3a1   : > { %5670 = vmatprep.subr.bf16.mxu1 %v8101_v8 }
 0x3a3   : > { %4036 = vmatmul.mubr.f32.gmra.mrb[58].mxu1 %v7453_v52 }
 0x3a4   : > { %4040 = vmatprep.mubr.f32.mxu1 %v7476_v38  ;;  %5672 = vmatpush1.bf16.msra.mxu1 %v5671_v45  ;;  %v3606_v45 = vld [vmem:[#allocation8 + $0x360] sm:$0xff] }
 0x3a5   : > { %5673 = vmatprep.subr.bf16.mxu1 %v8101_v8  ;;  %v5698_v27 = vpack.c.bf16 %v3607_v3, %v3606_v45  ;;  %v7785_v45 = vld [vmem:[#allocation3 + $0x91] sm:$0xff] }
 0x3a7   : > { %4041 = vmatmul.mubr.f32.gmra.mrb[60].mxu1 %v7465_v53  ;;  %v8130_v53 = vld [vmem:[#allocation27_spill] sm:$0xff] }
 0x3a8   : > { %4045 = vmatprep.mubr.f32.mxu1 %v7483_v6  ;;  %5675 = vmatpush1.bf16.msra.mxu1 %v5674_v11  ;;  %v2959_v11 = vld [vmem:[#allocation3 + $0x62] sm:$0xff] }
 0x3a9   : > { %5676 = vmatprep.subr.bf16.mxu1 %v8101_v8 }
 0x3ab   : > { %4046 = vmatmul.mubr.f32.gmra.mrb[62].mxu1 %v7469_v28  ;;  %v7702_v28 = vld [vmem:[#allocation3 + $0x152] sm:$0xff] }
 0x3ac   : > { %4050 = vmatprep.mubr.f32.mxu1 %v7492_v30  ;;  %5678 = vmatpush1.bf16.msra.mxu1 %v5677_v7  ;;  %v7713_v30 = vld [vmem:[#allocation3 + $0x180] sm:$0xff]  ;;  %v3609_v7 = vld [vmem:[#allocation8 + $0x378] sm:$0xff] }
 0x3ad   : > { %5679 = vmatprep.subr.bf16.mxu1 %v8101_v8 }
 0x3af   : > { %4051 = vmatmul.mubr.f32.gmra.mrb[64].mxu1 %v7481_v21  ;;  %v8129_v21 = vld [vmem:[#allocation24_spill] sm:$0xff] }
 0x3b0   : > { %4055 = vmatprep.mubr.f32.mxu1 %v7499_v9  ;;  %v7716_v9 = vld [vmem:[#allocation3 + $0x16a] sm:$0xff] }
 0x3b3   : > { %4056 = vmatmul.mubr.f32.gmra.mrb[66].mxu1 %v7485_v44  ;;  %v7710_v44 = vld [vmem:[#allocation3 + $0x15a] sm:$0xff] }
 0x3b4   : > { %4060 = vmatprep.mubr.f32.mxu1 %v7508_v61 }
 0x3b7   : > { %4061 = vmatmul.mubr.f32.gmra.mrb[68].mxu1 %v7497_v34 }
 0x3b8   : > { %4065 = vmatprep.mubr.f32.mxu1 %v7515_v5  ;;  %v7721_v5 = vld [vmem:[#allocation3 + $0x188] sm:$0xff] }
 0x3bb   : > { %4066 = vmatmul.mubr.f32.gmra.mrb[70].mxu1 %v7501_v47 }
 0x3bc   : > { %4070 = vmatprep.mubr.f32.mxu1 %v7524_v24 }
 0x3bf   : > { %4071 = vmatmul.mubr.f32.gmra.mrb[72].mxu1 %v7513_v60 }
 0x3c0   : > { %4075 = vmatprep.mubr.f32.mxu1 %v7531_v43  ;;  %v3594_v43 = vld [vmem:[#allocation8 + $0x300] sm:$0xff] }
 0x3c3   : > { %4076 = vmatmul.mubr.f32.gmra.mrb[74].mxu1 %v7517_v42 }
 0x3c4   : > { %4080 = vmatprep.mubr.f32.mxu1 %v7542_v49  ;;  %v3595_v49 = vld [vmem:[#allocation8 + $0x308] sm:$0xff] }
 0x3c7   : > { %4081 = vmatmul.mubr.f32.gmra.mrb[76].mxu1 %v7529_v19 }
 0x3c8   : > { %4085 = vmatprep.mubr.f32.mxu1 %v7552_v23  ;;  %v8131_v23 = vld [vmem:[#allocation28_spill] sm:$0xff] }
 0x3cb   : > { %4086 = vmatmul.mubr.f32.gmra.mrb[78].mxu1 %v7533_v13 }
 0x3cc   : > { %4090 = vmatprep.mubr.f32.mxu1 %v7565_v1  ;;  %v5680_v1 = vpack.c.bf16 %v3595_v49, %v3594_v43  ;;  %v7761_v43 = vld [vmem:[#allocation3 + $0x61] sm:$0xff] }
 0x3cf   : > { %4091 = vmatmul.mubr.f32.gmra.mrb[80].mxu1 %v7550_v36 }
 0x3d0   : > { %4095 = vmatprep.mubr.f32.mxu1 %v7576_v56  ;;  %v3597_v56 = vld [vmem:[#allocation8 + $0x318] sm:$0xff] }
 0x3d3   : > { %4096 = vmatmul.mubr.f32.gmra.mrb[82].mxu1 %v8129_v21 }
 0x3d4   : > { %4100 = vmatprep.mubr.f32.mxu1 %v7589_v10  ;;  %v7726_v10 = vld [vmem:[#allocation3 + $0x172] sm:$0xff] }
 0x3d5   : > { %v7694_v52 = vpop.f32.mrb[64].mxu0 }
 0x3d6   : > { %v7697_v37 = vpop.f32.mrb[65].mxu0 }
 0x3d7   : > { %4101 = vmatmul.mubr.f32.gmra.mrb[84].mxu1 %v8130_v53 }
 0x3d8   : > { %4105 = vmatprep.mubr.f32.mxu1 %v7598_v17  ;;  %v2889_v17 = vld [vmem:[#allocation3 + $0x19] sm:$0xff] }
 0x3db   : > { %4106 = vmatmul.mubr.f32.gmra.mrb[86].mxu1 %v8131_v23 }
 0x3dc   : > { %4110 = vmatprep.mubr.f32.mxu1 %v7608_v26  ;;  %v3596_v26 = vld [vmem:[#allocation8 + $0x310] sm:$0xff] }
 0x3dd   : > { %v7704_v38 = vpop.f32.mrb[66].mxu0  ;;  %v5683_v12 = vpack.c.bf16 %v3597_v56, %v3596_v26  ;;  %v5701_v56 = vpack.c.bf16 %v3609_v7, %v3608_v32  ;;  %v3618_v7 = vld [vmem:[#allocation8 + $0x3c0] sm:$0xff] }
 0x3de   : > { %v7707_v6 = vpop.f32.mrb[67].mxu0 }
 0x3df   : > { %4111 = vmatmul.mubr.f32.gmra.mrb[88].mxu1 %v7702_v28 }
 0x3e0   : > { %4115 = vmatprep.mubr.f32.mxu1 %v7618_v15 }
 0x3e3   : > { %4116 = vmatmul.mubr.f32.gmra.mrb[90].mxu1 %v7710_v44 }
 0x3e4   : > { %4120 = vmatprep.mubr.f32.mxu1 %v7713_v30 }
 0x3e5   : > { %v7718_v61 = vpop.f32.mrb[68].mxu0 }
 0x3e6   : > { %v7723_v24 = vpop.f32.mrb[69].mxu0 }
 0x3e7   : > { %4121 = vmatmul.mubr.f32.gmra.mrb[92].mxu1 %v7716_v9 }
 0x3e8   : > { %4125 = vmatprep.mubr.f32.mxu1 %v7721_v5 }
 0x3eb   : > { %4126 = vmatmul.mubr.f32.gmra.mrb[94].mxu1 %v7726_v10 }
 0x3ec   : > { %4195 = vmatprep.mubr.f32.mxu1 %v7628_v54  ;;  %v2955_v54 = vld [vmem:[#allocation3 + $0x32] sm:$0xff] }
 0x3ed   : > { %v7730_v15 = vpop.f32.mrb[70].mxu0 }
 0x3ee   : > { %v7732_v59 = vpop.f32.mrb[71].mxu0 }
 0x3ef   : > { %4196 = vmatmul.mubr.f32.vlgmr.msra.gmra.mrb[32].mxu1 %v2889_v17  ;;  %v3610_v17 = vld [vmem:[#allocation8 + $0x380] sm:$0xff] }
 0x3f0   : > { %4200 = vmatprep.mubr.f32.mxu1 %v7633_v0  ;;  %5681 = vmatpush1.bf16.msra.mxu1 %v5680_v1  ;;  %v2956_v0 = vld [vmem:[#allocation3 + $0x3a] sm:$0xff]  ;;  %v2960_v1 = vld [vmem:[#allocation3 + $0x6a] sm:$0xff] }
 0x3f1   : > { %5682 = vmatprep.subr.bf16.mxu1 %v8101_v8 }
 0x3f3   : > { %4201 = vmatmul.mubr.f32.gmra.mrb[34].mxu1 %v2890_v62 }
 0x3f4   : > { %4205 = vmatprep.mubr.f32.mxu1 %v2955_v54  ;;  %5684 = vmatpush1.bf16.msra.mxu1 %v5683_v12  ;;  %v3611_v12 = vld [vmem:[#allocation8 + $0x388] sm:$0xff]  ;;  %v3612_v54 = vld [vmem:[#allocation8 + $0x390] sm:$0xff] }
 0x3f5   : > { %5685 = vmatprep.subr.bf16.mxu1 %v8101_v8  ;;  %v7739_v14 = vpop.f32.mrb[72].mxu0  ;;  %v5704_v62 = vpack.c.bf16 %v3611_v12, %v3610_v17  ;;  %v2965_v17 = vld [vmem:[#allocation3 + $0xaa] sm:$0xff] }
 0x3f6   : > { %v7742_v22 = vpop.f32.mrb[73].mxu0 }
 0x3f7   : > { %4206 = vmatmul.mubr.f32.gmra.mrb[36].mxu1 %v7737_v57 }
 0x3f8   : > { %4210 = vmatprep.mubr.f32.mxu1 %v2956_v0  ;;  %5687 = vmatpush1.bf16.msra.mxu1 %v5686_v2  ;;  %v3613_v2 = vld [vmem:[#allocation8 + $0x398] sm:$0xff] }
 0x3f9   : > { %5688 = vmatprep.subr.bf16.mxu1 %v8101_v8  ;;  %v2962_v0 = vld [vmem:[#allocation3 + $0x82] sm:$0xff]  ;;  %v5707_v20 = vpack.c.bf16 %v3613_v2, %v3612_v54 }
 0x3fa   : > { %v7797_v54 = vld [vmem:[#allocation3 + $0xa9] sm:$0xff] }
 0x3fb   : > { %4211 = vmatmul.mubr.f32.gmra.mrb[38].mxu1 %v7745_v33 }
 0x3fc   : > { %4215 = vmatprep.mubr.f32.mxu1 %v2957_v48  ;;  %5690 = vmatpush1.bf16.msra.mxu1 %v5689_v40  ;;  %v3615_v48 = vld [vmem:[#allocation8 + $0x3a8] sm:$0xff] }
 0x3fd   : > { %5691 = vmatprep.subr.bf16.mxu1 %v8101_v8  ;;  %v7751_v39 = vpop.f32.mrb[74].mxu0  ;;  %v5710_v18 = vpack.c.bf16 %v3615_v48, %v3614_v35  ;;  %v3622_v48 = vld [vmem:[#allocation8 + $0x3e0] sm:$0xff] }
 0x3fe   : > { %v7754_v4 = vpop.f32.mrb[75].mxu0 }
 0x3ff   : > { %4216 = vmatmul.mubr.f32.gmra.mrb[40].mxu1 %v7749_v41 }
 0x400   : > { %4220 = vmatprep.mubr.f32.mxu1 %v2958_v63  ;;  %5693 = vmatpush1.bf16.msra.mxu1 %v5692_v55  ;;  %v7781_v55 = vld [vmem:[#allocation3 + $0x81] sm:$0xff] }
 0x401   : > { %5694 = vmatprep.subr.bf16.mxu1 %v8101_v8  ;;  %v3616_v63 = vld [vmem:[#allocation8 + $0x3b0] sm:$0xff] }
 0x403   : > { %4221 = vmatmul.mubr.f32.gmra.mrb[42].mxu1 %v7757_v46 }
 0x404   : > { %4225 = vmatprep.mubr.f32.mxu1 %v2959_v11  ;;  %5696 = vmatpush1.bf16.msra.mxu1 %v5695_v51  ;;  %v3617_v51 = vld [vmem:[#allocation8 + $0x3b8] sm:$0xff]  ;;  %v2964_v11 = vld [vmem:[#allocation3 + $0x9a] sm:$0xff] }
 0x405   : > { %5697 = vmatprep.subr.bf16.mxu1 %v8101_v8  ;;  %v7763_v49 = vpop.f32.mrb[76].mxu0  ;;  %v5713_v32 = vpack.c.bf16 %v3617_v51, %v3616_v63  ;;  %v2967_v63 = vld [vmem:[#allocation3 + $0xc2] sm:$0xff] }
 0x406   : > { %v7766_v26 = vpop.f32.mrb[77].mxu0 }
 0x407   : > { %4226 = vmatmul.mubr.f32.gmra.mrb[44].mxu1 %v7761_v43 }
 0x408   : > { %4230 = vmatprep.mubr.f32.mxu1 %v2960_v1  ;;  %5699 = vmatpush1.bf16.msra.mxu1 %v5698_v27  ;;  %v3619_v1 = vld [vmem:[#allocation8 + $0x3c8] sm:$0xff] }
 0x409   : > { %5700 = vmatprep.subr.bf16.mxu1 %v8101_v8  ;;  %v5716_v12 = vpack.c.bf16 %v3619_v1, %v3618_v7  ;;  %v7809_v7 = vld [vmem:[#allocation3 + $0xc1] sm:$0xff] }
 0x40b   : > { %4231 = vmatmul.mubr.f32.gmra.mrb[46].mxu1 %v7769_v50 }
 0x40c   : > { %4235 = vmatprep.mubr.f32.mxu1 %v2961_v31  ;;  %5702 = vmatpush1.bf16.msra.mxu1 %v5701_v56  ;;  %v7793_v56 = vld [vmem:[#allocation3 + $0x99] sm:$0xff] }
 0x40d   : > { %5703 = vmatprep.subr.bf16.mxu1 %v8101_v8  ;;  %v7775_v25 = vpop.f32.mrb[78].mxu0  ;;  %v3620_v31 = vld [vmem:[#allocation8 + $0x3d0] sm:$0xff] }
 0x40e   : > { %v7778_v40 = vpop.f32.mrb[79].mxu0 }
 0x40f   : > { %4236 = vmatmul.mubr.f32.gmra.mrb[48].mxu1 %v7773_v29 }
 0x410   : > { %4240 = vmatprep.mubr.f32.mxu1 %v2962_v0  ;;  %5705 = vmatpush1.bf16.msra.mxu1 %v5704_v62  ;;  %v3621_v62 = vld [vmem:[#allocation8 + $0x3d8] sm:$0xff]  ;;  %v2966_v0 = vld [vmem:[#allocation3 + $0xb2] sm:$0xff] }
 0x411   : > { %5706 = vmatprep.subr.bf16.mxu1 %v8101_v8  ;;  %v5719_v35 = vpack.c.bf16 %v3621_v62, %v3620_v31  ;;  %v7817_v62 = vld [vmem:[#allocation3 + $0xc9] sm:$0xff] }
 0x413   : > { %4241 = vmatmul.mubr.f32.gmra.mrb[50].mxu1 %v7781_v55 }
 0x414   : > { %4245 = vmatprep.mubr.f32.mxu1 %v2963_v58  ;;  %5708 = vmatpush1.bf16.msra.mxu1 %v5707_v20  ;;  %v3623_v58 = vld [vmem:[#allocation8 + $0x3e8] sm:$0xff] }
 0x415   : > { %5709 = vmatprep.subr.bf16.mxu1 %v8101_v8  ;;  %v7787_v3 = vpop.f32.mrb[80].mxu0  ;;  %v5722_v51 = vpack.c.bf16 %v3623_v58, %v3622_v48 }
 0x416   : > { %v7790_v27 = vpop.f32.mrb[81].mxu0 }
 0x417   : > { %4246 = vmatmul.mubr.f32.gmra.mrb[52].mxu1 %v7785_v45 }
 0x418   : > { %4250 = vmatprep.mubr.f32.mxu1 %v2964_v11  ;;  %5711 = vmatpush1.bf16.msra.mxu1 %v5710_v18  ;;  %v7805_v18 = vld [vmem:[#allocation3 + $0xb1] sm:$0xff]  ;;  %v3624_v11 = vld [vmem:[#allocation8 + $0x3f0] sm:$0xff] }
 0x419   : > { %5712 = vmatprep.subr.bf16.mxu1 %v8101_v8 }
 0x41b   : > { %4251 = vmatmul.mubr.f32.gmra.mrb[54].mxu1 %v7793_v56 }
 0x41c   : > { %4255 = vmatprep.mubr.f32.mxu1 %v2965_v17  ;;  %5714 = vmatpush1.bf16.msra.mxu1 %v5713_v32  ;;  %v3625_v32 = vld [vmem:[#allocation8 + $0x3f8] sm:$0xff] }
 0x41d   : > { %5715 = vmatprep.subr.bf16.mxu1 %v8101_v8  ;;  %v7799_v2 = vpop.f32.mrb[82].mxu0  ;;  %v2968_v17 = vld [vmem:[#allocation3 + $0xca] sm:$0xff]  ;;  %v5725_v31 = vpack.c.bf16 %v3625_v32, %v3624_v11  ;;  %v8136_v11 = vld [vmem:[#allocation26_spill] sm:$0xff] }
 0x41e   : > { %v7802_v20 = vpop.f32.mrb[83].mxu0  ;;  %v7869_v32 = vld [vmem:[#allocation3 + $0x182] sm:$0xff] }
 0x41f   : > { %4256 = vmatmul.mubr.f32.gmra.mrb[56].mxu1 %v7797_v54 }
 0x420   : > { %4260 = vmatprep.mubr.f32.mxu1 %v2966_v0  ;;  %5717 = vmatpush1.bf16.msra.mxu1 %v5716_v12  ;;  %v8132_v0 = vld [vmem:[#allocation14_spill] sm:$0xff] }
 0x421   : > { %5718 = vmatprep.subr.bf16.mxu1 %v8101_v8 }
 0x423   : > { %4261 = vmatmul.mubr.f32.gmra.mrb[58].mxu1 %v7805_v18 }
 0x424   : > { %4265 = vmatprep.mubr.f32.mxu1 %v2967_v63  ;;  %5720 = vmatpush1.bf16.msra.mxu1 %v5719_v35  ;;  %v7822_v35 = vld [vmem:[#allocation3 + $0xd9] sm:$0xff] }
 0x425   : > { %5721 = vmatprep.subr.bf16.mxu1 %v8101_v8  ;;  %v7811_v1 = vpop.f32.mrb[84].mxu0  ;;  %v7838_v63 = vld [vmem:[#allocation3 + $0xf9] sm:$0xff] }
 0x426   : > { %v7814_v12 = vpop.f32.mrb[85].mxu0 }
 0x427   : > { %4266 = vmatmul.mubr.f32.gmra.mrb[60].mxu1 %v7809_v7 }
 0x428   : > { %4270 = vmatprep.mubr.f32.mxu1 %v2968_v17  ;;  %5723 = vmatpush1.bf16.msra.mxu1 %v5722_v51  ;;  %v7842_v51 = vld [vmem:[#allocation3 + $0x109] sm:$0xff] }
 0x429   : > { %5724 = vmatprep.subr.bf16.mxu1 %v8101_v8  ;;  %v7830_v8 = vld [vmem:[#allocation3 + $0xe1] sm:$0xff] }
 0x42b   : > { %4271 = vmatmul.mubr.f32.gmra.mrb[62].mxu1 %v7817_v62 }
 0x42c   : > { %4275 = vmatprep.mubr.f32.mxu1 %v7497_v34  ;;  %5726 = vmatpush1.bf16.msra.mxu1 %v5725_v31  ;;  %v7834_v34 = vld [vmem:[#allocation3 + $0xf1] sm:$0xff] }
 0x42d   : > { %5759 = vmatprep.subr.bf16.mxu1 %v8132_v0  ;;  %v7874_v31 = vld [vmem:[#allocation3 + $0x18a] sm:$0xff] }
 0x42e   : > { %v7824_v48 = vpop.f32.mrb[86].mxu0 }
 0x42f   : > { %4276 = vmatmul.mubr.f32.gmra.mrb[64].mxu1 %v7822_v35  ;;  %v7827_v58 = vpop.f32.mrb[87].mxu0 }
 0x430   : > { %4280 = vmatprep.mubr.f32.mxu1 %v7501_v47  ;;  %v7846_v47 = vld [vmem:[#allocation3 + $0x111] sm:$0xff] }
 0x433   : > { %4281 = vmatmul.mubr.f32.gmra.mrb[66].mxu1 %v7830_v8 }
 0x434   : > { %4285 = vmatprep.mubr.f32.mxu1 %v7513_v60  ;;  %v7850_v60 = vld [vmem:[#allocation3 + $0x121] sm:$0xff] }
 0x437   : > { %4286 = vmatmul.mubr.f32.gmra.mrb[68].mxu1 %v7834_v34 }
 0x438   : > { %4290 = vmatprep.mubr.f32.mxu1 %v7517_v42  ;;  %v7854_v42 = vld [vmem:[#allocation3 + $0x129] sm:$0xff] }
 0x43b   : > { %4291 = vmatmul.mubr.f32.gmra.mrb[70].mxu1 %v7838_v63 }
 0x43c   : > { %4295 = vmatprep.mubr.f32.mxu1 %v7529_v19  ;;  %v8133_v19 = vld [vmem:[#allocation22_spill] sm:$0xff] }
 0x43f   : > { %4296 = vmatmul.mubr.f32.gmra.mrb[72].mxu1 %v7842_v51 }
 0x440   : > { %4300 = vmatprep.mubr.f32.mxu1 %v7533_v13  ;;  %v8134_v13 = vld [vmem:[#allocation23_spill] sm:$0xff] }
 0x443   : > { %4301 = vmatmul.mubr.f32.gmra.mrb[74].mxu1 %v7846_v47 }
 0x444   : > { %4305 = vmatprep.mubr.f32.mxu1 %v7550_v36  ;;  %v8135_v36 = vld [vmem:[#allocation25_spill] sm:$0xff] }
 0x447   : > { %4306 = vmatmul.mubr.f32.gmra.mrb[76].mxu1 %v7850_v60 }
 0x448   : > { %4310 = vmatprep.mubr.f32.mxu1 %v8129_v21  ;;  %v8137_v21 = vld [vmem:[#allocation29_spill] sm:$0xff] }
 0x44b   : > { %4311 = vmatmul.mubr.f32.gmra.mrb[78].mxu1 %v7854_v42 }
 0x44c   : > { %4315 = vmatprep.mubr.f32.mxu1 %v8130_v53  ;;  %v8138_v53 = vld [vmem:[#allocation30_spill] sm:$0xff] }
 0x44f   : > { %4316 = vmatmul.mubr.f32.gmra.mrb[80].mxu1 %v8133_v19  ;;  %v8141_v19 = vmax.f32 %v7613_v16, 0.0  ;;  %v3020_v16 = vld [vmem:[#allocation3 + $0x48] sm:$0xff] }
 0x450   : > { %4320 = vmatprep.mubr.f32.mxu1 %v8131_v23  ;;  %v8139_v23 = vld [vmem:[#allocation31_spill] sm:$0xff] }
 0x451   : > { %v8140_v17 = vmax.f32 %v8139_v23, 0.0  ;;  %v8147_v23 = vld [vmem:[#allocation20_spill] sm:$0xff] }
 0x453   : > { %4321 = vmatmul.mubr.f32.gmra.mrb[82].mxu1 %v8134_v13  ;;  %v3018_v13 = vld [vmem:[#allocation3 + $0x30] sm:$0xff] }
 0x454   : > { %4325 = vmatprep.mubr.f32.mxu1 %v7702_v28 }
 0x457   : > { %4326 = vmatmul.mubr.f32.gmra.mrb[84].mxu1 %v8135_v36  ;;  %v8142_v36 = vld [vmem:[#allocation15_spill] sm:$0xff] }
 0x458   : > { %4330 = vmatprep.mubr.f32.mxu1 %v7710_v44 }
 0x45b   : > { %4331 = vmatmul.mubr.f32.gmra.mrb[86].mxu1 %v8136_v11  ;;  %v3019_v11 = vld [vmem:[#allocation3 + $0x38] sm:$0xff] }
 0x45c   : > { %4335 = vmatprep.mubr.f32.mxu1 %v7716_v9 }
 0x45f   : > { %4336 = vmatmul.mubr.f32.gmra.mrb[88].mxu1 %v8137_v21  ;;  %v8143_v21 = vld [vmem:[#allocation16_spill] sm:$0xff] }
 0x460   : > { %4340 = vmatprep.mubr.f32.mxu1 %v7726_v10 }
 0x463   : > { %4341 = vmatmul.mubr.f32.gmra.mrb[90].mxu1 %v8138_v53  ;;  %v8146_v53 = vld [vmem:[#allocation19_spill] sm:$0xff] }
 0x464   : > { %4345 = vmatprep.mubr.f32.mxu1 %v7869_v32 }
 0x467   : > { %4346 = vmatmul.mubr.f32.gmra.mrb[92].mxu1 %v8140_v17  ;;  %v8148_v17 = vld [vmem:[#allocation21_spill] sm:$0xff] }
 0x468   : > { %4350 = vmatprep.mubr.f32.mxu1 %v7874_v31 }
 0x46b   : > { %4351 = vmatmul.mubr.f32.gmra.mrb[94].mxu1 %v8141_v19  ;;  %v3026_v19 = vld [vmem:[#allocation3 + $0x90] sm:$0xff] }
 0x46c   : > { %4420 = vmatprep.mubr.f32.mxu1 %v7737_v57  ;;  %v8144_v57 = vld [vmem:[#allocation17_spill] sm:$0xff] }
 0x46f   : > { %4421 = vmatmul.mubr.f32.vlgmr.msra.gmra.mrb[32].mxu1 %v3018_v13  ;;  %v3028_v13 = vld [vmem:[#allocation3 + $0xa8] sm:$0xff] }
 0x470   : > { %4425 = vmatprep.mubr.f32.mxu1 %v7745_v33  ;;  %5767 = vmatpush3.bf16.msra.mxu1 %v8132_v0  ;;  %v3021_v33 = vld [vmem:[#allocation3 + $0x50] sm:$0xff]  ;;  %v8145_v0 = vld [vmem:[#allocation18_spill] sm:$0xff] }
 0x471   : > { %5760 = vmatprep.subr.bf16.mxu1 %v8142_v36 }
 0x473   : > { %4426 = vmatmul.mubr.f32.gmra.mrb[34].mxu1 %v3019_v11  ;;  %v3104_v11 = vld [vmem:[#allocation3 + $0x139] sm:$0xff] }
 0x474   : > { %4430 = vmatprep.mubr.f32.mxu1 %v7749_v41  ;;  %5768 = vmatpush3.bf16.msra.mxu1 %v8142_v36  ;;  %v3022_v41 = vld [vmem:[#allocation3 + $0x60] sm:$0xff] }
 0x475   : > { %5761 = vmatprep.subr.bf16.mxu1 %v8143_v21  ;;  %v3030_v36 = vld [vmem:[#allocation3 + $0xc0] sm:$0xff] }
 0x477   : > { %4431 = vmatmul.mubr.f32.gmra.mrb[36].mxu1 %v3020_v16  ;;  %v3106_v16 = vld [vmem:[#allocation3 + $0x151] sm:$0xff] }
 0x478   : > { %4435 = vmatprep.mubr.f32.mxu1 %v7757_v46  ;;  %5769 = vmatpush3.bf16.msra.mxu1 %v8143_v21  ;;  %v3023_v46 = vld [vmem:[#allocation3 + $0x68] sm:$0xff] }
 0x479   : > { %5762 = vmatprep.subr.bf16.mxu1 %v8144_v57  ;;  %v3105_v21 = vld [vmem:[#allocation3 + $0x141] sm:$0xff] }
 0x47b   : > { %4436 = vmatmul.mubr.f32.gmra.mrb[38].mxu1 %v3021_v33  ;;  %v3108_v33 = vld [vmem:[#allocation3 + $0x169] sm:$0xff] }
 0x47c   : > { %4440 = vmatprep.mubr.f32.mxu1 %v7761_v43  ;;  %5770 = vmatpush3.bf16.msra.mxu1 %v8144_v57  ;;  %v3024_v43 = vld [vmem:[#allocation3 + $0x78] sm:$0xff] }
 0x47d   : > { %5763 = vmatprep.subr.bf16.mxu1 %v8145_v0  ;;  %v3107_v57 = vld [vmem:[#allocation3 + $0x159] sm:$0xff] }
 0x47f   : > { %4441 = vmatmul.mubr.f32.gmra.mrb[40].mxu1 %v3022_v41  ;;  %v3045_v41 = vld [vmem:[#allocation3 + $0x170] sm:$0xff] }
 0x480   : > { %4445 = vmatprep.mubr.f32.mxu1 %v7769_v50  ;;  %5771 = vmatpush3.bf16.msra.mxu1 %v8145_v0  ;;  %v3025_v50 = vld [vmem:[#allocation3 + $0x80] sm:$0xff]  ;;  %v3109_v0 = vld [vmem:[#allocation3 + $0x171] sm:$0xff] }
 0x481   : > { %5764 = vmatprep.subr.bf16.mxu1 %v8146_v53 }
 0x483   : > { %4446 = vmatmul.mubr.f32.gmra.mrb[42].mxu1 %v3023_v46  ;;  %v3111_v46 = vld [vmem:[#allocation3 + $0x189] sm:$0xff] }
 0x484   : > { %4450 = vmatprep.mubr.f32.mxu1 %v7773_v29  ;;  %5772 = vmatpush3.bf16.msra.mxu1 %v8146_v53  ;;  %v3027_v29 = vld [vmem:[#allocation3 + $0x98] sm:$0xff]  ;;  %v3110_v53 = vld [vmem:[#allocation3 + $0x181] sm:$0xff] }
 0x485   : > { %5765 = vmatprep.subr.bf16.mxu1 %v8147_v23 }
 0x487   : > { %4451 = vmatmul.mubr.f32.gmra.mrb[44].mxu1 %v3024_v43  ;;  %v3113_v43 = vld [vmem:[#allocation3 + $0x1a1] sm:$0xff] }
 0x488   : > { %4455 = vmatprep.mubr.f32.mxu1 %v7781_v55  ;;  %5773 = vmatpush3.bf16.msra.mxu1 %v8147_v23  ;;  %v3029_v55 = vld [vmem:[#allocation3 + $0xb0] sm:$0xff]  ;;  %v3112_v23 = vld [vmem:[#allocation3 + $0x199] sm:$0xff] }
 0x489   : > { %5766 = vmatprep.subr.bf16.mxu1 %v8148_v17 }
 0x48b   : > { %4456 = vmatmul.mubr.f32.gmra.mrb[46].mxu1 %v3025_v50  ;;  %v7927_v50 = vld [vmem:[%s8036_s4] ss:$0 sm:$0xff] }
 0x48c   : > { %4460 = vmatprep.mubr.f32.mxu1 %v7785_v45  ;;  %5774 = vmatpush3.bf16.msra.mxu1 %v8148_v17  ;;  %v3031_v45 = vld [vmem:[#allocation3 + $0xc8] sm:$0xff]  ;;  %v6288_v17 = vld [vmem:[#allocation2] sm:$0xff] }
 0x48f   : > { %4461 = vmatmul.mubr.f32.gmra.mrb[48].mxu1 %v3026_v19 }
 0x490   : > { %4465 = vmatprep.mubr.f32.mxu1 %v7793_v56  ;;  %v3032_v56 = vld [vmem:[#allocation3 + $0xd8] sm:$0xff] }
 0x493   : > { %4466 = vmatmul.mubr.f32.gmra.mrb[50].mxu1 %v3027_v29 }
 0x494   : > { %4470 = vmatprep.mubr.f32.mxu1 %v7797_v54  ;;  %v3033_v54 = vld [vmem:[#allocation3 + $0xe0] sm:$0xff] }
 0x497   : > { %4471 = vmatmul.mubr.f32.gmra.mrb[52].mxu1 %v3028_v13 }
 0x498   : > { %4475 = vmatprep.mubr.f32.mxu1 %v7805_v18  ;;  %v3034_v18 = vld [vmem:[#allocation3 + $0xf0] sm:$0xff] }
 0x49b   : > { %4476 = vmatmul.mubr.f32.gmra.mrb[54].mxu1 %v3029_v55  ;;  %v3643_v55 = vld [vmem:[#allocation2 + $0x21] sm:$0xff] }
 0x49c   : > { %4480 = vmatprep.mubr.f32.mxu1 %v7809_v7  ;;  %v3035_v7 = vld [vmem:[#allocation3 + $0xf8] sm:$0xff] }
 0x49f   : > { %4481 = vmatmul.mubr.f32.gmra.mrb[56].mxu1 %v3030_v36 }
 0x4a0   : > { %4485 = vmatprep.mubr.f32.mxu1 %v7817_v62  ;;  %v3036_v62 = vld [vmem:[#allocation3 + $0x108] sm:$0xff] }
 0x4a3   : > { %4486 = vmatmul.mubr.f32.gmra.mrb[58].mxu1 %v3031_v45 }
 0x4a4   : > { %4490 = vmatprep.mubr.f32.mxu1 %v7822_v35  ;;  %v3037_v35 = vld [vmem:[#allocation3 + $0x110] sm:$0xff] }
 0x4a7   : > { %4491 = vmatmul.mubr.f32.gmra.mrb[60].mxu1 %v3032_v56 }
 0x4a8   : > { %4495 = vmatprep.mubr.f32.mxu1 %v7830_v8  ;;  %v3038_v8 = vld [vmem:[#allocation3 + $0x120] sm:$0xff] }
 0x4ab   : > { %4496 = vmatmul.mubr.f32.gmra.mrb[62].mxu1 %v3033_v54 }
 0x4ac   : > { %4500 = vmatprep.mubr.f32.mxu1 %v7834_v34  ;;  %v3039_v34 = vld [vmem:[#allocation3 + $0x128] sm:$0xff] }
 0x4af   : > { %4501 = vmatmul.mubr.f32.gmra.mrb[64].mxu1 %v3034_v18 }
 0x4b0   : > { %4505 = vmatprep.mubr.f32.mxu1 %v7838_v63  ;;  %v3040_v63 = vld [vmem:[#allocation3 + $0x138] sm:$0xff] }
 0x4b3   : > { %4506 = vmatmul.mubr.f32.gmra.mrb[66].mxu1 %v3035_v7 }
 0x4b4   : > { %4510 = vmatprep.mubr.f32.mxu1 %v7842_v51  ;;  %v3041_v51 = vld [vmem:[#allocation3 + $0x140] sm:$0xff] }
 0x4b7   : > { %4511 = vmatmul.mubr.f32.gmra.mrb[68].mxu1 %v3036_v62  ;;  %v3644_v62 = vld [vmem:[#allocation2 + $0x31] sm:$0xff] }
 0x4b8   : > { %4515 = vmatprep.mubr.f32.mxu1 %v7846_v47  ;;  %v3042_v47 = vld [vmem:[#allocation3 + $0x150] sm:$0xff] }
 0x4bb   : > { %4516 = vmatmul.mubr.f32.gmra.mrb[70].mxu1 %v3037_v35 }
 0x4bc   : > { %4520 = vmatprep.mubr.f32.mxu1 %v7850_v60  ;;  %v3043_v60 = vld [vmem:[#allocation3 + $0x158] sm:$0xff] }
 0x4bf   : > { %4521 = vmatmul.mubr.f32.gmra.mrb[72].mxu1 %v3038_v8 }
 0x4c0   : > { %4525 = vmatprep.mubr.f32.mxu1 %v7854_v42  ;;  %v3044_v42 = vld [vmem:[#allocation3 + $0x168] sm:$0xff] }
 0x4c3   : > { %4526 = vmatmul.mubr.f32.gmra.mrb[74].mxu1 %v3039_v34 }
 0x4c4   : > { %4530 = vmatprep.mubr.f32.mxu1 %v3104_v11 }
 0x4c7   : > { %4531 = vmatmul.mubr.f32.gmra.mrb[76].mxu1 %v3040_v63 }
 0x4c8   : > { %4535 = vmatprep.mubr.f32.mxu1 %v3105_v21  ;;  %v3645_v21 = vld [vmem:[#allocation2 + $0x39] sm:$0xff] }
 0x4cb   : > { %4536 = vmatmul.mubr.f32.gmra.mrb[78].mxu1 %v3041_v51 }
 0x4cc   : > { %4540 = vmatprep.mubr.f32.mxu1 %v3106_v16 }
 0x4cf   : > { %4541 = vmatmul.mubr.f32.gmra.mrb[80].mxu1 %v3042_v47 }
 0x4d0   : > { %4545 = vmatprep.mubr.f32.mxu1 %v3107_v57 }
 0x4d3   : > { %4546 = vmatmul.mubr.f32.gmra.mrb[82].mxu1 %v3043_v60 }
 0x4d4   : > { %4550 = vmatprep.mubr.f32.mxu1 %v3108_v33  ;;  %v3646_v33 = vld [vmem:[#allocation2 + $0x49] sm:$0xff] }
 0x4d7   : > { %4551 = vmatmul.mubr.f32.gmra.mrb[84].mxu1 %v3044_v42 }
 0x4d8   : > { %4555 = vmatprep.mubr.f32.mxu1 %v3109_v0 }
 0x4db   : > { %4556 = vmatmul.mubr.f32.gmra.mrb[86].mxu1 %v3045_v41 }
 0x4dc   : > { %4560 = vmatprep.mubr.f32.mxu1 %v3110_v53 }
 0x4df   : > { %4561 = vmatmul.mubr.f32.gmra.mrb[88].mxu1 %v7713_v30  ;;  %v3176_v30 = vld [vmem:[#allocation3 + $0x19a] sm:$0xff] }
 0x4e0   : > { %4565 = vmatprep.mubr.f32.mxu1 %v3111_v46 }
 0x4e3   : > { %4566 = vmatmul.mubr.f32.gmra.mrb[90].mxu1 %v7721_v5  ;;  %v3177_v5 = vld [vmem:[#allocation3 + $0x1a2] sm:$0xff] }
 0x4e4   : > { %4570 = vmatprep.mubr.f32.mxu1 %v3112_v23  ;;  %v3647_v23 = vld [vmem:[#allocation2 + $0x51] sm:$0xff] }
 0x4e7   : > { %4571 = vmatmul.mubr.f32.gmra.mrb[92].mxu1 %v6288_v17 }
 0x4e8   : > { %4575 = vmatprep.mubr.f32.mxu1 %v3113_v43 }
 0x4eb   : > { %4576 = vmatmul.mubr.f32.gmra.mrb[94].mxu1 %v6288_v17 }
 0x4ec   : > { %5299 = vmatprep.mubr.f32.mxu1 %v7702_v28 }
 0x4ef   : > { %5300 = vmatmul.mubr.f32.vlgmr.msra.gmra.mrb[96].mxu1 %v7710_v44 }
 0x4f0   : > { %5302 = vmatprep.mubr.f32.mxu1 %v7716_v9  ;;  %v3642_v9 = vld [vmem:[#allocation2 + $0x19] sm:$0xff] }
 0x4f3   : > { %5303 = vmatmul.mubr.f32.gmra.mrb[98].mxu1 %v7726_v10 }
 0x4f4   : > { %5305 = vmatprep.mubr.f32.mxu1 %v7869_v32 }
 0x4f7   : > { %5306 = vmatmul.mubr.f32.gmra.mrb[100].mxu1 %v7874_v31 }
 0x4f8   : > { %5308 = vmatprep.mubr.f32.mxu1 %v3176_v30 }
 0x4fb   : > { %5309 = vmatmul.mubr.f32.gmra.mrb[102].mxu1 %v3177_v5 }
 0x542   : > { %v4422_v28 = vpop.f32.mrb[32].mxu1 }
 0x543   : > { %v5807_v44 = vadd.f32 %v7927_v50, %v4422_v28  ;;  %v4424_v19 = vpop.f32.mrb[33].mxu1 }
 0x545   : > { %v4648_v10 = vadd.f32 %v5807_v44, %v7697_v37  ;;  %v3648_v44 = vld [vmem:[#allocation2 + $0x61] sm:$0xff] }
 0x546   : > { %v4427_v29 = vpop.f32.mrb[34].mxu1 }
 0x547   : > { %v5808_v32 = vadd.f32 %v7927_v50, %v4427_v29  ;;  %v4429_v13 = vpop.f32.mrb[35].mxu1  ;;  %v4806_v31 = vadd.f32 %v4648_v10, %v3642_v9 }
 0x548   : > { %v3649_v13 = vld [vmem:[#allocation2 + $0x69] sm:$0xff] }
 0x549   : > { %v4653_v36 = vadd.f32 %v5808_v32, %v7694_v52  ;;  %v4838_v45 = vmax.f32 %v4806_v31, 0.0 }
 0x54a   : > { %v4432_v56 = vpop.f32.mrb[36].mxu1 }
 0x54b   : > { %v5809_v54 = vadd.f32 %v7927_v50, %v4432_v56  ;;  %v4434_v18 = vpop.f32.mrb[37].mxu1  ;;  %4870 = vxpose.xlu0.b32.start [1/16] (narrow) %v4838_v45, 8  ;;  %v4807_v7 = vadd.f32 %v4653_v36, %v3643_v55 }
 0x54d   : > { %v4658_v35 = vadd.f32 %v5809_v54, %v7707_v6  ;;  %v4839_v8 = vmax.f32 %v4807_v7, 0.0  ;;  %v3650_v54 = vld [vmem:[#allocation2 + $0x79] sm:$0xff] }
 0x54e   : > { %v4437_v37 = vpop.f32.mrb[38].mxu1 }
 0x54f   : > { %v5810_v34 = vadd.f32 %v7927_v50, %v4437_v37  ;;  %v4439_v11 = vpop.f32.mrb[39].mxu1  ;;  %4871 = vxpose.xlu0.b32.cont [2/16] (narrow) %v4839_v8, 8  ;;  %v4808_v63 = vadd.f32 %v4658_v35, %v3644_v62  ;;  %v3651_v37 = vld [vmem:[#allocation2 + $0x81] sm:$0xff] }
 0x551   : > { %v4663_v52 = vadd.f32 %v5810_v34, %v7704_v38  ;;  %v4840_v51 = vmax.f32 %v4808_v63, 0.0 }
 0x552   : > { %v4442_v16 = vpop.f32.mrb[40].mxu1 }
 0x553   : > { %v5811_v47 = vadd.f32 %v7927_v50, %v4442_v16  ;;  %v4444_v57 = vpop.f32.mrb[41].mxu1  ;;  %4872 = vxpose.xlu0.b32.cont [3/16] (narrow) %v4840_v51, 8  ;;  %v4809_v60 = vadd.f32 %v4663_v52, %v3645_v21  ;;  %v3652_v51 = vld [vmem:[#allocation2 + $0x91] sm:$0xff] }
 0x555   : > { %v4668_v6 = vadd.f32 %v5811_v47, %v7723_v24  ;;  %v4841_v42 = vmax.f32 %v4809_v60, 0.0 }
 0x556   : > { %v4447_v0 = vpop.f32.mrb[42].mxu1 }
 0x557   : > { %v5812_v41 = vadd.f32 %v7927_v50, %v4447_v0  ;;  %v4449_v53 = vpop.f32.mrb[43].mxu1  ;;  %4873 = vxpose.xlu0.b32.cont [4/16] (narrow) %v4841_v42, 8  ;;  %v4810_v46 = vadd.f32 %v4668_v6, %v3646_v33  ;;  %v3653_v6 = vld [vmem:[#allocation2 + $0x99] sm:$0xff] }
 0x559   : > { %v4673_v38 = vadd.f32 %v5812_v41, %v7718_v61  ;;  %v4842_v43 = vmax.f32 %v4810_v46, 0.0 }
 0x55a   : > { %v4452_v17 = vpop.f32.mrb[44].mxu1 }
 0x55b   : > { %v5813_v30 = vadd.f32 %v7927_v50, %v4452_v17  ;;  %v4454_v5 = vpop.f32.mrb[45].mxu1  ;;  %4874 = vxpose.xlu0.b32.cont [5/16] (narrow) %v4842_v43, 8  ;;  %v4811_v28 = vadd.f32 %v4673_v38, %v3647_v23  ;;  %v3654_v23 = vld [vmem:[#allocation2 + $0xa9] sm:$0xff] }
 0x55d   : > { %v4678_v24 = vadd.f32 %v5813_v30, %v7732_v59  ;;  %v4843_v19 = vmax.f32 %v4811_v28, 0.0  ;;  %v3655_v28 = vld [vmem:[#allocation2 + $0xb1] sm:$0xff] }
 0x55e   : > { %v4457_v9 = vpop.f32.mrb[46].mxu1 }
 0x55f   : > { %v5814_v10 = vadd.f32 %v7927_v50, %v4457_v9  ;;  %v4459_v29 = vpop.f32.mrb[47].mxu1  ;;  %4875 = vxpose.xlu0.b32.cont [6/16] (narrow) %v4843_v19, 8  ;;  %v4812_v32 = vadd.f32 %v4678_v24, %v3648_v44 }
 0x560   : > { %v3656_v29 = vld [vmem:[#allocation2 + $0xc1] sm:$0xff] }
 0x561   : > { %v4683_v61 = vadd.f32 %v5814_v10, %v7730_v15  ;;  %v4844_v31 = vmax.f32 %v4812_v32, 0.0 }
 0x562   : > { %v4462_v55 = vpop.f32.mrb[48].mxu1 }
 0x563   : > { %v5815_v36 = vadd.f32 %v7927_v50, %v4462_v55  ;;  %v4464_v45 = vpop.f32.mrb[49].mxu1  ;;  %4876 = vxpose.xlu0.b32.cont [7/16] (narrow) %v4844_v31, 8  ;;  %v4813_v56 = vadd.f32 %v4683_v61, %v3649_v13 }
 0x565   : > { %v4688_v59 = vadd.f32 %v5815_v36, %v7742_v22  ;;  %v4845_v18 = vmax.f32 %v4813_v56, 0.0  ;;  %v3657_v36 = vld [vmem:[#allocation2 + $0xc9] sm:$0xff] }
 0x566   : > { %v4467_v7 = vpop.f32.mrb[50].mxu1 }
 0x567   : > { %v5816_v62 = vadd.f32 %v7927_v50, %v4467_v7  ;;  %v4469_v35 = vpop.f32.mrb[51].mxu1  ;;  %4877 = vxpose.xlu0.b32.cont [8/16] (narrow) %v4845_v18, 8  ;;  %v4814_v8 = vadd.f32 %v4688_v59, %v3650_v54  ;;  %v3658_v7 = vld [vmem:[#allocation2 + $0xd9] sm:$0xff] }
 0x569   : > { %v4693_v15 = vadd.f32 %v5816_v62, %v7739_v14  ;;  %v4846_v34 = vmax.f32 %v4814_v8, 0.0 }
 0x56a   : > { %v4472_v11 = vpop.f32.mrb[52].mxu1 }
 0x56b   : > { %v5817_v63 = vadd.f32 %v7927_v50, %v4472_v11  ;;  %v4474_v21 = vpop.f32.mrb[53].mxu1  ;;  %4878 = vxpose.xlu0.b32.cont [9/16] (narrow) %v4846_v34, 8  ;;  %v4815_v52 = vadd.f32 %v4693_v15, %v3651_v37  ;;  %v3659_v34 = vld [vmem:[#allocation2 + $0xe1] sm:$0xff] }
 0x56d   : > { %v4698_v22 = vadd.f32 %v5817_v63, %v7754_v4  ;;  %v4847_v16 = vmax.f32 %v4815_v52, 0.0 }
 0x56e   : > { %v4477_v47 = vpop.f32.mrb[54].mxu1 }
 0x56f   : > { %v5818_v57 = vadd.f32 %v7927_v50, %v4477_v47  ;;  %v4479_v60 = vpop.f32.mrb[55].mxu1  ;;  %4879 = vxpose.xlu0.b32.cont [10/16] (narrow) %v4847_v16, 8  ;;  %v4816_v33 = vadd.f32 %v4698_v22, %v3652_v51  ;;  %v3660_v22 = vld [vmem:[#allocation2 + $0xf1] sm:$0xff] }
 0x571   : > { %v4703_v14 = vadd.f32 %v5818_v57, %v7751_v39  ;;  %v4848_v42 = vmax.f32 %v4816_v33, 0.0 }
 0x572   : > { %v4482_v0 = vpop.f32.mrb[56].mxu1 }
 0x573   : > { %v5819_v41 = vadd.f32 %v7927_v50, %v4482_v0  ;;  %v4484_v53 = vpop.f32.mrb[57].mxu1  ;;  %4880 = vxpose.xlu0.b32.cont [11/16] (narrow) %v4848_v42, 8  ;;  %v4817_v46 = vadd.f32 %v4703_v14, %v3653_v6  ;;  %v3661_v6 = vld [vmem:[#allocation2 + $0xf9] sm:$0xff] }
 0x575   : > { %v4708_v4 = vadd.f32 %v5819_v41, %v7766_v26  ;;  %v4849_v38 = vmax.f32 %v4817_v46, 0.0  ;;  %v3662_v46 = vld [vmem:[#allocation2 + $0x109] sm:$0xff] }
 0x576   : > { %v4487_v43 = vpop.f32.mrb[58].mxu1 }
 0x577   : > { %v5820_v17 = vadd.f32 %v7927_v50, %v4487_v43  ;;  %v4489_v30 = vpop.f32.mrb[59].mxu1  ;;  %4881 = vxpose.xlu0.b32.cont [12/16] (narrow) %v4849_v38, 8  ;;  %v4818_v5 = vadd.f32 %v4708_v4, %v3654_v23 }
 0x578   : > { %v3663_v30 = vld [vmem:[#allocation2 + $0x111] sm:$0xff] }
 0x579   : > { %v4713_v39 = vadd.f32 %v5820_v17, %v7763_v49  ;;  %v4850_v44 = vmax.f32 %v4818_v5, 0.0 }
 0x57a   : > { %v4492_v24 = vpop.f32.mrb[60].mxu1 }
 0x57b   : > { %v5821_v19 = vadd.f32 %v7927_v50, %v4492_v24  ;;  %v4494_v9 = vpop.f32.mrb[61].mxu1  ;;  %4882 = vxpose.xlu0.b32.cont [13/16] (narrow) %v4850_v44, 8  ;;  %v4819_v10 = vadd.f32 %v4713_v39, %v3655_v28 }
 0x57d   : > { %v4718_v26 = vadd.f32 %v5821_v19, %v7778_v40  ;;  %v4851_v32 = vmax.f32 %v4819_v10, 0.0  ;;  %v3664_v19 = vld [vmem:[#allocation2 + $0x121] sm:$0xff] }
 0x57e   : > { %v4497_v13 = vpop.f32.mrb[62].mxu1 }
 0x57f   : > { %v5822_v61 = vadd.f32 %v7927_v50, %v4497_v13  ;;  %v4499_v31 = vpop.f32.mrb[63].mxu1  ;;  %4883 = vxpose.xlu0.b32.cont [14/16] (narrow) %v4851_v32, 8  ;;  %v4820_v55 = vadd.f32 %v4718_v26, %v3656_v29  ;;  %v3665_v13 = vld [vmem:[#allocation2 + $0x129] sm:$0xff] }
 0x581   : > { %v4723_v49 = vadd.f32 %v5822_v61, %v7775_v25  ;;  %v4852_v45 = vmax.f32 %v4820_v55, 0.0 }
 0x582   : > { %v4502_v56 = vpop.f32.mrb[64].mxu1 }
 0x583   : > { %v5823_v54 = vadd.f32 %v7927_v50, %v4502_v56  ;;  %v4504_v59 = vpop.f32.mrb[65].mxu1  ;;  %4884 = vxpose.xlu0.b32.cont [15/16] (narrow) %v4852_v45, 8  ;;  %v4821_v18 = vadd.f32 %v4723_v49, %v3657_v36 }
 0x585   : > { %v4853_v62 = vmax.f32 %v4821_v18, 0.0  ;;  %v4728_v40 = vadd.f32 %v5823_v54, %v7790_v27 }
 0x586   : > { %v4507_v35 = vpop.f32.mrb[66].mxu1 }
 0x587   : > { %v5824_v8 = vadd.f32 %v7927_v50, %v4507_v35  ;;  %v4509_v37 = vpop.f32.mrb[67].mxu1  ;;  %4885 = vxpose.xlu0.b32.end [16/16] (narrow) %v4853_v62, 8  ;;  %v4822_v15 = vadd.f32 %v4728_v40, %v3658_v7 }
 0x589   : > { %v4733_v25 = vadd.f32 %v5824_v8, %v7787_v3  ;;  %v4854_v11 = vmax.f32 %v4822_v15, 0.0 }
 0x58a   : > { %v4512_v63 = vpop.f32.mrb[68].mxu1 }
 0x58b   : > { %v5825_v21 = vadd.f32 %v7927_v50, %v4512_v63  ;;  %v4514_v52 = vpop.f32.mrb[69].mxu1  ;;  %4902 = vxpose.xlu1.b32.start [1/16] (narrow) %v4854_v11, 8  ;;  %v4823_v51 = vadd.f32 %v4733_v25, %v3659_v34 }
 0x58c   : > { %v3666_v52 = vld [vmem:[#allocation2 + $0x139] sm:$0xff] }
 0x58d   : > { %v4738_v16 = vadd.f32 %v5825_v21, %v7802_v20  ;;  %v4855_v27 = vmax.f32 %v4823_v51, 0.0 }
 0x58e   : > { %v4517_v47 = vpop.f32.mrb[70].mxu1 }
 0x58f   : > { %v5826_v57 = vadd.f32 %v7927_v50, %v4517_v47  ;;  %v4519_v60 = vpop.f32.mrb[71].mxu1  ;;  %4903 = vxpose.xlu1.b32.cont [2/16] (narrow) %v4855_v27, 8  ;;  %v4824_v33 = vadd.f32 %v4738_v16, %v3660_v22  ;;  %v3667_v16 = vld [vmem:[#allocation2 + $0x141] sm:$0xff] }
 0x591   : > { %v4743_v3 = vadd.f32 %v5826_v57, %v7799_v2  ;;  %v4856_v14 = vmax.f32 %v4824_v33, 0.0 }
 0x592   : > { %v4522_v42 = vpop.f32.mrb[72].mxu1 }
 0x593   : > { %v5827_v0 = vadd.f32 %v7927_v50, %v4522_v42  ;;  %v4524_v41 = vpop.f32.mrb[73].mxu1  ;;  %4904 = vxpose.xlu1.b32.cont [3/16] (narrow) %v4856_v14, 8  ;;  %v4825_v53 = vadd.f32 %v4743_v3, %v3661_v6 }
 0x595   : > { %v4748_v20 = vadd.f32 %v5827_v0, %v7814_v12  ;;  %v4857_v23 = vmax.f32 %v4825_v53, 0.0  ;;  %v3668_v0 = vld [vmem:[#allocation2 + $0x151] sm:$0xff] }
 0x596   : > { %v4527_v4 = vpop.f32.mrb[74].mxu1 }
 0x597   : > { %v5828_v38 = vadd.f32 %v7927_v50, %v4527_v4  ;;  %v4529_v43 = vpop.f32.mrb[75].mxu1  ;;  %4905 = vxpose.xlu1.b32.cont [4/16] (narrow) %v4857_v23, 8  ;;  %v4826_v17 = vadd.f32 %v4748_v20, %v3662_v46 }
 0x599   : > { %v4753_v2 = vadd.f32 %v5828_v38, %v7811_v1  ;;  %v4858_v5 = vmax.f32 %v4826_v17, 0.0  ;;  %v3669_v17 = vld [vmem:[#allocation2 + $0x159] sm:$0xff] }
 0x59a   : > { %v4532_v28 = vpop.f32.mrb[76].mxu1 }
 0x59b   : > { %v5829_v39 = vadd.f32 %v7927_v50, %v4532_v28  ;;  %v4534_v44 = vpop.f32.mrb[77].mxu1  ;;  %4906 = vxpose.xlu1.b32.cont [5/16] (narrow) %v4858_v5, 8  ;;  %v4827_v24 = vadd.f32 %v4753_v2, %v3663_v30 }
 0x59d   : > { %v4758_v12 = vadd.f32 %v5829_v39, %v7827_v58  ;;  %v4859_v9 = vmax.f32 %v4827_v24, 0.0 }
 0x59e   : > { %v4537_v10 = vpop.f32.mrb[78].mxu1 }
 0x59f   : > { %v5830_v29 = vadd.f32 %v7927_v50, %v4537_v10  ;;  %v4539_v26 = vpop.f32.mrb[79].mxu1  ;;  %4907 = vxpose.xlu1.b32.cont [6/16] (narrow) %v4859_v9, 8  ;;  %v4828_v32 = vadd.f32 %v4758_v12, %v3664_v19  ;;  %v3670_v19 = vld [vmem:[#allocation2 + $0x169] sm:$0xff]  ;;  %v3671_v10 = vld [vmem:[#allocation2 + $0x171] sm:$0xff] }
 0x5a1   : > { %v4763_v1 = vadd.f32 %v5830_v29, %v7824_v48  ;;  %v4860_v61 = vmax.f32 %v4828_v32, 0.0  ;;  %v3672_v32 = vld [vmem:[#allocation2 + $0x181] sm:$0xff] }
 0x5a2   : > { %v4542_v31 = vpop.f32.mrb[80].mxu1 }
 0x5a3   : > { %v4544_v55 = vpop.f32.mrb[81].mxu1  ;;  %4908 = vxpose.xlu1.b32.cont [7/16] (narrow) %v4860_v61, 8  ;;  %v4829_v36 = vadd.f32 %v4763_v1, %v3665_v13  ;;  %v5831_v25 = vadd.f32 %v7927_v50, %v4542_v31  ;;  %v3673_v1 = vld [vmem:[#allocation2 + $0x189] sm:$0xff] }
 0x5a5   : > { %v4861_v49 = vmax.f32 %v4829_v36, 0.0 }
 0x5a6   : > { %v4547_v45 = vpop.f32.mrb[82].mxu1 }
 0x5a7   : > { %v4549_v56 = vpop.f32.mrb[83].mxu1  ;;  %4909 = vxpose.xlu1.b32.cont [8/16] (narrow) %v4861_v49, 8  ;;  %v5832_v34 = vadd.f32 %v7927_v50, %v4547_v45 }
 0x5aa   : > { %v4552_v58 = vpop.f32.mrb[84].mxu1 }
 0x5ab   : > { %v4554_v54 = vpop.f32.mrb[85].mxu1  ;;  %v5833_v27 = vadd.f32 %v7927_v50, %v4552_v58 }
 0x5ae   : > { %v4557_v59 = vpop.f32.mrb[86].mxu1 }
 0x5af   : > { %v4559_v18 = vpop.f32.mrb[87].mxu1  ;;  %v5834_v22 = vadd.f32 %v7927_v50, %v4557_v59 }
 0x5b2   : > { %v4562_v7 = vpop.f32.mrb[88].mxu1 }
 0x5b3   : > { %v4564_v62 = vpop.f32.mrb[89].mxu1  ;;  %v5835_v41 = vadd.f32 %v7927_v50, %v4562_v7 }
 0x5b6   : > { %v4567_v40 = vpop.f32.mrb[90].mxu1 }
 0x5b7   : > { %v4569_v35 = vpop.f32.mrb[91].mxu1  ;;  %v5836_v42 = vadd.f32 %v7927_v50, %v4567_v40 }
 0x5ba   : > { %v4572_v8 = vpop.f32.mrb[92].mxu1 }
 0x5bb   : > { %v4574_v37 = vpop.f32.mrb[93].mxu1  ;;  %v5837_v30 = vadd.f32 %v7927_v50, %v4572_v8 }
 0x5be   : > { %v4577_v48 = vpop.f32.mrb[94].mxu1 }
 0x5bf   : > { %v4579_v15 = vpop.f32.mrb[95].mxu1  ;;  %v5838_v43 = vadd.f32 %v7927_v50, %v4577_v48 }
 0x5c2   : > { %v5301_v11 = vpop.f32.mrb[96].mxu1 }
 0x5c3   : > { %v4773_v63 = vadd.f32 %v5832_v34, %v5301_v11  ;;  %v4767_v21 = vpop.f32.mrb[97].mxu1 }
 0x5c4   : > { %v4768_v51 = vadd.f32 %v5831_v25, %v4767_v21 }
 0x5c5   : > { %v4831_v14 = vadd.f32 %v4773_v63, %v3667_v16 }
 0x5c6   : > { %v5304_v47 = vpop.f32.mrb[98].mxu1  ;;  %v4830_v57 = vadd.f32 %v4768_v51, %v3666_v52 }
 0x5c7   : > { %v4783_v60 = vadd.f32 %v5834_v22, %v5304_v47  ;;  %v4777_v33 = vpop.f32.mrb[99].mxu1  ;;  %v4863_v4 = vmax.f32 %v4831_v14, 0.0 }
 0x5c8   : > { %v4778_v6 = vadd.f32 %v5833_v27, %v4777_v33  ;;  %v4862_v3 = vmax.f32 %v4830_v57, 0.0 }
 0x5c9   : > { %v4833_v24 = vadd.f32 %v4783_v60, %v3669_v17 }
 0x5ca   : > { %v5307_v53 = vpop.f32.mrb[100].mxu1  ;;  %4910 = vxpose.xlu1.b32.cont [9/16] (narrow) %v4862_v3, 8  ;;  %v4832_v38 = vadd.f32 %v4778_v6, %v3668_v0 }
 0x5cb   : > { %v4793_v46 = vadd.f32 %v5836_v42, %v5307_v53  ;;  %v4787_v20 = vpop.f32.mrb[101].mxu1  ;;  %v4865_v12 = vmax.f32 %v4833_v24, 0.0  ;;  %v4886_v36 = vpop.trf.xlu0 }
 0x5cc   : > { %v4788_v23 = vadd.f32 %v5835_v41, %v4787_v20  ;;  %v4864_v44 = vmax.f32 %v4832_v38, 0.0 }
 0x5cd   : > { %v4835_v26 = vadd.f32 %v4793_v46, %v3671_v10 }
 0x5ce   : > { %v5310_v2 = vpop.f32.mrb[102].mxu1  ;;  %4911 = vxpose.xlu1.b32.cont [10/16] (narrow) %v4863_v4, 8  ;;  %v4834_v9 = vadd.f32 %v4788_v23, %v3670_v19 }
 0x5cf   : > { %v4803_v5 = vadd.f32 %v5838_v43, %v5310_v2  ;;  %v4797_v28 = vpop.f32.mrb[103].mxu1  ;;  %v4867_v50 = vmax.f32 %v4835_v26, 0.0 }
 0x5d0   : > { %v4798_v39 = vadd.f32 %v5837_v30, %v4797_v28  ;;  %v4866_v29 = vmax.f32 %v4834_v9, 0.0 }
 0x5d1   : > { %v4837_v31 = vadd.f32 %v4803_v5, %v3673_v1 }
 0x5d2   : > { %4912 = vxpose.xlu1.b32.cont [11/16] (narrow) %v4864_v44, 8  ;;  %v4836_v13 = vadd.f32 %v4798_v39, %v3672_v32 }
 0x5d3   : > { %v4869_v55 = vmax.f32 %v4837_v31, 0.0 }
 0x5d4   : > { %v4868_v61 = vmax.f32 %v4836_v13, 0.0 }
 0x5d6   : > { %4913 = vxpose.xlu1.b32.cont [12/16] (narrow) %v4865_v12, 8 }
 0x5da   : > { %4914 = vxpose.xlu1.b32.cont [13/16] (narrow) %v4866_v29, 8 }
 0x5de   : > { %4915 = vxpose.xlu1.b32.cont [14/16] (narrow) %v4867_v50, 8 }
 0x5e2   : > { %4916 = vxpose.xlu1.b32.cont [15/16] (narrow) %v4868_v61, 8 }
 0x5e6   : > { %4917 = vxpose.xlu1.b32.end [16/16] (narrow) %v4869_v55, 8 }
 0x62a   : > { %v4918_v49 = vpop.trf.xlu1 }
 0x62b   : > { %v4936_v45 = vcombine.low %v4886_v36, %v4918_v49 }
 0x62d   : > { %4938 = vst [vmem:[%s247_s17] sm:$0xff] %v4936_v45 }
 0x62e   : > { %6358 = shalt.err (!%p6355_p11)
}
 0x62f   : > { %s6359_s9 = scalar_lea.hbm %s7990_s30, 128  ;;  %s6363_s13 = scalar_lea.hbm %s8037_s5, 256 }
 0x630   : > { %p6360_p13 = scmp.ne.s32.totalorder %s7990_s30, %s6359_s9  ;;  %p6364_p6 = scmp.lt.u32.totalorder %s7990_s30, %s8037_s5 }
 0x631   : > { %p6365_p9 = scmp.lt.u32.totalorder %s6363_s13, %s6359_s9  ;;  %p6367_p10 = scmp.lt.u32.totalorder %s6359_s9, %s7990_s30 }
 0x632   : > { %p6361_p5 = pnand %p6360_p13, %p8149_p1 }
 0x633   : > { %p6366_p12 = por %p6365_p9, %p6364_p6 }
 0x634   : > { %p6362_p0 = pneg %p6361_p5 }
 0x635   : > { %p6368_p2 = por %p6367_p10, %p6366_p12 }
 0x637   : > { %p6369_p3 = pnand %p6368_p2, %p6362_p0 }
 0x639   : > { %6372 = shalt.err (!%p6369_p3)
}
 0x63a   : > { %6231 = dma.vmem_to_hbm [thread:$0]  (%p8149_p1), %s7992_s7, 128, %s7990_s30, %s4940_s8  }
 0x63b PF: > { %p6248_p4 = scmp.ge.s32.totalorder %s6415_s21, 2  ;;  %s4966_s16 = sand.u32 1, %s6403_s18  }
 0x63c   : > { %p8150_p7 = scmp.ne.s32.totalorder %s8084_s29, 0  ;;  %s4967_s17 = scalar_lea.sflag [#allocation7], %s4966_s16 }
 0x63e   : > { %p6241_p8 = pnand %p6248_p4, %p8150_p7 }
 0x640   : > { %6398 = dma.done.wait (!%p6241_p8), %s4967_s17, 128  }
 0x641   : > { %6400 = vsyncadd (!%p6241_p8), %s4967_s17, 4294967168  ;;  %p17_p11 = scmp.ge.s32.totalorder %s6479_s24, 4   ;;  %s8151_s18 = smov %s6407_s19 }
 0x642   : > { %s8152_s19 = smov %s6411_s20  ;;  %s8153_s20 = smov %s6490_s27 }
 0x643   : > { %s8154_s21 = smov %s6479_s24  ;;  %19 = sbr.rel (!%p17_p11) target bundleno = 5 (0x5), region = 88 }
 0x64a   :  { %4972 = vsyncpa [#allocation6], 1 }
 0x64b   :  { %4974 = vsyncpa [#allocation6 + $0x1], 1 }
 0x64c   :  { %4975 = vsyncpa [#allocation9], 1 }
 0x64d   :  { %4976 = vsyncpa [#allocation7], 1 }
 0x64e   :  { %4978 = vsyncpa [#allocation7 + $0x1], 1 }

</bundles_post_ra>
